<compile_context>
chip_gen: v5e
topology: v5e:2x2
jax: 0.10.0
libtpu: 0.0.40
codegen_flags: <defaults>
</compile_context>

<pallas_src>
import functools
import math

import jax
import jax.numpy as jnp
from jax import lax
from jax.experimental import pallas as pl
from jax.experimental.pallas import tpu as pltpu

# Reference and in-kernel f32 matmuls use the same (full) MXU precision.
jax.config.update("jax_default_matmul_precision", "highest")

_VMEM_LIMIT = 32 * 1024 * 1024   # fits the scoped VMEM budget on v5e / v6e / v7x


# --------------------------------------------------------------------------------------
# Small helpers (used while tracing the kernel bodies)
# --------------------------------------------------------------------------------------
def _const_spec(shape):
    """BlockSpec for a grid-invariant operand (weights / biases / LN params)."""
    zeros = (0,) * len(shape)
    return pl.BlockSpec(shape, lambda i: zeros)


def _mask_spec(mask):
    """BlockSpec for a mask kept at its natural (1|B, rows, cols) shape."""
    if mask.shape[0] == 1:
        idx = lambda i: (0, 0, 0)
    else:
        idx = lambda i: (i, 0, 0)
    return pl.BlockSpec((None,) + mask.shape[1:], idx)


def _layernorm(x, gamma, beta, eps):
    """Torch-style LayerNorm: a_2*(x-mean)/(std+eps)+b_2 with unbiased std."""
    d = x.shape[-1]
    mean = jnp.mean(x, axis=-1, keepdims=True)
    xc = x - mean
    var = jnp.sum(xc * xc, axis=-1, keepdims=True) / (d - 1)      # unbiased (torch .std())
    inv = pl.reciprocal(jnp.sqrt(var) + eps)                      # per-row, EUP slot
    return gamma * xc * inv + beta


def _mha(xq, xkv, mask, wq, bq, wk, bk, wv, bv, wo, bo, *, heads, scale):
    """All-heads masked attention + fused output projection; stays in vregs/VMEM.

    xq: (Tq, D) f32, xkv: (S, D) f32, mask: (1 or Tq, S) float 0/1.
    Returns (Tq, D) f32 = concat_h(softmax(q_h k_h^T * scale) v_h) @ Wo + bo.
    """
    tq, d = xq.shape
    dk = d // heads

    q = jnp.dot(xq, wq, preferred_element_type=jnp.float32) + bq
    k = jnp.dot(xkv, wk, preferred_element_type=jnp.float32) + bk
    v = jnp.dot(xkv, wv, preferred_element_type=jnp.float32) + bv

    masked_out = mask == 0.0                     # hoisted out of the head loop
    out = jnp.zeros((tq, d), jnp.float32)
    for h in range(heads):                       # static unroll over heads
        sl = slice(h * dk, (h + 1) * dk)
        scores = lax.dot_general(q[:, sl], k[:, sl], (((1,), (1,)), ((), ())),
                                 preferred_element_type=jnp.float32) * scale
        scores = jnp.where(masked_out, jnp.float32(-1e9), scores)
        scores = scores - jnp.max(scores, axis=-1, keepdims=True)
        p = jnp.exp(scores)
        p = p * pl.reciprocal(jnp.sum(p, axis=-1, keepdims=True))
        o_h = jnp.dot(p, v[:, sl], preferred_element_type=jnp.float32)        # (Tq, dk)
        # concat_h(o_h) @ Wo  ==  sum_h  o_h @ Wo[h*dk:(h+1)*dk, :]
        out = out + jnp.dot(o_h, wo[sl, :], preferred_element_type=jnp.float32)
    return out + bo


# --------------------------------------------------------------------------------------
# Fused sublayer kernels (one grid step == one batch element)
# --------------------------------------------------------------------------------------
def _self_attn_kernel(x_ref, g_ref, b_ref, wq_ref, bq_ref, wk_ref, bk_ref,
                      wv_ref, bv_ref, wo_ref, bo_ref, m_ref, o_ref,
                      *, heads, scale, eps):
    x = x_ref[...].astype(jnp.float32)                    # (T, D)
    xn = _layernorm(x, g_ref[...], b_ref[...], eps)
    attn = _mha(xn, xn, m_ref[...],
                wq_ref[...], bq_ref[...], wk_ref[...], bk_ref[...],
                wv_ref[...], bv_ref[...], wo_ref[...], bo_ref[...],
                heads=heads, scale=scale)
    o_ref[...] = (x + attn).astype(o_ref.dtype)


def _src_attn_kernel(x_ref, g_ref, b_ref, mem_ref, wq_ref, bq_ref, wk_ref, bk_ref,
                     wv_ref, bv_ref, wo_ref, bo_ref, m_ref, o_ref,
                     *, heads, scale, eps):
    x = x_ref[...].astype(jnp.float32)                    # (T, D)
    xn = _layernorm(x, g_ref[...], b_ref[...], eps)
    mem = mem_ref[...].astype(jnp.float32)                # (S, D) — K/V projected in-kernel
    attn = _mha(xn, mem, m_ref[...],
                wq_ref[...], bq_ref[...], wk_ref[...], bk_ref[...],
                wv_ref[...], bv_ref[...], wo_ref[...], bo_ref[...],
                heads=heads, scale=scale)
    o_ref[...] = (x + attn).astype(o_ref.dtype)


def _ffn_kernel(x_ref, g_ref, b_ref, w1_ref, b1_ref, w2_ref, b2_ref, o_ref, *, eps):
    x = x_ref[...].astype(jnp.float32)                    # (T, D)
    xn = _layernorm(x, g_ref[...], b_ref[...], eps)
    hid = jnp.dot(xn, w1_ref[...], preferred_element_type=jnp.float32) + b1_ref[...]
    hid = jnp.maximum(hid, 0.0)                           # (T, DFF) never leaves VMEM
    y = jnp.dot(hid, w2_ref[...], preferred_element_type=jnp.float32) + b2_ref[...]
    o_ref[...] = (x + y).astype(o_ref.dtype)


# --------------------------------------------------------------------------------------
# pallas_call wrappers
# --------------------------------------------------------------------------------------
def self_attn_sublayer(x, tgt_mask, p, *, heads, eps=1e-6):
    b, t, d = x.shape
    kernel = functools.partial(_self_attn_kernel, heads=heads,
                               scale=1.0 / math.sqrt(d // heads), eps=eps)
    x_spec = pl.BlockSpec((None, t, d), lambda i: (i, 0, 0))
    return pl.pallas_call(
        kernel,
        out_shape=jax.ShapeDtypeStruct((b, t, d), x.dtype),
        grid_spec=pltpu.PrefetchScalarGridSpec(
            num_scalar_prefetch=0,
            grid=(b,),
            in_specs=[x_spec,
                      _const_spec((1, d)), _const_spec((1, d)),      # LN0 gamma/beta
                      _const_spec((d, d)), _const_spec((1, d)),      # Wq, bq
                      _const_spec((d, d)), _const_spec((1, d)),      # Wk, bk
                      _const_spec((d, d)), _const_spec((1, d)),      # Wv, bv
                      _const_spec((d, d)), _const_spec((1, d)),      # Wo, bo
                      _mask_spec(tgt_mask)],
            out_specs=x_spec),
        compiler_params=pltpu.CompilerParams(
            dimension_semantics=("parallel",), vmem_limit_bytes=_VMEM_LIMIT),
    )(x,
      p["ln0_g"].reshape(1, d), p["ln0_b"].reshape(1, d),
      p["sa_wq"], p["sa_bq"], p["sa_wk"], p["sa_bk"],
      p["sa_wv"], p["sa_bv"], p["sa_wo"], p["sa_bo"],
      tgt_mask)


def src_attn_sublayer(x, memory, src_mask, p, *, heads, eps=1e-6):
    b, t, d = x.shape
    s = memory.shape[1]
    kernel = functools.partial(_src_attn_kernel, heads=heads,
                               scale=1.0 / math.sqrt(d // heads), eps=eps)
    x_spec = pl.BlockSpec((None, t, d), lambda i: (i, 0, 0))
    mem_spec = pl.BlockSpec((None, s, d), lambda i: (i, 0, 0))
    return pl.pallas_call(
        kernel,
        out_shape=jax.ShapeDtypeStruct((b, t, d), x.dtype),
        grid_spec=pltpu.PrefetchScalarGridSpec(
            num_scalar_prefetch=0,
            grid=(b,),
            in_specs=[x_spec,
                      _const_spec((1, d)), _const_spec((1, d)),      # LN1 gamma/beta
                      mem_spec,
                      _const_spec((d, d)), _const_spec((1, d)),      # Wq, bq
                      _const_spec((d, d)), _const_spec((1, d)),      # Wk, bk
                      _const_spec((d, d)), _const_spec((1, d)),      # Wv, bv
                      _const_spec((d, d)), _const_spec((1, d)),      # Wo, bo
                      _mask_spec(src_mask)],
            out_specs=x_spec),
        compiler_params=pltpu.CompilerParams(
            dimension_semantics=("parallel",), vmem_limit_bytes=_VMEM_LIMIT),
    )(x,
      p["ln1_g"].reshape(1, d), p["ln1_b"].reshape(1, d),
      memory,
      p["ca_wq"], p["ca_bq"], p["ca_wk"], p["ca_bk"],
      p["ca_wv"], p["ca_bv"], p["ca_wo"], p["ca_bo"],
      src_mask)


def ffn_sublayer(x, p, *, eps=1e-6):
    b, t, d = x.shape
    dff = p["ff_w1"].shape[1]
    kernel = functools.partial(_ffn_kernel, eps=eps)
    x_spec = pl.BlockSpec((None, t, d), lambda i: (i, 0, 0))
    return pl.pallas_call(
        kernel,
        out_shape=jax.ShapeDtypeStruct((b, t, d), x.dtype),
        grid_spec=pltpu.PrefetchScalarGridSpec(
            num_scalar_prefetch=0,
            grid=(b,),
            in_specs=[x_spec,
                      _const_spec((1, d)), _const_spec((1, d)),      # LN2 gamma/beta
                      _const_spec((d, dff)), _const_spec((1, dff)),  # W1, b1
                      _const_spec((dff, d)), _const_spec((1, d))],   # W2, b2
            out_specs=x_spec),
        compiler_params=pltpu.CompilerParams(
            dimension_semantics=("parallel",), vmem_limit_bytes=_VMEM_LIMIT),
    )(x,
      p["ln2_g"].reshape(1, d), p["ln2_b"].reshape(1, d),
      p["ff_w1"], p["ff_b1"], p["ff_w2"], p["ff_b2"])


def decoder_layer_pallas(x, memory, src_mask, tgt_mask, params, *, h):
    x = self_attn_sublayer(x, tgt_mask.astype(jnp.float32), params, heads=h)
    x = src_attn_sublayer(x, memory, src_mask.astype(jnp.float32), params, heads=h)
    x = ffn_sublayer(x, params)
    return x


# --------------------------------------------------------------------------------------
# Pure-JAX reference mirroring the PyTorch module
# --------------------------------------------------------------------------------------
def _ref_layernorm(x, g, b, eps=1e-6):
    mean = jnp.mean(x, axis=-1, keepdims=True)
    d = x.shape[-1]
    var = jnp.sum((x - mean) ** 2, axis=-1, keepdims=True) / (d - 1)
    return g * (x - mean) / (jnp.sqrt(var) + eps) + b


def _ref_mha(xq, xkv, mask3, wq, bq, wk, bk, wv, bv, wo, bo, h):
    b_, tq, d = xq.shape
    tk = xkv.shape[1]
    dk = d // h
    scale = 1.0 / math.sqrt(dk)
    q = (xq @ wq + bq).reshape(b_, tq, h, dk).transpose(0, 2, 1, 3)
    k = (xkv @ wk + bk).reshape(b_, tk, h, dk).transpose(0, 2, 1, 3)
    v = (xkv @ wv + bv).reshape(b_, tk, h, dk).transpose(0, 2, 1, 3)
    scores = jnp.einsum("bhqd,bhkd->bhqk", q, k) * scale
    scores = jnp.where(mask3[:, None, :, :] == 0.0, jnp.float32(-1e9), scores)
    p_attn = jax.nn.softmax(scores, axis=-1)
    out = jnp.einsum("bhqk,bhkd->bhqd", p_attn, v)
    out = out.transpose(0, 2, 1, 3).reshape(b_, tq, d)
    return out @ wo + bo


def ref_decoder_layer(x, memory, src_mask, tgt_mask, p, *, h):
    b_, t, d = x.shape
    s = memory.shape[1]
    tgt_m = jnp.broadcast_to(tgt_mask, (b_, t, t))
    src_m = jnp.broadcast_to(src_mask, (b_, t, s))

    xn = _ref_layernorm(x, p["ln0_g"], p["ln0_b"])
    x = x + _ref_mha(xn, xn, tgt_m, p["sa_wq"], p["sa_bq"], p["sa_wk"], p["sa_bk"],
                     p["sa_wv"], p["sa_bv"], p["sa_wo"], p["sa_bo"], h)
    xn = _ref_layernorm(x, p["ln1_g"], p["ln1_b"])
    x = x + _ref_mha(xn, memory, src_m, p["ca_wq"], p["ca_bq"], p["ca_wk"], p["ca_bk"],
                     p["ca_wv"], p["ca_bv"], p["ca_wo"], p["ca_bo"], h)
    xn = _ref_layernorm(x, p["ln2_g"], p["ln2_b"])
    ff = jnp.maximum(xn @ p["ff_w1"] + p["ff_b1"], 0.0) @ p["ff_w2"] + p["ff_b2"]
    return x + ff


# --------------------------------------------------------------------------------------
if __name__ == "__main__":
    B, T, S = 2, 8, 10          # batch, target seq, source (memory) seq
    D, H, DFF = 32, 4, 64       # d_model, heads, feed-forward width

    kit = iter(jax.random.split(jax.random.PRNGKey(0), 64))

    def nk():
        return next(kit)

    def lin_init(din, dout):
        w = jax.random.normal(nk(), (din, dout), jnp.float32) / math.sqrt(din)
        bb = 0.02 * jax.random.normal(nk(), (1, dout), jnp.float32)
        return w, bb

    params = {}
    for i in range(3):
        params[f"ln{i}_g"] = 1.0 + 0.1 * jax.random.normal(nk(), (D,), jnp.float32)
        params[f"ln{i}_b"] = 0.1 * jax.random.normal(nk(), (D,), jnp.float32)
    for pre in ("sa", "ca"):
        for name in ("q", "k", "v", "o"):
            w, bb = lin_init(D, D)
            params[f"{pre}_w{name}"] = w
            params[f"{pre}_b{name}"] = bb
    params["ff_w1"], params["ff_b1"] = lin_init(D, DFF)
    params["ff_w2"], params["ff_b2"] = lin_init(DFF, D)

    x = jax.random.normal(nk(), (B, T, D), jnp.float32)
    memory = jax.random.normal(nk(), (B, S, D), jnp.float32)
    tgt_mask = jnp.tril(jnp.ones((T, T), jnp.float32))[None]               # (1, T, T) causal
    src_mask = jnp.ones((B, 1, S), jnp.float32).at[1, 0, S - 3:].set(0.0)  # pad 3 src toks

    fwd = jax.jit(functools.partial(decoder_layer_pallas, h=H))
    out = jax.block_until_ready(fwd(x, memory, src_mask, tgt_mask, params))

    ref = ref_decoder_layer(x, memory, src_mask, tgt_mask, params, h=H)
    max_err = float(jnp.max(jnp.abs(out - ref)))
    assert out.shape == (B, T, D)
    assert jnp.allclose(out, ref, rtol=2e-3, atol=2e-3), f"max abs err = {max_err}"
    print("KERNEL_OK")
</pallas_src>

<mosaic_0001>
module attributes {stable_mosaic.version = 11 : i64} {
  func.func @_self_attn_kernel(%arg0: i32, %arg1: memref<1x8x32xf32, #tpu.memory_space<vmem>>, %arg2: memref<1x32xf32, #tpu.memory_space<vmem>>, %arg3: memref<1x32xf32, #tpu.memory_space<vmem>>, %arg4: memref<32x32xf32, #tpu.memory_space<vmem>>, %arg5: memref<1x32xf32, #tpu.memory_space<vmem>>, %arg6: memref<32x32xf32, #tpu.memory_space<vmem>>, %arg7: memref<1x32xf32, #tpu.memory_space<vmem>>, %arg8: memref<32x32xf32, #tpu.memory_space<vmem>>, %arg9: memref<1x32xf32, #tpu.memory_space<vmem>>, %arg10: memref<32x32xf32, #tpu.memory_space<vmem>>, %arg11: memref<1x32xf32, #tpu.memory_space<vmem>>, %arg12: memref<1x8x8xf32, #tpu.memory_space<vmem>>, %arg13: memref<1x8x32xf32, #tpu.memory_space<vmem>>) attributes {dimension_semantics = [#tpu.dimension_semantics<parallel>], iteration_bounds = array<i64: 2>, scalar_prefetch = 0 : i64, scratch_operands = 0 : i64, tpu.core_type = #tpu.core_type<tc>, window_params = [{transform_indices = @transform_0, window_bounds = array<i64: 1, 8, 32>}, {pipeline_mode = #tpu.pipeline_mode<synchronous>, transform_indices = @transform_1, window_bounds = array<i64: 1, 32>}, {pipeline_mode = #tpu.pipeline_mode<synchronous>, transform_indices = @transform_2, window_bounds = array<i64: 1, 32>}, {pipeline_mode = #tpu.pipeline_mode<synchronous>, transform_indices = @transform_3, window_bounds = array<i64: 32, 32>}, {pipeline_mode = #tpu.pipeline_mode<synchronous>, transform_indices = @transform_4, window_bounds = array<i64: 1, 32>}, {pipeline_mode = #tpu.pipeline_mode<synchronous>, transform_indices = @transform_5, window_bounds = array<i64: 32, 32>}, {pipeline_mode = #tpu.pipeline_mode<synchronous>, transform_indices = @transform_6, window_bounds = array<i64: 1, 32>}, {pipeline_mode = #tpu.pipeline_mode<synchronous>, transform_indices = @transform_7, window_bounds = array<i64: 32, 32>}, {pipeline_mode = #tpu.pipeline_mode<synchronous>, transform_indices = @transform_8, window_bounds = array<i64: 1, 32>}, {pipeline_mode = #tpu.pipeline_mode<synchronous>, transform_indices = @transform_9, window_bounds = array<i64: 32, 32>}, {pipeline_mode = #tpu.pipeline_mode<synchronous>, transform_indices = @transform_10, window_bounds = array<i64: 1, 32>}, {pipeline_mode = #tpu.pipeline_mode<synchronous>, transform_indices = @transform_11, window_bounds = array<i64: 1, 8, 8>}, {transform_indices = @transform_12, window_bounds = array<i64: 1, 8, 32>}]} {
    %c0 = arith.constant 0 : index
    %c0_0 = arith.constant 0 : index
    %c0_1 = arith.constant 0 : index
    %0 = vector.load %arg1[%c0, %c0_0, %c0_1] : memref<1x8x32xf32, #tpu.memory_space<vmem>>, vector<1x8x32xf32>
    %1 = vector.shape_cast %0 : vector<1x8x32xf32> to vector<8x32xf32>
    %c0_2 = arith.constant 0 : index
    %c0_3 = arith.constant 0 : index
    %2 = vector.load %arg2[%c0_2, %c0_3] : memref<1x32xf32, #tpu.memory_space<vmem>>, vector<1x32xf32>
    %c0_4 = arith.constant 0 : index
    %c0_5 = arith.constant 0 : index
    %3 = vector.load %arg3[%c0_4, %c0_5] : memref<1x32xf32, #tpu.memory_space<vmem>>, vector<1x32xf32>
    %cst = arith.constant dense<0.000000e+00> : vector<8xf32>
    %4 = vector.multi_reduction <add>, %1, %cst [1] : vector<8x32xf32> to vector<8xf32>
    %5 = vector.shape_cast %4 : vector<8xf32> to vector<8x1xf32>
    %cst_6 = arith.constant 3.200000e+01 : f32
    %6 = vector.broadcast %cst_6 : f32 to vector<8x1xf32>
    %7 = arith.divf %5, %6 : vector<8x1xf32>
    %8 = vector.broadcast %7 : vector<8x1xf32> to vector<8x32xf32>
    %9 = arith.subf %1, %8 : vector<8x32xf32>
    %10 = arith.mulf %9, %9 : vector<8x32xf32>
    %cst_7 = arith.constant dense<0.000000e+00> : vector<8xf32>
    %11 = vector.multi_reduction <add>, %10, %cst_7 [1] : vector<8x32xf32> to vector<8xf32>
    %12 = vector.shape_cast %11 : vector<8xf32> to vector<8x1xf32>
    %cst_8 = arith.constant 3.100000e+01 : f32
    %13 = vector.broadcast %cst_8 : f32 to vector<8x1xf32>
    %14 = arith.divf %12, %13 : vector<8x1xf32>
    %15 = math.sqrt %14 : vector<8x1xf32>
    %cst_9 = arith.constant 9.99999997E-7 : f32
    %16 = vector.broadcast %cst_9 : f32 to vector<8x1xf32>
    %17 = arith.addf %15, %16 : vector<8x1xf32>
    %18 = tpu.reciprocal %17 : vector<8x1xf32> -> vector<8x1xf32>
    %19 = vector.broadcast %2 : vector<1x32xf32> to vector<8x32xf32>
    %20 = arith.mulf %19, %9 : vector<8x32xf32>
    %21 = vector.broadcast %18 : vector<8x1xf32> to vector<8x32xf32>
    %22 = arith.mulf %20, %21 : vector<8x32xf32>
    %23 = vector.broadcast %3 : vector<1x32xf32> to vector<8x32xf32>
    %24 = arith.addf %22, %23 : vector<8x32xf32>
    %c0_10 = arith.constant 0 : index
    %c0_11 = arith.constant 0 : index
    %c0_12 = arith.constant 0 : index
    %25 = vector.load %arg12[%c0_10, %c0_11, %c0_12] : memref<1x8x8xf32, #tpu.memory_space<vmem>>, vector<1x8x8xf32>
    %26 = vector.shape_cast %25 : vector<1x8x8xf32> to vector<8x8xf32>
    %c0_13 = arith.constant 0 : index
    %c0_14 = arith.constant 0 : index
    %27 = vector.load %arg4[%c0_13, %c0_14] : memref<32x32xf32, #tpu.memory_space<vmem>>, vector<32x32xf32>
    %c0_15 = arith.constant 0 : index
    %c0_16 = arith.constant 0 : index
    %28 = vector.load %arg5[%c0_15, %c0_16] : memref<1x32xf32, #tpu.memory_space<vmem>>, vector<1x32xf32>
    %c0_17 = arith.constant 0 : index
    %c0_18 = arith.constant 0 : index
    %29 = vector.load %arg6[%c0_17, %c0_18] : memref<32x32xf32, #tpu.memory_space<vmem>>, vector<32x32xf32>
    %c0_19 = arith.constant 0 : index
    %c0_20 = arith.constant 0 : index
    %30 = vector.load %arg7[%c0_19, %c0_20] : memref<1x32xf32, #tpu.memory_space<vmem>>, vector<1x32xf32>
    %c0_21 = arith.constant 0 : index
    %c0_22 = arith.constant 0 : index
    %31 = vector.load %arg8[%c0_21, %c0_22] : memref<32x32xf32, #tpu.memory_space<vmem>>, vector<32x32xf32>
    %c0_23 = arith.constant 0 : index
    %c0_24 = arith.constant 0 : index
    %32 = vector.load %arg9[%c0_23, %c0_24] : memref<1x32xf32, #tpu.memory_space<vmem>>, vector<1x32xf32>
    %c0_25 = arith.constant 0 : index
    %c0_26 = arith.constant 0 : index
    %33 = vector.load %arg10[%c0_25, %c0_26] : memref<32x32xf32, #tpu.memory_space<vmem>>, vector<32x32xf32>
    %c0_27 = arith.constant 0 : index
    %c0_28 = arith.constant 0 : index
    %34 = vector.load %arg11[%c0_27, %c0_28] : memref<1x32xf32, #tpu.memory_space<vmem>>, vector<1x32xf32>
    %cst_29 = arith.constant dense<0.000000e+00> : vector<8x32xf32>
    %35 = tpu.matmul %24, %27, %cst_29 {dimension_numbers = #tpu.dot_dimension_numbers<[1], [0], [0], [1], [0, 0, 1, 1], [], []>, precision = #tpu.contract_precision<fp32>} : vector<8x32xf32>, vector<32x32xf32>, vector<8x32xf32> -> vector<8x32xf32>
    %36 = vector.broadcast %28 : vector<1x32xf32> to vector<8x32xf32>
    %37 = arith.addf %35, %36 : vector<8x32xf32>
    %cst_30 = arith.constant dense<0.000000e+00> : vector<8x32xf32>
    %38 = tpu.matmul %24, %29, %cst_30 {dimension_numbers = #tpu.dot_dimension_numbers<[1], [0], [0], [1], [0, 0, 1, 1], [], []>, precision = #tpu.contract_precision<fp32>} : vector<8x32xf32>, vector<32x32xf32>, vector<8x32xf32> -> vector<8x32xf32>
    %39 = vector.broadcast %30 : vector<1x32xf32> to vector<8x32xf32>
    %40 = arith.addf %38, %39 : vector<8x32xf32>
    %cst_31 = arith.constant dense<0.000000e+00> : vector<8x32xf32>
    %41 = tpu.matmul %24, %31, %cst_31 {dimension_numbers = #tpu.dot_dimension_numbers<[1], [0], [0], [1], [0, 0, 1, 1], [], []>, precision = #tpu.contract_precision<fp32>} : vector<8x32xf32>, vector<32x32xf32>, vector<8x32xf32> -> vector<8x32xf32>
    %42 = vector.broadcast %32 : vector<1x32xf32> to vector<8x32xf32>
    %43 = arith.addf %41, %42 : vector<8x32xf32>
    %cst_32 = arith.constant 0.000000e+00 : f32
    %44 = vector.broadcast %cst_32 : f32 to vector<8x8xf32>
    %45 = arith.cmpf oeq, %26, %44 : vector<8x8xf32>
    %cst_33 = arith.constant 0.000000e+00 : f32
    %46 = vector.broadcast %cst_33 : f32 to vector<8x32xf32>
    %47 = vector.extract_strided_slice %37 {offsets = [0, 0], sizes = [8, 8], strides = [1, 1]} : vector<8x32xf32> to vector<8x8xf32>
    %48 = vector.extract_strided_slice %40 {offsets = [0, 0], sizes = [8, 8], strides = [1, 1]} : vector<8x32xf32> to vector<8x8xf32>
    %cst_34 = arith.constant dense<0.000000e+00> : vector<8x8xf32>
    %49 = tpu.matmul %47, %48, %cst_34 {dimension_numbers = #tpu.dot_dimension_numbers<[1], [1], [0], [0], [0, 0, 1, 0], [], []>, precision = #tpu.contract_precision<fp32>} : vector<8x8xf32>, vector<8x8xf32>, vector<8x8xf32> -> vector<8x8xf32>
    %cst_35 = arith.constant 0.353553385 : f32
    %50 = vector.broadcast %cst_35 : f32 to vector<8x8xf32>
    %51 = arith.mulf %49, %50 : vector<8x8xf32>
    %cst_36 = arith.constant -1.000000e+09 : f32
    %52 = vector.broadcast %cst_36 : f32 to vector<8x8xf32>
    %53 = arith.select %45, %52, %51 : vector<8x8xi1>, vector<8x8xf32>
    %cst_37 = arith.constant dense<0xFF800000> : vector<8xf32>
    %54 = vector.multi_reduction <maximumf>, %53, %cst_37 [1] : vector<8x8xf32> to vector<8xf32>
    %55 = vector.shape_cast %54 : vector<8xf32> to vector<8x1xf32>
    %56 = vector.broadcast %55 : vector<8x1xf32> to vector<8x8xf32>
    %57 = arith.subf %53, %56 : vector<8x8xf32>
    %58 = math.exp %57 : vector<8x8xf32>
    %cst_38 = arith.constant dense<0.000000e+00> : vector<8xf32>
    %59 = vector.multi_reduction <add>, %58, %cst_38 [1] : vector<8x8xf32> to vector<8xf32>
    %60 = vector.shape_cast %59 : vector<8xf32> to vector<8x1xf32>
    %61 = tpu.reciprocal %60 : vector<8x1xf32> -> vector<8x1xf32>
    %62 = vector.broadcast %61 : vector<8x1xf32> to vector<8x8xf32>
    %63 = arith.mulf %58, %62 : vector<8x8xf32>
    %64 = vector.extract_strided_slice %43 {offsets = [0, 0], sizes = [8, 8], strides = [1, 1]} : vector<8x32xf32> to vector<8x8xf32>
    %cst_39 = arith.constant dense<0.000000e+00> : vector<8x8xf32>
    %65 = tpu.matmul %63, %64, %cst_39 {dimension_numbers = #tpu.dot_dimension_numbers<[1], [0], [0], [1], [0, 0, 1, 1], [], []>, precision = #tpu.contract_precision<fp32>} : vector<8x8xf32>, vector<8x8xf32>, vector<8x8xf32> -> vector<8x8xf32>
    %66 = vector.extract_strided_slice %33 {offsets = [0, 0], sizes = [8, 32], strides = [1, 1]} : vector<32x32xf32> to vector<8x32xf32>
    %cst_40 = arith.constant dense<0.000000e+00> : vector<8x32xf32>
    %67 = tpu.matmul %65, %66, %cst_40 {dimension_numbers = #tpu.dot_dimension_numbers<[1], [0], [0], [1], [0, 0, 1, 1], [], []>, precision = #tpu.contract_precision<fp32>} : vector<8x8xf32>, vector<8x32xf32>, vector<8x32xf32> -> vector<8x32xf32>
    %68 = arith.addf %46, %67 : vector<8x32xf32>
    %69 = vector.extract_strided_slice %37 {offsets = [0, 8], sizes = [8, 8], strides = [1, 1]} : vector<8x32xf32> to vector<8x8xf32>
    %70 = vector.extract_strided_slice %40 {offsets = [0, 8], sizes = [8, 8], strides = [1, 1]} : vector<8x32xf32> to vector<8x8xf32>
    %cst_41 = arith.constant dense<0.000000e+00> : vector<8x8xf32>
    %71 = tpu.matmul %69, %70, %cst_41 {dimension_numbers = #tpu.dot_dimension_numbers<[1], [1], [0], [0], [0, 0, 1, 0], [], []>, precision = #tpu.contract_precision<fp32>} : vector<8x8xf32>, vector<8x8xf32>, vector<8x8xf32> -> vector<8x8xf32>
    %cst_42 = arith.constant 0.353553385 : f32
    %72 = vector.broadcast %cst_42 : f32 to vector<8x8xf32>
    %73 = arith.mulf %71, %72 : vector<8x8xf32>
    %cst_43 = arith.constant -1.000000e+09 : f32
    %74 = vector.broadcast %cst_43 : f32 to vector<8x8xf32>
    %75 = arith.select %45, %74, %73 : vector<8x8xi1>, vector<8x8xf32>
    %cst_44 = arith.constant dense<0xFF800000> : vector<8xf32>
    %76 = vector.multi_reduction <maximumf>, %75, %cst_44 [1] : vector<8x8xf32> to vector<8xf32>
    %77 = vector.shape_cast %76 : vector<8xf32> to vector<8x1xf32>
    %78 = vector.broadcast %77 : vector<8x1xf32> to vector<8x8xf32>
    %79 = arith.subf %75, %78 : vector<8x8xf32>
    %80 = math.exp %79 : vector<8x8xf32>
    %cst_45 = arith.constant dense<0.000000e+00> : vector<8xf32>
    %81 = vector.multi_reduction <add>, %80, %cst_45 [1] : vector<8x8xf32> to vector<8xf32>
    %82 = vector.shape_cast %81 : vector<8xf32> to vector<8x1xf32>
    %83 = tpu.reciprocal %82 : vector<8x1xf32> -> vector<8x1xf32>
    %84 = vector.broadcast %83 : vector<8x1xf32> to vector<8x8xf32>
    %85 = arith.mulf %80, %84 : vector<8x8xf32>
    %86 = vector.extract_strided_slice %43 {offsets = [0, 8], sizes = [8, 8], strides = [1, 1]} : vector<8x32xf32> to vector<8x8xf32>
    %cst_46 = arith.constant dense<0.000000e+00> : vector<8x8xf32>
    %87 = tpu.matmul %85, %86, %cst_46 {dimension_numbers = #tpu.dot_dimension_numbers<[1], [0], [0], [1], [0, 0, 1, 1], [], []>, precision = #tpu.contract_precision<fp32>} : vector<8x8xf32>, vector<8x8xf32>, vector<8x8xf32> -> vector<8x8xf32>
    %88 = vector.extract_strided_slice %33 {offsets = [8, 0], sizes = [8, 32], strides = [1, 1]} : vector<32x32xf32> to vector<8x32xf32>
    %cst_47 = arith.constant dense<0.000000e+00> : vector<8x32xf32>
    %89 = tpu.matmul %87, %88, %cst_47 {dimension_numbers = #tpu.dot_dimension_numbers<[1], [0], [0], [1], [0, 0, 1, 1], [], []>, precision = #tpu.contract_precision<fp32>} : vector<8x8xf32>, vector<8x32xf32>, vector<8x32xf32> -> vector<8x32xf32>
    %90 = arith.addf %68, %89 : vector<8x32xf32>
    %91 = vector.extract_strided_slice %37 {offsets = [0, 16], sizes = [8, 8], strides = [1, 1]} : vector<8x32xf32> to vector<8x8xf32>
    %92 = vector.extract_strided_slice %40 {offsets = [0, 16], sizes = [8, 8], strides = [1, 1]} : vector<8x32xf32> to vector<8x8xf32>
    %cst_48 = arith.constant dense<0.000000e+00> : vector<8x8xf32>
    %93 = tpu.matmul %91, %92, %cst_48 {dimension_numbers = #tpu.dot_dimension_numbers<[1], [1], [0], [0], [0, 0, 1, 0], [], []>, precision = #tpu.contract_precision<fp32>} : vector<8x8xf32>, vector<8x8xf32>, vector<8x8xf32> -> vector<8x8xf32>
    %cst_49 = arith.constant 0.353553385 : f32
    %94 = vector.broadcast %cst_49 : f32 to vector<8x8xf32>
    %95 = arith.mulf %93, %94 : vector<8x8xf32>
    %cst_50 = arith.constant -1.000000e+09 : f32
    %96 = vector.broadcast %cst_50 : f32 to vector<8x8xf32>
    %97 = arith.select %45, %96, %95 : vector<8x8xi1>, vector<8x8xf32>
    %cst_51 = arith.constant dense<0xFF800000> : vector<8xf32>
    %98 = vector.multi_reduction <maximumf>, %97, %cst_51 [1] : vector<8x8xf32> to vector<8xf32>
    %99 = vector.shape_cast %98 : vector<8xf32> to vector<8x1xf32>
    %100 = vector.broadcast %99 : vector<8x1xf32> to vector<8x8xf32>
    %101 = arith.subf %97, %100 : vector<8x8xf32>
    %102 = math.exp %101 : vector<8x8xf32>
    %cst_52 = arith.constant dense<0.000000e+00> : vector<8xf32>
    %103 = vector.multi_reduction <add>, %102, %cst_52 [1] : vector<8x8xf32> to vector<8xf32>
    %104 = vector.shape_cast %103 : vector<8xf32> to vector<8x1xf32>
    %105 = tpu.reciprocal %104 : vector<8x1xf32> -> vector<8x1xf32>
    %106 = vector.broadcast %105 : vector<8x1xf32> to vector<8x8xf32>
    %107 = arith.mulf %102, %106 : vector<8x8xf32>
    %108 = vector.extract_strided_slice %43 {offsets = [0, 16], sizes = [8, 8], strides = [1, 1]} : vector<8x32xf32> to vector<8x8xf32>
    %cst_53 = arith.constant dense<0.000000e+00> : vector<8x8xf32>
    %109 = tpu.matmul %107, %108, %cst_53 {dimension_numbers = #tpu.dot_dimension_numbers<[1], [0], [0], [1], [0, 0, 1, 1], [], []>, precision = #tpu.contract_precision<fp32>} : vector<8x8xf32>, vector<8x8xf32>, vector<8x8xf32> -> vector<8x8xf32>
    %110 = vector.extract_strided_slice %33 {offsets = [16, 0], sizes = [8, 32], strides = [1, 1]} : vector<32x32xf32> to vector<8x32xf32>
    %cst_54 = arith.constant dense<0.000000e+00> : vector<8x32xf32>
    %111 = tpu.matmul %109, %110, %cst_54 {dimension_numbers = #tpu.dot_dimension_numbers<[1], [0], [0], [1], [0, 0, 1, 1], [], []>, precision = #tpu.contract_precision<fp32>} : vector<8x8xf32>, vector<8x32xf32>, vector<8x32xf32> -> vector<8x32xf32>
    %112 = arith.addf %90, %111 : vector<8x32xf32>
    %113 = vector.extract_strided_slice %37 {offsets = [0, 24], sizes = [8, 8], strides = [1, 1]} : vector<8x32xf32> to vector<8x8xf32>
    %114 = vector.extract_strided_slice %40 {offsets = [0, 24], sizes = [8, 8], strides = [1, 1]} : vector<8x32xf32> to vector<8x8xf32>
    %cst_55 = arith.constant dense<0.000000e+00> : vector<8x8xf32>
    %115 = tpu.matmul %113, %114, %cst_55 {dimension_numbers = #tpu.dot_dimension_numbers<[1], [1], [0], [0], [0, 0, 1, 0], [], []>, precision = #tpu.contract_precision<fp32>} : vector<8x8xf32>, vector<8x8xf32>, vector<8x8xf32> -> vector<8x8xf32>
    %cst_56 = arith.constant 0.353553385 : f32
    %116 = vector.broadcast %cst_56 : f32 to vector<8x8xf32>
    %117 = arith.mulf %115, %116 : vector<8x8xf32>
    %cst_57 = arith.constant -1.000000e+09 : f32
    %118 = vector.broadcast %cst_57 : f32 to vector<8x8xf32>
    %119 = arith.select %45, %118, %117 : vector<8x8xi1>, vector<8x8xf32>
    %cst_58 = arith.constant dense<0xFF800000> : vector<8xf32>
    %120 = vector.multi_reduction <maximumf>, %119, %cst_58 [1] : vector<8x8xf32> to vector<8xf32>
    %121 = vector.shape_cast %120 : vector<8xf32> to vector<8x1xf32>
    %122 = vector.broadcast %121 : vector<8x1xf32> to vector<8x8xf32>
    %123 = arith.subf %119, %122 : vector<8x8xf32>
    %124 = math.exp %123 : vector<8x8xf32>
    %cst_59 = arith.constant dense<0.000000e+00> : vector<8xf32>
    %125 = vector.multi_reduction <add>, %124, %cst_59 [1] : vector<8x8xf32> to vector<8xf32>
    %126 = vector.shape_cast %125 : vector<8xf32> to vector<8x1xf32>
    %127 = tpu.reciprocal %126 : vector<8x1xf32> -> vector<8x1xf32>
    %128 = vector.broadcast %127 : vector<8x1xf32> to vector<8x8xf32>
    %129 = arith.mulf %124, %128 : vector<8x8xf32>
    %130 = vector.extract_strided_slice %43 {offsets = [0, 24], sizes = [8, 8], strides = [1, 1]} : vector<8x32xf32> to vector<8x8xf32>
    %cst_60 = arith.constant dense<0.000000e+00> : vector<8x8xf32>
    %131 = tpu.matmul %129, %130, %cst_60 {dimension_numbers = #tpu.dot_dimension_numbers<[1], [0], [0], [1], [0, 0, 1, 1], [], []>, precision = #tpu.contract_precision<fp32>} : vector<8x8xf32>, vector<8x8xf32>, vector<8x8xf32> -> vector<8x8xf32>
    %132 = vector.extract_strided_slice %33 {offsets = [24, 0], sizes = [8, 32], strides = [1, 1]} : vector<32x32xf32> to vector<8x32xf32>
    %cst_61 = arith.constant dense<0.000000e+00> : vector<8x32xf32>
    %133 = tpu.matmul %131, %132, %cst_61 {dimension_numbers = #tpu.dot_dimension_numbers<[1], [0], [0], [1], [0, 0, 1, 1], [], []>, precision = #tpu.contract_precision<fp32>} : vector<8x8xf32>, vector<8x32xf32>, vector<8x32xf32> -> vector<8x32xf32>
    %134 = arith.addf %112, %133 : vector<8x32xf32>
    %135 = vector.broadcast %34 : vector<1x32xf32> to vector<8x32xf32>
    %136 = arith.addf %134, %135 : vector<8x32xf32>
    %137 = arith.addf %1, %136 : vector<8x32xf32>
    %c0_62 = arith.constant 0 : index
    %c0_63 = arith.constant 0 : index
    %c0_64 = arith.constant 0 : index
    %138 = vector.load %arg13[%c0_62, %c0_63, %c0_64] : memref<1x8x32xf32, #tpu.memory_space<vmem>>, vector<1x8x32xf32>
    %139 = vector.shape_cast %138 : vector<1x8x32xf32> to vector<8x32xf32>
    %140 = vector.shape_cast %137 : vector<8x32xf32> to vector<1x8x32xf32>
    tpu.vector_store %arg13[%c0_62, %c0_63, %c0_64], %140 {strides = array<i32>} : memref<1x8x32xf32, #tpu.memory_space<vmem>>, vector<1x8x32xf32>,
    return
  }
  func.func @transform_0(%arg0: i32) -> (i32, i32, i32) {
    %c0_i32 = arith.constant 0 : i32
    %c0_i32_0 = arith.constant 0 : i32
    %c0_i32_1 = arith.constant 0 : i32
    return %arg0, %c0_i32, %c0_i32_0 : i32, i32, i32
  }
  func.func @transform_1(%arg0: i32) -> (i32, i32) {
    %c0_i32 = arith.constant 0 : i32
    %c0_i32_0 = arith.constant 0 : i32
    %c0_i32_1 = arith.constant 0 : i32
    return %c0_i32, %c0_i32_0 : i32, i32
  }
  func.func @transform_2(%arg0: i32) -> (i32, i32) {
    %c0_i32 = arith.constant 0 : i32
    %c0_i32_0 = arith.constant 0 : i32
    %c0_i32_1 = arith.constant 0 : i32
    return %c0_i32, %c0_i32_0 : i32, i32
  }
  func.func @transform_3(%arg0: i32) -> (i32, i32) {
    %c0_i32 = arith.constant 0 : i32
    %c0_i32_0 = arith.constant 0 : i32
    %c0_i32_1 = arith.constant 0 : i32
    return %c0_i32, %c0_i32_0 : i32, i32
  }
  func.func @transform_4(%arg0: i32) -> (i32, i32) {
    %c0_i32 = arith.constant 0 : i32
    %c0_i32_0 = arith.constant 0 : i32
    %c0_i32_1 = arith.constant 0 : i32
    return %c0_i32, %c0_i32_0 : i32, i32
  }
  func.func @transform_5(%arg0: i32) -> (i32, i32) {
    %c0_i32 = arith.constant 0 : i32
    %c0_i32_0 = arith.constant 0 : i32
    %c0_i32_1 = arith.constant 0 : i32
    return %c0_i32, %c0_i32_0 : i32, i32
  }
  func.func @transform_6(%arg0: i32) -> (i32, i32) {
    %c0_i32 = arith.constant 0 : i32
    %c0_i32_0 = arith.constant 0 : i32
    %c0_i32_1 = arith.constant 0 : i32
    return %c0_i32, %c0_i32_0 : i32, i32
  }
  func.func @transform_7(%arg0: i32) -> (i32, i32) {
    %c0_i32 = arith.constant 0 : i32
    %c0_i32_0 = arith.constant 0 : i32
    %c0_i32_1 = arith.constant 0 : i32
    return %c0_i32, %c0_i32_0 : i32, i32
  }
  func.func @transform_8(%arg0: i32) -> (i32, i32) {
    %c0_i32 = arith.constant 0 : i32
    %c0_i32_0 = arith.constant 0 : i32
    %c0_i32_1 = arith.constant 0 : i32
    return %c0_i32, %c0_i32_0 : i32, i32
  }
  func.func @transform_9(%arg0: i32) -> (i32, i32) {
    %c0_i32 = arith.constant 0 : i32
    %c0_i32_0 = arith.constant 0 : i32
    %c0_i32_1 = arith.constant 0 : i32
    return %c0_i32, %c0_i32_0 : i32, i32
  }
  func.func @transform_10(%arg0: i32) -> (i32, i32) {
    %c0_i32 = arith.constant 0 : i32
    %c0_i32_0 = arith.constant 0 : i32
    %c0_i32_1 = arith.constant 0 : i32
    return %c0_i32, %c0_i32_0 : i32, i32
  }
  func.func @transform_11(%arg0: i32) -> (i32, i32, i32) {
    %c0_i32 = arith.constant 0 : i32
    %c0_i32_0 = arith.constant 0 : i32
    %c0_i32_1 = arith.constant 0 : i32
    %c0_i32_2 = arith.constant 0 : i32
    return %c0_i32, %c0_i32_0, %c0_i32_1 : i32, i32, i32
  }
  func.func @transform_12(%arg0: i32) -> (i32, i32, i32) {
    %c0_i32 = arith.constant 0 : i32
    %c0_i32_0 = arith.constant 0 : i32
    %c0_i32_1 = arith.constant 0 : i32
    return %arg0, %c0_i32, %c0_i32_0 : i32, i32, i32
  }
}

module attributes {stable_mosaic.version = 11 : i64} {
  func.func @_src_attn_kernel(%arg0: i32, %arg1: memref<1x8x32xf32, #tpu.memory_space<vmem>>, %arg2: memref<1x32xf32, #tpu.memory_space<vmem>>, %arg3: memref<1x32xf32, #tpu.memory_space<vmem>>, %arg4: memref<1x10x32xf32, #tpu.memory_space<vmem>>, %arg5: memref<32x32xf32, #tpu.memory_space<vmem>>, %arg6: memref<1x32xf32, #tpu.memory_space<vmem>>, %arg7: memref<32x32xf32, #tpu.memory_space<vmem>>, %arg8: memref<1x32xf32, #tpu.memory_space<vmem>>, %arg9: memref<32x32xf32, #tpu.memory_space<vmem>>, %arg10: memref<1x32xf32, #tpu.memory_space<vmem>>, %arg11: memref<32x32xf32, #tpu.memory_space<vmem>>, %arg12: memref<1x32xf32, #tpu.memory_space<vmem>>, %arg13: memref<1x1x10xf32, #tpu.memory_space<vmem>>, %arg14: memref<1x8x32xf32, #tpu.memory_space<vmem>>) attributes {dimension_semantics = [#tpu.dimension_semantics<parallel>], iteration_bounds = array<i64: 2>, scalar_prefetch = 0 : i64, scratch_operands = 0 : i64, tpu.core_type = #tpu.core_type<tc>, window_params = [{transform_indices = @transform_0, window_bounds = array<i64: 1, 8, 32>}, {pipeline_mode = #tpu.pipeline_mode<synchronous>, transform_indices = @transform_1, window_bounds = array<i64: 1, 32>}, {pipeline_mode = #tpu.pipeline_mode<synchronous>, transform_indices = @transform_2, window_bounds = array<i64: 1, 32>}, {transform_indices = @transform_3, window_bounds = array<i64: 1, 10, 32>}, {pipeline_mode = #tpu.pipeline_mode<synchronous>, transform_indices = @transform_4, window_bounds = array<i64: 32, 32>}, {pipeline_mode = #tpu.pipeline_mode<synchronous>, transform_indices = @transform_5, window_bounds = array<i64: 1, 32>}, {pipeline_mode = #tpu.pipeline_mode<synchronous>, transform_indices = @transform_6, window_bounds = array<i64: 32, 32>}, {pipeline_mode = #tpu.pipeline_mode<synchronous>, transform_indices = @transform_7, window_bounds = array<i64: 1, 32>}, {pipeline_mode = #tpu.pipeline_mode<synchronous>, transform_indices = @transform_8, window_bounds = array<i64: 32, 32>}, {pipeline_mode = #tpu.pipeline_mode<synchronous>, transform_indices = @transform_9, window_bounds = array<i64: 1, 32>}, {pipeline_mode = #tpu.pipeline_mode<synchronous>, transform_indices = @transform_10, window_bounds = array<i64: 32, 32>}, {pipeline_mode = #tpu.pipeline_mode<synchronous>, transform_indices = @transform_11, window_bounds = array<i64: 1, 32>}, {transform_indices = @transform_12, window_bounds = array<i64: 1, 1, 10>}, {transform_indices = @transform_13, window_bounds = array<i64: 1, 8, 32>}]} {
    %c0 = arith.constant 0 : index
    %c0_0 = arith.constant 0 : index
    %c0_1 = arith.constant 0 : index
    %0 = vector.load %arg1[%c0, %c0_0, %c0_1] : memref<1x8x32xf32, #tpu.memory_space<vmem>>, vector<1x8x32xf32>
    %1 = vector.shape_cast %0 : vector<1x8x32xf32> to vector<8x32xf32>
    %c0_2 = arith.constant 0 : index
    %c0_3 = arith.constant 0 : index
    %2 = vector.load %arg2[%c0_2, %c0_3] : memref<1x32xf32, #tpu.memory_space<vmem>>, vector<1x32xf32>
    %c0_4 = arith.constant 0 : index
    %c0_5 = arith.constant 0 : index
    %3 = vector.load %arg3[%c0_4, %c0_5] : memref<1x32xf32, #tpu.memory_space<vmem>>, vector<1x32xf32>
    %cst = arith.constant dense<0.000000e+00> : vector<8xf32>
    %4 = vector.multi_reduction <add>, %1, %cst [1] : vector<8x32xf32> to vector<8xf32>
    %5 = vector.shape_cast %4 : vector<8xf32> to vector<8x1xf32>
    %cst_6 = arith.constant 3.200000e+01 : f32
    %6 = vector.broadcast %cst_6 : f32 to vector<8x1xf32>
    %7 = arith.divf %5, %6 : vector<8x1xf32>
    %8 = vector.broadcast %7 : vector<8x1xf32> to vector<8x32xf32>
    %9 = arith.subf %1, %8 : vector<8x32xf32>
    %10 = arith.mulf %9, %9 : vector<8x32xf32>
    %cst_7 = arith.constant dense<0.000000e+00> : vector<8xf32>
    %11 = vector.multi_reduction <add>, %10, %cst_7 [1] : vector<8x32xf32> to vector<8xf32>
    %12 = vector.shape_cast %11 : vector<8xf32> to vector<8x1xf32>
    %cst_8 = arith.constant 3.100000e+01 : f32
    %13 = vector.broadcast %cst_8 : f32 to vector<8x1xf32>
    %14 = arith.divf %12, %13 : vector<8x1xf32>
    %15 = math.sqrt %14 : vector<8x1xf32>
    %cst_9 = arith.constant 9.99999997E-7 : f32
    %16 = vector.broadcast %cst_9 : f32 to vector<8x1xf32>
    %17 = arith.addf %15, %16 : vector<8x1xf32>
    %18 = tpu.reciprocal %17 : vector<8x1xf32> -> vector<8x1xf32>
    %19 = vector.broadcast %2 : vector<1x32xf32> to vector<8x32xf32>
    %20 = arith.mulf %19, %9 : vector<8x32xf32>
    %21 = vector.broadcast %18 : vector<8x1xf32> to vector<8x32xf32>
    %22 = arith.mulf %20, %21 : vector<8x32xf32>
    %23 = vector.broadcast %3 : vector<1x32xf32> to vector<8x32xf32>
    %24 = arith.addf %22, %23 : vector<8x32xf32>
    %c0_10 = arith.constant 0 : index
    %c0_11 = arith.constant 0 : index
    %c0_12 = arith.constant 0 : index
    %25 = vector.load %arg4[%c0_10, %c0_11, %c0_12] : memref<1x10x32xf32, #tpu.memory_space<vmem>>, vector<1x10x32xf32>
    %26 = vector.shape_cast %25 : vector<1x10x32xf32> to vector<10x32xf32>
    %c0_13 = arith.constant 0 : index
    %c0_14 = arith.constant 0 : index
    %c0_15 = arith.constant 0 : index
    %27 = vector.load %arg13[%c0_13, %c0_14, %c0_15] : memref<1x1x10xf32, #tpu.memory_space<vmem>>, vector<1x1x10xf32>
    %28 = vector.shape_cast %27 : vector<1x1x10xf32> to vector<1x10xf32>
    %c0_16 = arith.constant 0 : index
    %c0_17 = arith.constant 0 : index
    %29 = vector.load %arg5[%c0_16, %c0_17] : memref<32x32xf32, #tpu.memory_space<vmem>>, vector<32x32xf32>
    %c0_18 = arith.constant 0 : index
    %c0_19 = arith.constant 0 : index
    %30 = vector.load %arg6[%c0_18, %c0_19] : memref<1x32xf32, #tpu.memory_space<vmem>>, vector<1x32xf32>
    %c0_20 = arith.constant 0 : index
    %c0_21 = arith.constant 0 : index
    %31 = vector.load %arg7[%c0_20, %c0_21] : memref<32x32xf32, #tpu.memory_space<vmem>>, vector<32x32xf32>
    %c0_22 = arith.constant 0 : index
    %c0_23 = arith.constant 0 : index
    %32 = vector.load %arg8[%c0_22, %c0_23] : memref<1x32xf32, #tpu.memory_space<vmem>>, vector<1x32xf32>
    %c0_24 = arith.constant 0 : index
    %c0_25 = arith.constant 0 : index
    %33 = vector.load %arg9[%c0_24, %c0_25] : memref<32x32xf32, #tpu.memory_space<vmem>>, vector<32x32xf32>
    %c0_26 = arith.constant 0 : index
    %c0_27 = arith.constant 0 : index
    %34 = vector.load %arg10[%c0_26, %c0_27] : memref<1x32xf32, #tpu.memory_space<vmem>>, vector<1x32xf32>
    %c0_28 = arith.constant 0 : index
    %c0_29 = arith.constant 0 : index
    %35 = vector.load %arg11[%c0_28, %c0_29] : memref<32x32xf32, #tpu.memory_space<vmem>>, vector<32x32xf32>
    %c0_30 = arith.constant 0 : index
    %c0_31 = arith.constant 0 : index
    %36 = vector.load %arg12[%c0_30, %c0_31] : memref<1x32xf32, #tpu.memory_space<vmem>>, vector<1x32xf32>
    %cst_32 = arith.constant dense<0.000000e+00> : vector<8x32xf32>
    %37 = tpu.matmul %24, %29, %cst_32 {dimension_numbers = #tpu.dot_dimension_numbers<[1], [0], [0], [1], [0, 0, 1, 1], [], []>, precision = #tpu.contract_precision<fp32>} : vector<8x32xf32>, vector<32x32xf32>, vector<8x32xf32> -> vector<8x32xf32>
    %38 = vector.broadcast %30 : vector<1x32xf32> to vector<8x32xf32>
    %39 = arith.addf %37, %38 : vector<8x32xf32>
    %cst_33 = arith.constant dense<0.000000e+00> : vector<10x32xf32>
    %40 = tpu.matmul %26, %31, %cst_33 {dimension_numbers = #tpu.dot_dimension_numbers<[1], [0], [0], [1], [0, 0, 1, 1], [], []>, precision = #tpu.contract_precision<fp32>} : vector<10x32xf32>, vector<32x32xf32>, vector<10x32xf32> -> vector<10x32xf32>
    %41 = vector.broadcast %32 : vector<1x32xf32> to vector<10x32xf32>
    %42 = arith.addf %40, %41 : vector<10x32xf32>
    %cst_34 = arith.constant dense<0.000000e+00> : vector<10x32xf32>
    %43 = tpu.matmul %26, %33, %cst_34 {dimension_numbers = #tpu.dot_dimension_numbers<[1], [0], [0], [1], [0, 0, 1, 1], [], []>, precision = #tpu.contract_precision<fp32>} : vector<10x32xf32>, vector<32x32xf32>, vector<10x32xf32> -> vector<10x32xf32>
    %44 = vector.broadcast %34 : vector<1x32xf32> to vector<10x32xf32>
    %45 = arith.addf %43, %44 : vector<10x32xf32>
    %cst_35 = arith.constant 0.000000e+00 : f32
    %46 = vector.broadcast %cst_35 : f32 to vector<1x10xf32>
    %47 = arith.cmpf oeq, %28, %46 : vector<1x10xf32>
    %cst_36 = arith.constant 0.000000e+00 : f32
    %48 = vector.broadcast %cst_36 : f32 to vector<8x32xf32>
    %49 = vector.extract_strided_slice %39 {offsets = [0, 0], sizes = [8, 8], strides = [1, 1]} : vector<8x32xf32> to vector<8x8xf32>
    %50 = vector.extract_strided_slice %42 {offsets = [0, 0], sizes = [10, 8], strides = [1, 1]} : vector<10x32xf32> to vector<10x8xf32>
    %cst_37 = arith.constant dense<0.000000e+00> : vector<8x10xf32>
    %51 = tpu.matmul %49, %50, %cst_37 {dimension_numbers = #tpu.dot_dimension_numbers<[1], [1], [0], [0], [0, 0, 1, 0], [], []>, precision = #tpu.contract_precision<fp32>} : vector<8x8xf32>, vector<10x8xf32>, vector<8x10xf32> -> vector<8x10xf32>
    %cst_38 = arith.constant 0.353553385 : f32
    %52 = vector.broadcast %cst_38 : f32 to vector<8x10xf32>
    %53 = arith.mulf %51, %52 : vector<8x10xf32>
    %cst_39 = arith.constant -1.000000e+09 : f32
    %54 = vector.shape_cast %47 : vector<1x10xi1> to vector<1x10xi1>
    %55 = vector.broadcast %54 : vector<1x10xi1> to vector<8x10xi1>
    %56 = vector.broadcast %cst_39 : f32 to vector<8x10xf32>
    %57 = arith.select %55, %56, %53 : vector<8x10xi1>, vector<8x10xf32>
    %cst_40 = arith.constant dense<0xFF800000> : vector<8xf32>
    %58 = vector.multi_reduction <maximumf>, %57, %cst_40 [1] : vector<8x10xf32> to vector<8xf32>
    %59 = vector.shape_cast %58 : vector<8xf32> to vector<8x1xf32>
    %60 = vector.broadcast %59 : vector<8x1xf32> to vector<8x10xf32>
    %61 = arith.subf %57, %60 : vector<8x10xf32>
    %62 = math.exp %61 : vector<8x10xf32>
    %cst_41 = arith.constant dense<0.000000e+00> : vector<8xf32>
    %63 = vector.multi_reduction <add>, %62, %cst_41 [1] : vector<8x10xf32> to vector<8xf32>
    %64 = vector.shape_cast %63 : vector<8xf32> to vector<8x1xf32>
    %65 = tpu.reciprocal %64 : vector<8x1xf32> -> vector<8x1xf32>
    %66 = vector.broadcast %65 : vector<8x1xf32> to vector<8x10xf32>
    %67 = arith.mulf %62, %66 : vector<8x10xf32>
    %68 = vector.extract_strided_slice %45 {offsets = [0, 0], sizes = [10, 8], strides = [1, 1]} : vector<10x32xf32> to vector<10x8xf32>
    %cst_42 = arith.constant dense<0.000000e+00> : vector<8x8xf32>
    %69 = tpu.matmul %67, %68, %cst_42 {dimension_numbers = #tpu.dot_dimension_numbers<[1], [0], [0], [1], [0, 0, 1, 1], [], []>, precision = #tpu.contract_precision<fp32>} : vector<8x10xf32>, vector<10x8xf32>, vector<8x8xf32> -> vector<8x8xf32>
    %70 = vector.extract_strided_slice %35 {offsets = [0, 0], sizes = [8, 32], strides = [1, 1]} : vector<32x32xf32> to vector<8x32xf32>
    %cst_43 = arith.constant dense<0.000000e+00> : vector<8x32xf32>
    %71 = tpu.matmul %69, %70, %cst_43 {dimension_numbers = #tpu.dot_dimension_numbers<[1], [0], [0], [1], [0, 0, 1, 1], [], []>, precision = #tpu.contract_precision<fp32>} : vector<8x8xf32>, vector<8x32xf32>, vector<8x32xf32> -> vector<8x32xf32>
    %72 = arith.addf %48, %71 : vector<8x32xf32>
    %73 = vector.extract_strided_slice %39 {offsets = [0, 8], sizes = [8, 8], strides = [1, 1]} : vector<8x32xf32> to vector<8x8xf32>
    %74 = vector.extract_strided_slice %42 {offsets = [0, 8], sizes = [10, 8], strides = [1, 1]} : vector<10x32xf32> to vector<10x8xf32>
    %cst_44 = arith.constant dense<0.000000e+00> : vector<8x10xf32>
    %75 = tpu.matmul %73, %74, %cst_44 {dimension_numbers = #tpu.dot_dimension_numbers<[1], [1], [0], [0], [0, 0, 1, 0], [], []>, precision = #tpu.contract_precision<fp32>} : vector<8x8xf32>, vector<10x8xf32>, vector<8x10xf32> -> vector<8x10xf32>
    %cst_45 = arith.constant 0.353553385 : f32
    %76 = vector.broadcast %cst_45 : f32 to vector<8x10xf32>
    %77 = arith.mulf %75, %76 : vector<8x10xf32>
    %cst_46 = arith.constant -1.000000e+09 : f32
    %78 = vector.shape_cast %47 : vector<1x10xi1> to vector<1x10xi1>
    %79 = vector.broadcast %78 : vector<1x10xi1> to vector<8x10xi1>
    %80 = vector.broadcast %cst_46 : f32 to vector<8x10xf32>
    %81 = arith.select %79, %80, %77 : vector<8x10xi1>, vector<8x10xf32>
    %cst_47 = arith.constant dense<0xFF800000> : vector<8xf32>
    %82 = vector.multi_reduction <maximumf>, %81, %cst_47 [1] : vector<8x10xf32> to vector<8xf32>
    %83 = vector.shape_cast %82 : vector<8xf32> to vector<8x1xf32>
    %84 = vector.broadcast %83 : vector<8x1xf32> to vector<8x10xf32>
    %85 = arith.subf %81, %84 : vector<8x10xf32>
    %86 = math.exp %85 : vector<8x10xf32>
    %cst_48 = arith.constant dense<0.000000e+00> : vector<8xf32>
    %87 = vector.multi_reduction <add>, %86, %cst_48 [1] : vector<8x10xf32> to vector<8xf32>
    %88 = vector.shape_cast %87 : vector<8xf32> to vector<8x1xf32>
    %89 = tpu.reciprocal %88 : vector<8x1xf32> -> vector<8x1xf32>
    %90 = vector.broadcast %89 : vector<8x1xf32> to vector<8x10xf32>
    %91 = arith.mulf %86, %90 : vector<8x10xf32>
    %92 = vector.extract_strided_slice %45 {offsets = [0, 8], sizes = [10, 8], strides = [1, 1]} : vector<10x32xf32> to vector<10x8xf32>
    %cst_49 = arith.constant dense<0.000000e+00> : vector<8x8xf32>
    %93 = tpu.matmul %91, %92, %cst_49 {dimension_numbers = #tpu.dot_dimension_numbers<[1], [0], [0], [1], [0, 0, 1, 1], [], []>, precision = #tpu.contract_precision<fp32>} : vector<8x10xf32>, vector<10x8xf32>, vector<8x8xf32> -> vector<8x8xf32>
    %94 = vector.extract_strided_slice %35 {offsets = [8, 0], sizes = [8, 32], strides = [1, 1]} : vector<32x32xf32> to vector<8x32xf32>
    %cst_50 = arith.constant dense<0.000000e+00> : vector<8x32xf32>
    %95 = tpu.matmul %93, %94, %cst_50 {dimension_numbers = #tpu.dot_dimension_numbers<[1], [0], [0], [1], [0, 0, 1, 1], [], []>, precision = #tpu.contract_precision<fp32>} : vector<8x8xf32>, vector<8x32xf32>, vector<8x32xf32> -> vector<8x32xf32>
    %96 = arith.addf %72, %95 : vector<8x32xf32>
    %97 = vector.extract_strided_slice %39 {offsets = [0, 16], sizes = [8, 8], strides = [1, 1]} : vector<8x32xf32> to vector<8x8xf32>
    %98 = vector.extract_strided_slice %42 {offsets = [0, 16], sizes = [10, 8], strides = [1, 1]} : vector<10x32xf32> to vector<10x8xf32>
    %cst_51 = arith.constant dense<0.000000e+00> : vector<8x10xf32>
    %99 = tpu.matmul %97, %98, %cst_51 {dimension_numbers = #tpu.dot_dimension_numbers<[1], [1], [0], [0], [0, 0, 1, 0], [], []>, precision = #tpu.contract_precision<fp32>} : vector<8x8xf32>, vector<10x8xf32>, vector<8x10xf32> -> vector<8x10xf32>
    %cst_52 = arith.constant 0.353553385 : f32
    %100 = vector.broadcast %cst_52 : f32 to vector<8x10xf32>
    %101 = arith.mulf %99, %100 : vector<8x10xf32>
    %cst_53 = arith.constant -1.000000e+09 : f32
    %102 = vector.shape_cast %47 : vector<1x10xi1> to vector<1x10xi1>
    %103 = vector.broadcast %102 : vector<1x10xi1> to vector<8x10xi1>
    %104 = vector.broadcast %cst_53 : f32 to vector<8x10xf32>
    %105 = arith.select %103, %104, %101 : vector<8x10xi1>, vector<8x10xf32>
    %cst_54 = arith.constant dense<0xFF800000> : vector<8xf32>
    %106 = vector.multi_reduction <maximumf>, %105, %cst_54 [1] : vector<8x10xf32> to vector<8xf32>
    %107 = vector.shape_cast %106 : vector<8xf32> to vector<8x1xf32>
    %108 = vector.broadcast %107 : vector<8x1xf32> to vector<8x10xf32>
    %109 = arith.subf %105, %108 : vector<8x10xf32>
    %110 = math.exp %109 : vector<8x10xf32>
    %cst_55 = arith.constant dense<0.000000e+00> : vector<8xf32>
    %111 = vector.multi_reduction <add>, %110, %cst_55 [1] : vector<8x10xf32> to vector<8xf32>
    %112 = vector.shape_cast %111 : vector<8xf32> to vector<8x1xf32>
    %113 = tpu.reciprocal %112 : vector<8x1xf32> -> vector<8x1xf32>
    %114 = vector.broadcast %113 : vector<8x1xf32> to vector<8x10xf32>
    %115 = arith.mulf %110, %114 : vector<8x10xf32>
    %116 = vector.extract_strided_slice %45 {offsets = [0, 16], sizes = [10, 8], strides = [1, 1]} : vector<10x32xf32> to vector<10x8xf32>
    %cst_56 = arith.constant dense<0.000000e+00> : vector<8x8xf32>
    %117 = tpu.matmul %115, %116, %cst_56 {dimension_numbers = #tpu.dot_dimension_numbers<[1], [0], [0], [1], [0, 0, 1, 1], [], []>, precision = #tpu.contract_precision<fp32>} : vector<8x10xf32>, vector<10x8xf32>, vector<8x8xf32> -> vector<8x8xf32>
    %118 = vector.extract_strided_slice %35 {offsets = [16, 0], sizes = [8, 32], strides = [1, 1]} : vector<32x32xf32> to vector<8x32xf32>
    %cst_57 = arith.constant dense<0.000000e+00> : vector<8x32xf32>
    %119 = tpu.matmul %117, %118, %cst_57 {dimension_numbers = #tpu.dot_dimension_numbers<[1], [0], [0], [1], [0, 0, 1, 1], [], []>, precision = #tpu.contract_precision<fp32>} : vector<8x8xf32>, vector<8x32xf32>, vector<8x32xf32> -> vector<8x32xf32>
    %120 = arith.addf %96, %119 : vector<8x32xf32>
    %121 = vector.extract_strided_slice %39 {offsets = [0, 24], sizes = [8, 8], strides = [1, 1]} : vector<8x32xf32> to vector<8x8xf32>
    %122 = vector.extract_strided_slice %42 {offsets = [0, 24], sizes = [10, 8], strides = [1, 1]} : vector<10x32xf32> to vector<10x8xf32>
    %cst_58 = arith.constant dense<0.000000e+00> : vector<8x10xf32>
    %123 = tpu.matmul %121, %122, %cst_58 {dimension_numbers = #tpu.dot_dimension_numbers<[1], [1], [0], [0], [0, 0, 1, 0], [], []>, precision = #tpu.contract_precision<fp32>} : vector<8x8xf32>, vector<10x8xf32>, vector<8x10xf32> -> vector<8x10xf32>
    %cst_59 = arith.constant 0.353553385 : f32
    %124 = vector.broadcast %cst_59 : f32 to vector<8x10xf32>
    %125 = arith.mulf %123, %124 : vector<8x10xf32>
    %cst_60 = arith.constant -1.000000e+09 : f32
    %126 = vector.shape_cast %47 : vector<1x10xi1> to vector<1x10xi1>
    %127 = vector.broadcast %126 : vector<1x10xi1> to vector<8x10xi1>
    %128 = vector.broadcast %cst_60 : f32 to vector<8x10xf32>
    %129 = arith.select %127, %128, %125 : vector<8x10xi1>, vector<8x10xf32>
    %cst_61 = arith.constant dense<0xFF800000> : vector<8xf32>
    %130 = vector.multi_reduction <maximumf>, %129, %cst_61 [1] : vector<8x10xf32> to vector<8xf32>
    %131 = vector.shape_cast %130 : vector<8xf32> to vector<8x1xf32>
    %132 = vector.broadcast %131 : vector<8x1xf32> to vector<8x10xf32>
    %133 = arith.subf %129, %132 : vector<8x10xf32>
    %134 = math.exp %133 : vector<8x10xf32>
    %cst_62 = arith.constant dense<0.000000e+00> : vector<8xf32>
    %135 = vector.multi_reduction <add>, %134, %cst_62 [1] : vector<8x10xf32> to vector<8xf32>
    %136 = vector.shape_cast %135 : vector<8xf32> to vector<8x1xf32>
    %137 = tpu.reciprocal %136 : vector<8x1xf32> -> vector<8x1xf32>
    %138 = vector.broadcast %137 : vector<8x1xf32> to vector<8x10xf32>
    %139 = arith.mulf %134, %138 : vector<8x10xf32>
    %140 = vector.extract_strided_slice %45 {offsets = [0, 24], sizes = [10, 8], strides = [1, 1]} : vector<10x32xf32> to vector<10x8xf32>
    %cst_63 = arith.constant dense<0.000000e+00> : vector<8x8xf32>
    %141 = tpu.matmul %139, %140, %cst_63 {dimension_numbers = #tpu.dot_dimension_numbers<[1], [0], [0], [1], [0, 0, 1, 1], [], []>, precision = #tpu.contract_precision<fp32>} : vector<8x10xf32>, vector<10x8xf32>, vector<8x8xf32> -> vector<8x8xf32>
    %142 = vector.extract_strided_slice %35 {offsets = [24, 0], sizes = [8, 32], strides = [1, 1]} : vector<32x32xf32> to vector<8x32xf32>
    %cst_64 = arith.constant dense<0.000000e+00> : vector<8x32xf32>
    %143 = tpu.matmul %141, %142, %cst_64 {dimension_numbers = #tpu.dot_dimension_numbers<[1], [0], [0], [1], [0, 0, 1, 1], [], []>, precision = #tpu.contract_precision<fp32>} : vector<8x8xf32>, vector<8x32xf32>, vector<8x32xf32> -> vector<8x32xf32>
    %144 = arith.addf %120, %143 : vector<8x32xf32>
    %145 = vector.broadcast %36 : vector<1x32xf32> to vector<8x32xf32>
    %146 = arith.addf %144, %145 : vector<8x32xf32>
    %147 = arith.addf %1, %146 : vector<8x32xf32>
    %c0_65 = arith.constant 0 : index
    %c0_66 = arith.constant 0 : index
    %c0_67 = arith.constant 0 : index
    %148 = vector.load %arg14[%c0_65, %c0_66, %c0_67] : memref<1x8x32xf32, #tpu.memory_space<vmem>>, vector<1x8x32xf32>
    %149 = vector.shape_cast %148 : vector<1x8x32xf32> to vector<8x32xf32>
    %150 = vector.shape_cast %147 : vector<8x32xf32> to vector<1x8x32xf32>
    tpu.vector_store %arg14[%c0_65, %c0_66, %c0_67], %150 {strides = array<i32>} : memref<1x8x32xf32, #tpu.memory_space<vmem>>, vector<1x8x32xf32>,
    return
  }
  func.func @transform_0(%arg0: i32) -> (i32, i32, i32) {
    %c0_i32 = arith.constant 0 : i32
    %c0_i32_0 = arith.constant 0 : i32
    %c0_i32_1 = arith.constant 0 : i32
    return %arg0, %c0_i32, %c0_i32_0 : i32, i32, i32
  }
  func.func @transform_1(%arg0: i32) -> (i32, i32) {
    %c0_i32 = arith.constant 0 : i32
    %c0_i32_0 = arith.constant 0 : i32
    %c0_i32_1 = arith.constant 0 : i32
    return %c0_i32, %c0_i32_0 : i32, i32
  }
  func.func @transform_2(%arg0: i32) -> (i32, i32) {
    %c0_i32 = arith.constant 0 : i32
    %c0_i32_0 = arith.constant 0 : i32
    %c0_i32_1 = arith.constant 0 : i32
    return %c0_i32, %c0_i32_0 : i32, i32
  }
  func.func @transform_3(%arg0: i32) -> (i32, i32, i32) {
    %c0_i32 = arith.constant 0 : i32
    %c0_i32_0 = arith.constant 0 : i32
    %c0_i32_1 = arith.constant 0 : i32
    return %arg0, %c0_i32, %c0_i32_0 : i32, i32, i32
  }
  func.func @transform_4(%arg0: i32) -> (i32, i32) {
    %c0_i32 = arith.constant 0 : i32
    %c0_i32_0 = arith.constant 0 : i32
    %c0_i32_1 = arith.constant 0 : i32
    return %c0_i32, %c0_i32_0 : i32, i32
  }
  func.func @transform_5(%arg0: i32) -> (i32, i32) {
    %c0_i32 = arith.constant 0 : i32
    %c0_i32_0 = arith.constant 0 : i32
    %c0_i32_1 = arith.constant 0 : i32
    return %c0_i32, %c0_i32_0 : i32, i32
  }
  func.func @transform_6(%arg0: i32) -> (i32, i32) {
    %c0_i32 = arith.constant 0 : i32
    %c0_i32_0 = arith.constant 0 : i32
    %c0_i32_1 = arith.constant 0 : i32
    return %c0_i32, %c0_i32_0 : i32, i32
  }
  func.func @transform_7(%arg0: i32) -> (i32, i32) {
    %c0_i32 = arith.constant 0 : i32
    %c0_i32_0 = arith.constant 0 : i32
    %c0_i32_1 = arith.constant 0 : i32
    return %c0_i32, %c0_i32_0 : i32, i32
  }
  func.func @transform_8(%arg0: i32) -> (i32, i32) {
    %c0_i32 = arith.constant 0 : i32
    %c0_i32_0 = arith.constant 0 : i32
    %c0_i32_1 = arith.constant 0 : i32
    return %c0_i32, %c0_i32_0 : i32, i32
  }
  func.func @transform_9(%arg0: i32) -> (i32, i32) {
    %c0_i32 = arith.constant 0 : i32
    %c0_i32_0 = arith.constant 0 : i32
    %c0_i32_1 = arith.constant 0 : i32
    return %c0_i32, %c0_i32_0 : i32, i32
  }
  func.func @transform_10(%arg0: i32) -> (i32, i32) {
    %c0_i32 = arith.constant 0 : i32
    %c0_i32_0 = arith.constant 0 : i32
    %c0_i32_1 = arith.constant 0 : i32
    return %c0_i32, %c0_i32_0 : i32, i32
  }
  func.func @transform_11(%arg0: i32) -> (i32, i32) {
    %c0_i32 = arith.constant 0 : i32
    %c0_i32_0 = arith.constant 0 : i32
    %c0_i32_1 = arith.constant 0 : i32
    return %c0_i32, %c0_i32_0 : i32, i32
  }
  func.func @transform_12(%arg0: i32) -> (i32, i32, i32) {
    %c0_i32 = arith.constant 0 : i32
    %c0_i32_0 = arith.constant 0 : i32
    %c0_i32_1 = arith.constant 0 : i32
    return %arg0, %c0_i32, %c0_i32_0 : i32, i32, i32
  }
  func.func @transform_13(%arg0: i32) -> (i32, i32, i32) {
    %c0_i32 = arith.constant 0 : i32
    %c0_i32_0 = arith.constant 0 : i32
    %c0_i32_1 = arith.constant 0 : i32
    return %arg0, %c0_i32, %c0_i32_0 : i32, i32, i32
  }
}

module attributes {stable_mosaic.version = 11 : i64} {
  func.func @_ffn_kernel(%arg0: i32, %arg1: memref<1x8x32xf32, #tpu.memory_space<vmem>>, %arg2: memref<1x32xf32, #tpu.memory_space<vmem>>, %arg3: memref<1x32xf32, #tpu.memory_space<vmem>>, %arg4: memref<32x64xf32, #tpu.memory_space<vmem>>, %arg5: memref<1x64xf32, #tpu.memory_space<vmem>>, %arg6: memref<64x32xf32, #tpu.memory_space<vmem>>, %arg7: memref<1x32xf32, #tpu.memory_space<vmem>>, %arg8: memref<1x8x32xf32, #tpu.memory_space<vmem>>) attributes {dimension_semantics = [#tpu.dimension_semantics<parallel>], iteration_bounds = array<i64: 2>, scalar_prefetch = 0 : i64, scratch_operands = 0 : i64, tpu.core_type = #tpu.core_type<tc>, window_params = [{transform_indices = @transform_0, window_bounds = array<i64: 1, 8, 32>}, {pipeline_mode = #tpu.pipeline_mode<synchronous>, transform_indices = @transform_1, window_bounds = array<i64: 1, 32>}, {pipeline_mode = #tpu.pipeline_mode<synchronous>, transform_indices = @transform_2, window_bounds = array<i64: 1, 32>}, {pipeline_mode = #tpu.pipeline_mode<synchronous>, transform_indices = @transform_3, window_bounds = array<i64: 32, 64>}, {pipeline_mode = #tpu.pipeline_mode<synchronous>, transform_indices = @transform_4, window_bounds = array<i64: 1, 64>}, {pipeline_mode = #tpu.pipeline_mode<synchronous>, transform_indices = @transform_5, window_bounds = array<i64: 64, 32>}, {pipeline_mode = #tpu.pipeline_mode<synchronous>, transform_indices = @transform_6, window_bounds = array<i64: 1, 32>}, {transform_indices = @transform_7, window_bounds = array<i64: 1, 8, 32>}]} {
    %c0 = arith.constant 0 : index
    %c0_0 = arith.constant 0 : index
    %c0_1 = arith.constant 0 : index
    %0 = vector.load %arg1[%c0, %c0_0, %c0_1] : memref<1x8x32xf32, #tpu.memory_space<vmem>>, vector<1x8x32xf32>
    %1 = vector.shape_cast %0 : vector<1x8x32xf32> to vector<8x32xf32>
    %c0_2 = arith.constant 0 : index
    %c0_3 = arith.constant 0 : index
    %2 = vector.load %arg2[%c0_2, %c0_3] : memref<1x32xf32, #tpu.memory_space<vmem>>, vector<1x32xf32>
    %c0_4 = arith.constant 0 : index
    %c0_5 = arith.constant 0 : index
    %3 = vector.load %arg3[%c0_4, %c0_5] : memref<1x32xf32, #tpu.memory_space<vmem>>, vector<1x32xf32>
    %cst = arith.constant dense<0.000000e+00> : vector<8xf32>
    %4 = vector.multi_reduction <add>, %1, %cst [1] : vector<8x32xf32> to vector<8xf32>
    %5 = vector.shape_cast %4 : vector<8xf32> to vector<8x1xf32>
    %cst_6 = arith.constant 3.200000e+01 : f32
    %6 = vector.broadcast %cst_6 : f32 to vector<8x1xf32>
    %7 = arith.divf %5, %6 : vector<8x1xf32>
    %8 = vector.broadcast %7 : vector<8x1xf32> to vector<8x32xf32>
    %9 = arith.subf %1, %8 : vector<8x32xf32>
    %10 = arith.mulf %9, %9 : vector<8x32xf32>
    %cst_7 = arith.constant dense<0.000000e+00> : vector<8xf32>
    %11 = vector.multi_reduction <add>, %10, %cst_7 [1] : vector<8x32xf32> to vector<8xf32>
    %12 = vector.shape_cast %11 : vector<8xf32> to vector<8x1xf32>
    %cst_8 = arith.constant 3.100000e+01 : f32
    %13 = vector.broadcast %cst_8 : f32 to vector<8x1xf32>
    %14 = arith.divf %12, %13 : vector<8x1xf32>
    %15 = math.sqrt %14 : vector<8x1xf32>
    %cst_9 = arith.constant 9.99999997E-7 : f32
    %16 = vector.broadcast %cst_9 : f32 to vector<8x1xf32>
    %17 = arith.addf %15, %16 : vector<8x1xf32>
    %18 = tpu.reciprocal %17 : vector<8x1xf32> -> vector<8x1xf32>
    %19 = vector.broadcast %2 : vector<1x32xf32> to vector<8x32xf32>
    %20 = arith.mulf %19, %9 : vector<8x32xf32>
    %21 = vector.broadcast %18 : vector<8x1xf32> to vector<8x32xf32>
    %22 = arith.mulf %20, %21 : vector<8x32xf32>
    %23 = vector.broadcast %3 : vector<1x32xf32> to vector<8x32xf32>
    %24 = arith.addf %22, %23 : vector<8x32xf32>
    %c0_10 = arith.constant 0 : index
    %c0_11 = arith.constant 0 : index
    %25 = vector.load %arg4[%c0_10, %c0_11] : memref<32x64xf32, #tpu.memory_space<vmem>>, vector<32x64xf32>
    %cst_12 = arith.constant dense<0.000000e+00> : vector<8x64xf32>
    %26 = tpu.matmul %24, %25, %cst_12 {dimension_numbers = #tpu.dot_dimension_numbers<[1], [0], [0], [1], [0, 0, 1, 1], [], []>, precision = #tpu.contract_precision<fp32>} : vector<8x32xf32>, vector<32x64xf32>, vector<8x64xf32> -> vector<8x64xf32>
    %c0_13 = arith.constant 0 : index
    %c0_14 = arith.constant 0 : index
    %27 = vector.load %arg5[%c0_13, %c0_14] : memref<1x64xf32, #tpu.memory_space<vmem>>, vector<1x64xf32>
    %28 = vector.broadcast %27 : vector<1x64xf32> to vector<8x64xf32>
    %29 = arith.addf %26, %28 : vector<8x64xf32>
    %cst_15 = arith.constant 0.000000e+00 : f32
    %30 = vector.broadcast %cst_15 : f32 to vector<8x64xf32>
    %31 = arith.maximumf %29, %30 : vector<8x64xf32>
    %c0_16 = arith.constant 0 : index
    %c0_17 = arith.constant 0 : index
    %32 = vector.load %arg6[%c0_16, %c0_17] : memref<64x32xf32, #tpu.memory_space<vmem>>, vector<64x32xf32>
    %cst_18 = arith.constant dense<0.000000e+00> : vector<8x32xf32>
    %33 = tpu.matmul %31, %32, %cst_18 {dimension_numbers = #tpu.dot_dimension_numbers<[1], [0], [0], [1], [0, 0, 1, 1], [], []>, precision = #tpu.contract_precision<fp32>} : vector<8x64xf32>, vector<64x32xf32>, vector<8x32xf32> -> vector<8x32xf32>
    %c0_19 = arith.constant 0 : index
    %c0_20 = arith.constant 0 : index
    %34 = vector.load %arg7[%c0_19, %c0_20] : memref<1x32xf32, #tpu.memory_space<vmem>>, vector<1x32xf32>
    %35 = vector.broadcast %34 : vector<1x32xf32> to vector<8x32xf32>
    %36 = arith.addf %33, %35 : vector<8x32xf32>
    %37 = arith.addf %1, %36 : vector<8x32xf32>
    %c0_21 = arith.constant 0 : index
    %c0_22 = arith.constant 0 : index
    %c0_23 = arith.constant 0 : index
    %38 = vector.load %arg8[%c0_21, %c0_22, %c0_23] : memref<1x8x32xf32, #tpu.memory_space<vmem>>, vector<1x8x32xf32>
    %39 = vector.shape_cast %38 : vector<1x8x32xf32> to vector<8x32xf32>
    %40 = vector.shape_cast %37 : vector<8x32xf32> to vector<1x8x32xf32>
    tpu.vector_store %arg8[%c0_21, %c0_22, %c0_23], %40 {strides = array<i32>} : memref<1x8x32xf32, #tpu.memory_space<vmem>>, vector<1x8x32xf32>,
    return
  }
  func.func @transform_0(%arg0: i32) -> (i32, i32, i32) {
    %c0_i32 = arith.constant 0 : i32
    %c0_i32_0 = arith.constant 0 : i32
    %c0_i32_1 = arith.constant 0 : i32
    return %arg0, %c0_i32, %c0_i32_0 : i32, i32, i32
  }
  func.func @transform_1(%arg0: i32) -> (i32, i32) {
    %c0_i32 = arith.constant 0 : i32
    %c0_i32_0 = arith.constant 0 : i32
    %c0_i32_1 = arith.constant 0 : i32
    return %c0_i32, %c0_i32_0 : i32, i32
  }
  func.func @transform_2(%arg0: i32) -> (i32, i32) {
    %c0_i32 = arith.constant 0 : i32
    %c0_i32_0 = arith.constant 0 : i32
    %c0_i32_1 = arith.constant 0 : i32
    return %c0_i32, %c0_i32_0 : i32, i32
  }
  func.func @transform_3(%arg0: i32) -> (i32, i32) {
    %c0_i32 = arith.constant 0 : i32
    %c0_i32_0 = arith.constant 0 : i32
    %c0_i32_1 = arith.constant 0 : i32
    return %c0_i32, %c0_i32_0 : i32, i32
  }
  func.func @transform_4(%arg0: i32) -> (i32, i32) {
    %c0_i32 = arith.constant 0 : i32
    %c0_i32_0 = arith.constant 0 : i32
    %c0_i32_1 = arith.constant 0 : i32
    return %c0_i32, %c0_i32_0 : i32, i32
  }
  func.func @transform_5(%arg0: i32) -> (i32, i32) {
    %c0_i32 = arith.constant 0 : i32
    %c0_i32_0 = arith.constant 0 : i32
    %c0_i32_1 = arith.constant 0 : i32
    return %c0_i32, %c0_i32_0 : i32, i32
  }
  func.func @transform_6(%arg0: i32) -> (i32, i32) {
    %c0_i32 = arith.constant 0 : i32
    %c0_i32_0 = arith.constant 0 : i32
    %c0_i32_1 = arith.constant 0 : i32
    return %c0_i32, %c0_i32_0 : i32, i32
  }
  func.func @transform_7(%arg0: i32) -> (i32, i32, i32) {
    %c0_i32 = arith.constant 0 : i32
    %c0_i32_0 = arith.constant 0 : i32
    %c0_i32_1 = arith.constant 0 : i32
    return %arg0, %c0_i32, %c0_i32_0 : i32, i32, i32
  }
}

</mosaic_0001>

<bundles_post_ra>
// kernel: decoder_layer_pallas.5
= control target key start
LH: loop header
LB: loop body
LE: loop exit
PB: predicated region body
PF: predicated region fallthrough
CT: control target
= control target key end

     0   :  { %12 = vsyncpa [#allocation3], 0  ;;  %s1225_s0 = inlined_call_operand.vmem [shape: f32[2,8,32], index: 0, kind: input, shape index: {}]   ;;  %s1226_s1 = inlined_call_operand.vmem [shape: f32[1,32], index: 1, kind: input, shape index: {}]   ;;  %s1227_s2 = inlined_call_operand.vmem [shape: f32[1,32], index: 2, kind: input, shape index: {}]   ;;  %s1228_s3 = inlined_call_operand.vmem [shape: f32[32,64], index: 3, kind: input, shape index: {}]   ;;  %s1229_s4 = inlined_call_operand.vmem [shape: f32[1,64], index: 4, kind: input, shape index: {}]   ;;  %s1230_s5 = inlined_call_operand.vmem [shape: f32[64,32], index: 5, kind: input, shape index: {}]   ;;  %s1231_s6 = inlined_call_operand.vmem [shape: f32[1,32], index: 6, kind: input, shape index: {}]   ;;  %s1232_s7 = inlined_call_operand.hbm [shape: f32[2,8,32], index: 7, kind: output, shape index: {}]  }
   0x1   :  { %14 = vsyncpa [#allocation3 + $0x1], 0  ;;  %s1034_s24 = smov 0   ;;  %s1036_s25 = smov 0  }
   0x2   :  { %s1038_s26 = smov 0   ;;  %s1040_s27 = smov 0  }
   0x3 LB: > { %s1055_s28 = sadd.s32 4294967295, %s990_s27   ;;  %s865_s29 = sadd.s32 4294967294, %s990_s27   ;;  %s990_s27 = sphi %s1040_s27, %s1238_s27   ;;  %s986_s26 = sphi %s1038_s26, %s1237_s26   ;;  %s982_s25 = sphi %s1036_s25, %s1236_s25   ;;  %s978_s24 = sphi %s1034_s24, %s1235_s24  }
   0x4   : > { %s1059_s30 = sadd.s32 1, %s990_s27   ;;  %s179_s8 = sadd.s32 1, %s986_s26 }
   0x5   : > { %s176_s9 = ssub.s32 %s990_s27, %s1059_s30  ;;  %p189_p0 = scmp.ne.s32.totalorder %s986_s26, %s982_s25 }
   0x6   : > { %p177_p1 = scmp.eq.s32.totalorder %s176_s9, 0  ;;  %p190_p2 = scmp.eq.s32.totalorder %s1055_s28, 1 }
   0x7   : > { %p195_p3 = scmp.ne.s32.totalorder %s982_s25, %s978_s24  ;;  %p196_p4 = scmp.eq.s32.totalorder %s865_s29, 1 }
   0x8   : > { %s1070_s10 = scalar_select %p177_p1, %s986_s26, %s179_s8  }
   0x9   : > { %p1072_p5 = por %p190_p2, %p189_p0  ;;  %p1076_p6 = por %p196_p4, %p195_p3 }
   0xa   : > { %p868_p7 = scmp.ge.s32.totalorder %s990_s27, 1  ;;  %p239_p8 = scmp.lt.s32.totalorder %s990_s27, 3 }
   0xc   : > { %p240_p9 = pnand %p868_p7, %p239_p8 }
   0xd   : > { %p270_p10 = scmp.lt.s32.totalorder (!%p240_p9), %s1055_s28, 1  ;;  %s267_s22 = sand.u32 (!%p240_p9), 1, %s982_s25  }
   0xe   : > { %243 = sbr.rel (%p240_p9) target bundleno = 621 (0x26d), region = 48  ;;  %s869_s23 = sshll.u32 (!%p240_p9), %s267_s22, 3 }
   0xf   : > { %s872_s29 = sshll.u32 (!%p240_p9), %s1055_s28, 3  ;;  %s948_s21 = scalar_lea.hbm (!%p240_p9), %s1232_s7, 16 }
  0x13   : > { %s271_s13 = scalar_select %p270_p10, %s1055_s28, 1  ;;  %vm277_vm0 = vcmask 261120   ;;  %v992_v2 = vmov 32.0   ;;  %v993_v14 = vmov 31.0   ;;  %v341_v20 = vld [vmem:[%s1228_s3 + $0x18] sm:$0xff]  ;;  %v340_v21 = vld [vmem:[%s1228_s3 + $0x10] sm:$0xff] }
  0x14   : > { %920 = vrcp.f32 %v992_v2  ;;  %v339_v22 = vld [vmem:[%s1228_s3 + $0x8] sm:$0xff]  ;;  %v361_v23 = vand.u32 4294901760, %v341_v20  ;;  %v363_v24 = vand.u32 4294901760, %v340_v21  ;;  %v338_v26 = vld [vmem:[%s1228_s3] sm:$0xff]  ;;  %vm547_vm9 = vcmask 523264   ;;  %s791_s28 = scalar_lea.sflag [#allocation3], %s267_s22 }
  0x15   : > { %s870_s14 = sshll.u32 %s271_s13, 3  ;;  %922 = vrcp.f32 %v993_v14  ;;  %v365_v25 = vand.u32 4294901760, %v339_v22  ;;  %v367_v27 = vand.u32 4294901760, %v338_v26  ;;  %v916_v62 = vld [vmem:[%s1226_s1] ss:$0 sm:$0xff]  ;;  %s801_s13 = scalar_lea.hbm %s1232_s7, %s872_s29 }
  0x16   : > { %s273_s17 = scalar_lea.vmem %s1225_s0, %s870_s14  ;;  %v391_v28 = vsub.f32 %v341_v20, %v361_v23  ;;  %v397_v29 = vsub.f32 %v340_v21, %v363_v24  ;;  %462 = vmatpush.msra.mxu3 %v361_v23  ;;  %362 = vmatpush.msra.mxu0 %v361_v23  ;;  %s269_s14 = scalar_lea.vmem [#allocation2], %s869_s23 }
  0x17   : > { %v1087_v0 = vld [vmem:[%s273_s17] sm:$0xff]  ;;  %v403_v30 = vsub.f32 %v339_v22, %v365_v25  ;;  %v409_v32 = vsub.f32 %v338_v26, %v367_v27  ;;  %s803_s15 = sshll.u32 %s269_s14, 4  ;;  %s805_s16 = sshll.u32 %s801_s13, 4  ;;  %s804_s15 = int_to_ptr.vmem [resolvable:$true] %s803_s15  ;;  %s806_s16 = int_to_ptr.hbm [resolvable:$true] %s805_s16 }
  0x18   : > { %v278_v1 = vsel %vm277_vm0, %v1087_v0, 0.0  ;;  %v392_v33 = vand.u32 4294901760, %v391_v28  ;;  %v398_v34 = vand.u32 4294901760, %v397_v29  ;;  %433 = vmatpush.msra.mxu2 %v391_v28  ;;  %464 = vmatpush.msra.mxu3 %v363_v24  ;;  %s942_s17 = sshra.s32 %s806_s16, 4  ;;  %s943_s17 = int_to_ptr.hbm [resolvable:$true] %s942_s17 }
  0x19   : > { %279 = vadd.xlane.f32.xlu0 %v278_v1  ;;  %v404_v35 = vand.u32 4294901760, %v403_v30  ;;  %v410_v37 = vand.u32 4294901760, %v409_v32  ;;  %364 = vmatpush.msra.mxu0 %v363_v24  ;;  %s944_s18 = scalar_lea.hbm %s943_s17, 8  ;;  %p949_p0 = scmp.lt.s32.totalorder %s943_s17, %s1232_s7 }
  0x1a   : > { %v921_v3 = vpop.eup %920  ;;  %v393_v39 = vsub.f32 %v391_v28, %v392_v33  ;;  %v399_v40 = vsub.f32 %v397_v29, %v398_v34  ;;  %436 = vmatpush.msra.mxu2 %v397_v29  ;;  %466 = vmatpush.msra.mxu3 %v365_v25  ;;  %p945_p11 = scmp.ne.s32.totalorder %s943_s17, %s944_s18  ;;  %p950_p1 = scmp.lt.s32.totalorder %s948_s21, %s944_s18 }
  0x1b   : > { %v282_v4 = vmul.f32 32.0, %v921_v3  ;;  %vm286_vm1 = vweird.f32 %v921_v3  ;;  %v923_v15 = vpop.eup %922  ;;  %v405_v41 = vsub.f32 %v403_v30, %v404_v35  ;;  %366 = vmatpush.msra.mxu0 %v365_v25  ;;  %v411_v44 = vsub.f32 %v409_v32, %v410_v37 }
  0x1c   : > { %v295_v16 = vmul.f32 31.0, %v923_v15  ;;  %vm299_vm2 = vweird.f32 %v923_v15  ;;  %439 = vmatpush.msra.mxu2 %v403_v30  ;;  %v394_v42 = vand.u32 4294901760, %v393_v39  ;;  %v400_v43 = vand.u32 4294901760, %v399_v40  ;;  %468 = vmatpush.msra.mxu3 %v367_v27  ;;  %p946_p12 = pnand %p945_p11, %p1072_p5  ;;  %p951_p2 = por %p950_p1, %p949_p0 }
  0x1d   : > { %v283_v5 = vsub.f32 1.0, %v282_v4  ;;  %368 = vmatpush.msra.mxu0 %v367_v27  ;;  %v406_v45 = vand.u32 4294901760, %v405_v41  ;;  %v412_v46 = vand.u32 4294901760, %v411_v44 }
  0x1e   : > { %v296_v17 = vsub.f32 1.0, %v295_v16  ;;  %442 = vmatpush.msra.mxu2 %v409_v32  ;;  %395 = vmatpush.msra.mxu1 %v394_v42  ;;  %v538_v32 = vld [vmem:[%s1230_s5 + $0x18] sm:$0xff]  ;;  %v536_v42 = vld [vmem:[%s1230_s5 + $0x8] sm:$0xff]  ;;  %p947_p13 = pneg %p946_p12 }
  0x1f   : > { %v284_v6 = vmul.f32 %v921_v3, %v283_v5  ;;  %491 = vmatpush.msrb.mxu0 %v392_v33 }
  0x20   : > { %v297_v18 = vmul.f32 %v923_v15, %v296_v17  ;;  %401 = vmatpush.msra.mxu1 %v400_v43  ;;  %p952_p3 = pnand %p951_p2, %p947_p13 }
  0x21   : > { %v285_v7 = vadd.f32 %v921_v3, %v284_v6  ;;  %495 = vmatpush.msrb.mxu0 %v398_v34  ;;  %v917_v6 = vld [vmem:[%s1227_s2] ss:$0 sm:$0xff] }
  0x22   : > { %v298_v19 = vadd.f32 %v923_v15, %v297_v18  ;;  %407 = vmatpush.msra.mxu1 %v406_v45  ;;  %v541_v18 = vld [vmem:[%s1230_s5 + $0x30] sm:$0xff] }
  0x23   : > { %v287_v8 = vsel %vm286_vm1, %v921_v3, %v285_v7  ;;  %499 = vmatpush.msrb.mxu0 %v404_v35  ;;  %v1128_v20 = vand.u32 4294901760, %v541_v18  ;;  %v1162_v35 = vand.u32 4294901760, %v538_v32 }
  0x24   : > { %v300_v31 = vsel %vm299_vm2, %v923_v15, %v298_v19  ;;  %413 = vmatpush.msra.mxu1 %v412_v46 }
  0x25   : > { %503 = vmatpush.msrb.mxu0 %v410_v37  ;;  %v1134_v22 = vsub.f32 %v541_v18, %v1128_v20  ;;  %v537_v37 = vld [vmem:[%s1230_s5 + $0x10] sm:$0xff]  ;;  %v617_v40 = vsub.f32 %v538_v32, %v1162_v35 }
  0x26   : > { %522 = vmatpush.msrb.mxu1 %v361_v23  ;;  %v540_v23 = vld [vmem:[%s1230_s5 + $0x28] sm:$0xff]  ;;  %v569_v41 = vand.u32 4294901760, %v537_v37 }
  0x27   : > { %v600_v26 = vand.u32 4294901760, %v1134_v22  ;;  %v618_v45 = vand.u32 4294901760, %v617_v40 }
  0x28   : > { %524 = vmatpush.msrb.mxu1 %v363_v24  ;;  %v1141_v24 = vand.u32 4294901760, %v540_v23  ;;  %v623_v46 = vsub.f32 %v537_v37, %v569_v41 }
  0x2a   : > { %526 = vmatpush.msrb.mxu1 %v365_v25  ;;  %v605_v28 = vsub.f32 %v540_v23, %v1141_v24 }
  0x2c   : > { %528 = vmatpush.msrb.mxu1 %v367_v27  ;;  %v539_v27 = vld [vmem:[%s1230_s5 + $0x20] sm:$0xff]  ;;  %v606_v33 = vand.u32 4294901760, %v605_v28 }
  0x2d   : > { %v1153_v29 = vand.u32 4294901760, %v539_v27 }
  0x2f   : > { %v611_v34 = vsub.f32 %v539_v27, %v1153_v29 }
  0x31   : > { %v612_v39 = vand.u32 4294901760, %v611_v34 }
  0x33   : > { %v613_v44 = vsub.f32 %v611_v34, %v612_v39 }
  0x8c   : > { %v280_v9 = vpop.xlane.xlu0 %279 }
  0x8d   : > { %v288_v10 = vmul.f32 %v287_v8, %v280_v9 }
  0x8f   : > { %v1092_v11 = vsub.f32 %v1087_v0, %v288_v10 }
  0x91   : > { %v290_v12 = vmul.f32 %v1092_v11, %v1092_v11  ;;  %v332_v4 = vmul.f32 %v916_v62, %v1092_v11  ;;  %v542_v11 = vld [vmem:[%s1230_s5 + $0x38] sm:$0xff] }
  0x92   : > { %v1120_v17 = vand.u32 4294901760, %v542_v11 }
  0x93   : > { %v291_v13 = vsel %vm277_vm0, %v290_v12, 0.0 }
  0x94   : > { %292 = vadd.xlane.f32.xlu0 %v291_v13  ;;  %v1126_v19 = vsub.f32 %v542_v11, %v1120_v17  ;;  %560 = vmatpush.msrb.mxu2 %v1120_v17 }
  0x96   : > { %v594_v21 = vand.u32 4294901760, %v1126_v19  ;;  %562 = vmatpush.msrb.mxu2 %v1128_v20 }
  0x98   : > { %v595_v25 = vsub.f32 %v1126_v19, %v594_v21  ;;  %564 = vmatpush.msrb.mxu2 %v1141_v24 }
  0x9a   : > { %v596_v30 = vand.u32 4294901760, %v595_v25  ;;  %566 = vmatpush.msrb.mxu2 %v1153_v29 }
  0x9c   : > { %597 = vmatpush.msrb.mxu3 %v596_v30  ;;  %568 = vmatpush.msrb.mxu2 %v1162_v35 }
  0x9e   : > { %570 = vmatpush.msrb.mxu2 %v569_v41 }
 0x107   : > { %v293_v36 = vpop.xlane.xlu0 %292 }
 0x108   : > { %v301_v38 = vmul.f32 %v300_v31, %v293_v36  ;;  %v601_v31 = vsub.f32 %v1134_v22, %v600_v26 }
 0x10a   : > { %924 = vrsqrt.f32 %v301_v38  ;;  %vm309_vm3 = vcmp.eq.f32.partialorder %v301_v38, inf  ;;  %v312_v54 = vand.u32 2147483648, %v301_v38  ;;  %vm311_vm4 = vcmp.eq.f32.partialorder %v301_v38, 0.0 }
 0x10b   : > { %v602_v36 = vand.u32 4294901760, %v601_v31 }
 0x10d   : > { %603 = vmatpush.msrb.mxu3 %v602_v36 }
 0x110   : > { %v925_v47 = vpop.eup %924 }
 0x111   : > { %v303_v48 = vmul.f32 %v925_v47, %v301_v38 }
 0x113   : > { %v304_v49 = vmul.f32 %v925_v47, %v303_v48  ;;  %v535_v48 = vld [vmem:[%s1230_s5] sm:$0xff] }
 0x115   : > { %v305_v50 = vmul.f32 0.5, %v304_v49  ;;  %v614_v49 = vand.u32 4294901760, %v613_v44 }
 0x117   : > { %v306_v51 = vsub.f32 1.5, %v305_v50  ;;  %v619_v50 = vsub.f32 %v617_v40, %v618_v45 }
 0x119   : > { %v307_v52 = vmul.f32 %v925_v47, %v306_v51  ;;  %v571_v47 = vand.u32 4294901760, %v536_v42  ;;  %v624_v51 = vand.u32 4294901760, %v623_v46 }
 0x11b   : > { %v308_v53 = vmul.f32 %v307_v52, %v301_v38  ;;  %v573_v52 = vand.u32 4294901760, %v535_v48  ;;  %572 = vmatpush.msrb.mxu2 %v571_v47 }
 0x11d   : > { %v310_v55 = vsel %vm309_vm3, %v301_v38, %v308_v53  ;;  %v607_v38 = vsub.f32 %v605_v28, %v606_v33  ;;  %v629_v53 = vsub.f32 %v536_v42, %v571_v47  ;;  %574 = vmatpush.msrb.mxu2 %v573_v52 }
 0x11e   : > { %v313_v56 = vsel %vm311_vm4, %v312_v54, %v310_v55  ;;  %v620_v54 = vand.u32 4294901760, %v619_v50  ;;  %v625_v55 = vsub.f32 %v623_v46, %v624_v51 }
 0x11f   : > { %v314_v57 = vadd.f32 1e-06, %v313_v56  ;;  %v608_v43 = vand.u32 4294901760, %v607_v38  ;;  %v635_v56 = vsub.f32 %v535_v48, %v573_v52 }
 0x121   : > { %926 = vrcp.f32 %v314_v57  ;;  %v326_v61 = vand.u32 2147483648, %v314_v57  ;;  %v324_v1 = vand.u32 2147483647, %v314_v57  ;;  %vm320_vm6 = vweird.f32 %v314_v57  ;;  %609 = vmatpush.msrb.mxu3 %v608_v43 }
 0x123   : > { %v327_v3 = vor.u32 1.1754944e-38, %v326_v61  ;;  %vm325_vm8 = vcmp.eq.f32.partialorder %v324_v1, 8.507059e+37  ;;  %615 = vmatpush.msrb.mxu3 %v614_v49  ;;  %v918_v1 = vld [vmem:[%s1229_s4] ss:$0 sm:$0xff] }
 0x125   : > { %621 = vmatpush.msrb.mxu3 %v620_v54 }
 0x127   : > { %v927_v58 = vpop.eup %926 }
 0x128   : > { %v316_v59 = vmul.f32 %v927_v58, %v314_v57  ;;  %vm321_vm5 = vweird.f32 %v927_v58  ;;  %v630_v57 = vand.u32 4294901760, %v629_v53 }
 0x129   : > { %vm322_vm7 = vmor %vm320_vm6, %vm321_vm5 }
 0x12a   : > { %v317_v60 = vsub.f32 1.0, %v316_v59  ;;  %v636_v59 = vand.u32 4294901760, %v635_v56 }
 0x12c   : > { %v318_v63 = vmul.f32 %v927_v58, %v317_v60  ;;  %v631_v60 = vsub.f32 %v629_v53, %v630_v57  ;;  %v637_v61 = vsub.f32 %v635_v56, %v636_v59 }
 0x12e   : > { %v319_v2 = vadd.f32 %v927_v58, %v318_v63  ;;  %v632_v62 = vand.u32 4294901760, %v631_v60  ;;  %v638_v63 = vand.u32 4294901760, %v637_v61 }
 0x130   : > { %v323_v5 = vsel %vm322_vm7, %v927_v58, %v319_v2  ;;  %v626_v58 = vand.u32 4294901760, %v625_v55 }
 0x131   : > { %v328_v7 = vsel %vm325_vm8, %v327_v3, %v323_v5 }
 0x132   : > { %v333_v8 = vmul.f32 %v332_v4, %v328_v7  ;;  %627 = vmatpush.msrb.mxu3 %v626_v58 }
 0x134   : > { %v337_v9 = vadd.f32 %v917_v6, %v333_v8  ;;  %633 = vmatpush.msrb.mxu3 %v632_v62 }
 0x136   : > { %v347_v10 = vsel %vm277_vm0, %v337_v9, 0  ;;  %639 = vmatpush.msrb.mxu3 %v638_v63 }
 0x137   : > { %v369_v12 = vand.u32 4294901760, %v347_v10 }
 0x139   : > { %415 = vmatmul.f32.vlgmr.msra.gmra.mxu1 %v369_v12  ;;  %v370_v13 = vsub.f32 %v347_v10, %v369_v12 }
 0x13a   : > { %692 = vmatpush.msra.mxu1 %v1120_v17 }
 0x13b   : > { %445 = vmatmul.f32.vlgmr.msra.gmra.mxu2 %v370_v13  ;;  %v371_v14 = vand.u32 4294901760, %v370_v13 }
 0x13c   : > { %694 = vmatpush.msra.mxu1 %v1128_v20  ;;  %725 = vmatpush.msra.mxu2 %v594_v21  ;;  %v919_v21 = vld [vmem:[%s1231_s6] ss:$0 sm:$0xff] }
 0x13d   : > { %472 = vmatmul.f32.vlgmr.msra.gmra.mxu3 %v371_v14  ;;  %v372_v15 = vsub.f32 %v370_v13, %v371_v14 }
 0x13e   : > { %696 = vmatpush.msra.mxu1 %v1141_v24  ;;  %729 = vmatpush.msra.mxu2 %v600_v26 }
 0x13f   : > { %v373_v16 = vand.u32 4294901760, %v372_v15  ;;  %768 = vmatpush.msra.mxu3 %v1120_v17 }
 0x140   : > { %698 = vmatpush.msra.mxu1 %v1153_v29  ;;  %733 = vmatpush.msra.mxu2 %v606_v33 }
 0x141   : > { %374 = vmatmul.f32.vlgmr.msra.gmra.mxu0 %v373_v16  ;;  %530 = vmatmul.f32.vlgmr.msrb.gmra.mxu1 %v369_v12 }
 0x142   : > { %655 = vmatpush.msra.mxu0 %v1126_v19  ;;  %700 = vmatpush.msra.mxu1 %v1162_v35 }
 0x143   : > { %737 = vmatpush.msra.mxu2 %v612_v39  ;;  %770 = vmatpush.msra.mxu3 %v1128_v20 }
 0x144   : > { %658 = vmatpush.msra.mxu0 %v1134_v22  ;;  %702 = vmatpush.msra.mxu1 %v569_v41 }
 0x145   : > { %741 = vmatpush.msra.mxu2 %v618_v45  ;;  %772 = vmatpush.msra.mxu3 %v1141_v24 }
 0x146   : > { %661 = vmatpush.msra.mxu0 %v605_v28  ;;  %704 = vmatpush.msra.mxu1 %v571_v47 }
 0x147   : > { %745 = vmatpush.msra.mxu2 %v624_v51  ;;  %774 = vmatpush.msra.mxu3 %v1153_v29 }
 0x148   : > { %664 = vmatpush.msra.mxu0 %v611_v34  ;;  %706 = vmatpush.msra.mxu1 %v573_v52 }
 0x149   : > { %505 = vmatmul.f32.vlgmr.msrb.gmra.mxu0 %v369_v12  ;;  %749 = vmatpush.msra.mxu2 %v630_v57 }
 0x14a   : > { %667 = vmatpush.msra.mxu0 %v617_v40  ;;  %776 = vmatpush.msra.mxu3 %v1162_v35 }
 0x14b   : > { %753 = vmatpush.msra.mxu2 %v636_v59 }
 0x14c   : > { %670 = vmatpush.msra.mxu0 %v623_v46  ;;  %778 = vmatpush.msra.mxu3 %v569_v41 }
 0x14e   : > { %673 = vmatpush.msra.mxu0 %v629_v53  ;;  %780 = vmatpush.msra.mxu3 %v571_v47 }
 0x150   : > { %676 = vmatpush.msra.mxu0 %v635_v56  ;;  %782 = vmatpush.msra.mxu3 %v573_v52 }
 0x1b6   : > { %v416_v2 = vpop.f32.mrf.mxu1 }
 0x1be   : > { %v375_v3 = vpop.f32.mrf.mxu0  ;;  %v446_v6 = vpop.f32.mrf.mxu2 }
 0x1bf   : > { %v376_v4 = vadd.f32 %v918_v1, %v375_v3  ;;  %v531_v13 = vpop.f32.mrf.mxu1 }
 0x1c0   : > { %v473_v8 = vpop.f32.mrf.mxu3 }
 0x1c1   : > { %v417_v5 = vadd.f32 %v416_v2, %v376_v4 }
 0x1c3   : > { %v447_v7 = vadd.f32 %v446_v6, %v417_v5 }
 0x1c5   : > { %v474_v9 = vadd.f32 %v473_v8, %v447_v7 }
 0x1c6   : > { %v506_v10 = vpop.f32.mrf.mxu0 }
 0x1c7   : > { %v507_v12 = vadd.f32 %v506_v10, %v474_v9 }
 0x1c9   : > { %v532_v14 = vadd.f32 %v531_v13, %v507_v12 }
 0x1cb   : > { %v534_v15 = vmax.f32 %v532_v14, 0.0 }
 0x1cd   : > { %v549_v16 = vsel %vm547_vm9, %v534_v15, 0 }
 0x1ce   : > { %v575_v11 = vand.u32 4294901760, %v549_v16 }
 0x1d0   : > { %v576_v17 = vsub.f32 %v549_v16, %v575_v11  ;;  %641 = vmatmul.f32.vlgmr.msrb.gmra.mxu3 %v575_v11 }
 0x1d2   : > { %679 = vmatmul.f32.vlgmr.msra.gmra.mxu0 %v576_v17  ;;  %v577_v18 = vand.u32 4294901760, %v576_v17 }
 0x1d4   : > { %710 = vmatmul.f32.vlgmr.msra.gmra.mxu1 %v577_v18  ;;  %v578_v19 = vsub.f32 %v576_v17, %v577_v18 }
 0x1d6   : > { %v579_v20 = vand.u32 4294901760, %v578_v19 }
 0x1d8   : > { %580 = vmatmul.f32.vlgmr.msrb.gmra.mxu2 %v579_v20  ;;  %784 = vmatmul.f32.vlgmr.msra.gmra.mxu3 %v575_v11 }
 0x1e0   : > { %755 = vmatmul.f32.vlgmr.msra.gmra.mxu2 %v575_v11 }
 0x24f   : > { %v680_v26 = vpop.f32.mrf.mxu0 }
 0x251   : > { %v711_v28 = vpop.f32.mrf.mxu1 }
 0x253   : > { %v642_v22 = vpop.f32.mrf.mxu3 }
 0x25b   : > { %v581_v23 = vpop.f32.mrf.mxu2  ;;  %v785_v32 = vpop.f32.mrf.mxu3 }
 0x25c   : > { %v582_v24 = vadd.f32 %v919_v21, %v581_v23 }
 0x25e   : > { %v643_v25 = vadd.f32 %v642_v22, %v582_v24 }
 0x260   : > { %v681_v27 = vadd.f32 %v680_v26, %v643_v25 }
 0x262   : > { %v712_v29 = vadd.f32 %v711_v28, %v681_v27 }
 0x263   : > { %v756_v30 = vpop.f32.mrf.mxu2 }
 0x264   : > { %v757_v31 = vadd.f32 %v756_v30, %v712_v29 }
 0x266   : > { %v786_v33 = vadd.f32 %v785_v32, %v757_v31 }
 0x268   : > { %v788_v34 = vadd.f32 %v786_v33, %v1087_v0 }
 0x26a   : > { %789 = vst.msk [vmem:[%s269_s14] sm:$0xff] %vm277_vm0, %v788_v34 }
 0x26b   : > { %955 = shalt.err (!%p952_p3)
}
 0x26c   : > { %875 = dma.vmem_to_hbm [thread:$0]  (%p1072_p5), %s804_s15, 128, %s806_s16, %s791_s28  }
 0x26d PF: > { %p881_p4 = scmp.ge.s32.totalorder %s990_s27, 2  ;;  %s817_s22 = sand.u32 1, %s978_s24  }
 0x26e   : > { %s818_s8 = scalar_lea.sflag [#allocation3], %s817_s22 }
 0x26f   : > { %p878_p7 = pnand %p881_p4, %p1076_p6 }
 0x271   : > { %p879_p8 = pneg %p878_p7 }
 0x273   : > { %973 = dma.done.wait (%p879_p8), %s818_s8, 128  }
 0x274   : > { %975 = vsyncadd (%p879_p8), %s818_s8, 4294967168  ;;  %p17_p9 = scmp.ge.s32.totalorder %s1059_s30, 4   ;;  %s1235_s24 = smov %s982_s25 }
 0x275   : > { %s1236_s25 = smov %s986_s26  ;;  %s1237_s26 = smov %s1070_s10 }
 0x276   : > { %s1238_s27 = smov %s1059_s30  ;;  %19 = sbr.rel (!%p17_p9) target bundleno = 3 (0x3), region = 83 }
 0x27b   :  { %824 = vsyncpa [#allocation3], 1 }
 0x27c   :  { %826 = vsyncpa [#allocation3 + $0x1], 1 }

// kernel: decoder_layer_pallas.3
= control target key start
LH: loop header
LB: loop body
LE: loop exit
PB: predicated region body
PF: predicated region fallthrough
CT: control target
= control target key end

     0   :  { %s4438_s0 = inlined_call_operand.hbm [shape: f32[2,8,32], index: 0, kind: input, shape index: {}]   ;;  %s4439_s1 = inlined_call_operand.hbm [shape: f32[1,32], index: 1, kind: input, shape index: {}]   ;;  %s4440_s2 = inlined_call_operand.hbm [shape: f32[1,32], index: 2, kind: input, shape index: {}]   ;;  %s4441_s3 = inlined_call_operand.vmem [shape: f32[32,32], index: 3, kind: input, shape index: {}]   ;;  %s4442_s4 = inlined_call_operand.hbm [shape: f32[1,32], index: 4, kind: input, shape index: {}]   ;;  %s4443_s5 = inlined_call_operand.hbm [shape: f32[32,32], index: 5, kind: input, shape index: {}]   ;;  %s4444_s6 = inlined_call_operand.hbm [shape: f32[1,32], index: 6, kind: input, shape index: {}]   ;;  %s4445_s7 = inlined_call_operand.hbm [shape: f32[32,32], index: 7, kind: input, shape index: {}]   ;;  %s4446_s8 = inlined_call_operand.hbm [shape: f32[1,32], index: 8, kind: input, shape index: {}]   ;;  %s4447_s9 = inlined_call_operand.hbm [shape: f32[32,32], index: 9, kind: input, shape index: {}]   ;;  %s4448_s10 = inlined_call_operand.hbm [shape: f32[1,32], index: 10, kind: input, shape index: {}]   ;;  %s4449_s11 = inlined_call_operand.hbm [shape: f32[1,8,8], index: 11, kind: input, shape index: {}]   ;;  %s4450_s12 = inlined_call_operand.vmem [shape: f32[2,8,32], index: 12, kind: output, shape index: {}]  }
   0x1   :  { %4451 = sst [smem:[#allocation25_spill]] %s4439_s1 }
   0x2   :  { %4452 = sst [smem:[#allocation26_spill]] %s4442_s4 }
   0x3   :  { %4453 = sst [smem:[#allocation27_spill]] %s4444_s6 }
   0x4   :  { %17 = vsyncpa [#allocation3], 0 }
   0x5   :  { %19 = vsyncpa [#allocation3 + $0x1], 0 }
   0x6   :  { %20 = vsyncpa [#allocation5], 0 }
   0x7   :  { %21 = vsyncpa [#allocation8], 0 }
   0x8   :  { %22 = vsyncpa [#allocation11], 0 }
   0x9   :  { %23 = vsyncpa [#allocation14], 0 }
   0xa   :  { %24 = vsyncpa [#allocation17], 0  ;;  %s4000_s21 = smov 0   ;;  %s4002_s22 = smov 0  }
   0xb   :  { %s4004_s23 = smov 0   ;;  %s4006_s24 = smov 0  }
   0xc LB: > { %s4454_s1 = sld [smem:[#allocation25_spill]]  ;;  %s4024_s28 = sadd.s32 4294967295, %s3916_s24   ;;  %s3916_s24 = sphi %s4006_s24, %s4464_s24   ;;  %s3912_s23 = sphi %s4004_s23, %s4463_s23   ;;  %s3908_s22 = sphi %s4002_s22, %s4462_s22   ;;  %s3904_s21 = sphi %s4000_s21, %s4461_s21  }
   0xd   : > { %p3325_p0 = scmp.ge.s32.totalorder %s3916_s24, 1  ;;  %p51_p1 = scmp.eq.s32.totalorder %s4024_s28, 0 }
   0xe   : > { %p318_p2 = scmp.lt.s32.totalorder %s3916_s24, 3  ;;  %s3918_s30 = smov [#allocation4]  }
   0xf   : > { %s332_s13 = sshll.u32 %s3918_s30, 4  ;;  %s4456_s4 = sld [smem:[#allocation26_spill]]  ;;  %s333_s13 = int_to_ptr.vmem [resolvable:$true] %s332_s13 }
  0x10   : > { %p4029_p3 = pnand %p3325_p0, %p318_p2  ;;  %s3919_s18 = smov [#allocation7]  }
  0x11   : > { %s359_s19 = sshll.u32 %s3919_s18, 4  ;;  %s4458_s6 = sld [smem:[#allocation27_spill]]  ;;  %s360_s19 = int_to_ptr.vmem [resolvable:$true] %s359_s19 }
  0x12   : > { %s330_s27 = sshll.u32 %s4454_s1, 4  ;;  %p3396_p4 = pneg %p4029_p3  ;;  %s331_s27 = int_to_ptr.hbm [resolvable:$true] %s330_s27 }
  0x13   : > { %s409_s15 = sshll.u32 %s4446_s8, 4  ;;  %s3920_s1 = smov [#allocation10]   ;;  %s410_s15 = int_to_ptr.hbm [resolvable:$true] %s409_s15 }
  0x14   : > { %p4040_p5 = pnand %p3396_p4, %p51_p1  ;;  %s3921_s18 = smov [#allocation13]  }
  0x15   : > { %s357_s16 = sshll.u32 %s4456_s4, 4  ;;  %s385_s4 = sshll.u32 %s3920_s1, 4  ;;  %s358_s16 = int_to_ptr.hbm [resolvable:$true] %s357_s16  ;;  %s386_s4 = int_to_ptr.vmem [resolvable:$true] %s385_s4 }
  0x16   : > { %3399 = dma.hbm_to_vmem [thread:$0]  (!%p4040_p5), %s331_s27, 16, %s333_s13, [#allocation5]  }
  0x17   : > { %s383_s26 = sshll.u32 %s4458_s6, 4  ;;  %s411_s20 = sshll.u32 %s3921_s18, 4  ;;  %s384_s26 = int_to_ptr.hbm [resolvable:$true] %s383_s26  ;;  %s412_s20 = int_to_ptr.vmem [resolvable:$true] %s411_s20 }
  0x18   : > { %3405 = dma.hbm_to_vmem [thread:$0]  (!%p4040_p5), %s358_s16, 16, %s360_s19, [#allocation8]  }
  0x19   : > { %3411 = dma.hbm_to_vmem [thread:$0]  (!%p4040_p5), %s384_s26, 16, %s386_s4, [#allocation11]  }
  0x1a   : > { %s435_s27 = sshll.u32 %s4448_s10, 4  ;;  %s342_s19 = sshll.u32 %s4440_s2, 4  ;;  %s436_s27 = int_to_ptr.hbm [resolvable:$true] %s435_s27  ;;  %s343_s19 = int_to_ptr.hbm [resolvable:$true] %s342_s19 }
  0x1b   : > { %3417 = dma.hbm_to_vmem [thread:$0]  (!%p4040_p5), %s410_s15, 16, %s412_s20, [#allocation14]  }
  0x1c   : > { %s3922_s1 = smov [#allocation16]   ;;  %s3923_s4 = smov [#allocation6]  }
  0x1d   : > { %s437_s30 = sshll.u32 %s3922_s1, 4  ;;  %s344_s26 = sshll.u32 %s3923_s4, 4  ;;  %s438_s30 = int_to_ptr.vmem [resolvable:$true] %s437_s30  ;;  %s345_s26 = int_to_ptr.vmem [resolvable:$true] %s344_s26 }
  0x1e   : > { %3423 = dma.hbm_to_vmem [thread:$0]  (!%p4040_p5), %s436_s27, 16, %s438_s30, [#allocation17]  }
  0x1f   : > { %s368_s18 = sshll.u32 %s4443_s5, 4  ;;  %s3924_s15 = smov [#allocation9]   ;;  %s369_s18 = int_to_ptr.hbm [resolvable:$true] %s368_s18 }
  0x20   : > { %3402 = dma.hbm_to_vmem [thread:$0]  (!%p4040_p5), %s343_s19, 16, %s345_s26, [#allocation5]  }
  0x21   : > { %s370_s20 = sshll.u32 %s3924_s15, 4  ;;  %s394_s16 = sshll.u32 %s4445_s7, 4  ;;  %s371_s20 = int_to_ptr.vmem [resolvable:$true] %s370_s20  ;;  %s395_s16 = int_to_ptr.hbm [resolvable:$true] %s394_s16 }
  0x22   : > { %s3925_s27 = smov 128   ;;  %s3926_s1 = smov 8  }
  0x23   : > { %3408 = dma.hbm_to_vmem [thread:$0]  (!%p4040_p5), %s369_s18, 512, %s371_s20, [#allocation8], %s3925_s27, %s3925_s27, %s3926_s1  }
  0x24   : > { %s3927_s30 = smov [#allocation12]   ;;  %s420_s19 = sshll.u32 %s4447_s9, 4  ;;  %s421_s19 = int_to_ptr.hbm [resolvable:$true] %s420_s19 }
  0x25   : > { %s396_s4 = sshll.u32 %s3927_s30, 4  ;;  %s447_s18 = sshll.u32 %s4449_s11, 4  ;;  %s397_s4 = int_to_ptr.vmem [resolvable:$true] %s396_s4  ;;  %s448_s18 = int_to_ptr.hbm [resolvable:$true] %s447_s18 }
  0x26   : > { %3414 = dma.hbm_to_vmem [thread:$0]  (!%p4040_p5), %s395_s16, 512, %s397_s4, [#allocation11], %s3925_s27, %s3925_s27, %s3926_s1  }
  0x27   : > { %s3928_s20 = smov [#allocation15]   ;;  %s3929_s13 = smov [#allocation18]  }
  0x28   : > { %s422_s25 = sshll.u32 %s3928_s20, 4  ;;  %s449_s16 = sshll.u32 %s3929_s13, 4  ;;  %s423_s25 = int_to_ptr.vmem [resolvable:$true] %s422_s25  ;;  %s450_s16 = int_to_ptr.vmem [resolvable:$true] %s449_s16 }
  0x29   : > { %3420 = dma.hbm_to_vmem [thread:$0]  (!%p4040_p5), %s421_s19, 512, %s423_s25, [#allocation14], %s3925_s27, %s3925_s27, %s3926_s1  }
  0x2a   : > { %3426 = dma.hbm_to_vmem [thread:$0]  (!%p4040_p5), %s448_s18, 128, %s450_s16, [#allocation17]  }
  0x2b   : > { %s4089_s30 = sadd.s32 1, %s3916_s24   ;;  %s37_s6 = sadd.s32 1, %s3912_s23 }
  0x2c   : > { %s34_s4 = ssub.s32 %s3916_s24, %s4089_s30  ;;  %p44_p7 = scmp.ne.s32.totalorder %s3912_s23, %s3908_s22 }
  0x2d   : > { %p35_p6 = scmp.eq.s32.totalorder %s34_s4, 0  ;;  %p45_p8 = scmp.eq.s32.totalorder %s3916_s24, 0 }
  0x2e   : > { %p50_p9 = scmp.ne.s32.totalorder %s3908_s22, %s3904_s21  ;;  %p3441_p11 = scmp.lt.s32.totalorder %s3916_s24, 2 }
  0x2f   : > { %s4100_s14 = scalar_select %p35_p6, %s3912_s23, %s37_s6  }
  0x30   : > { %p4104_p10 = por %p51_p1, %p50_p9  ;;  %s460_s1 = sand.u32 1, %s3912_s23  }
  0x31   : > { %s3338_s17 = sshll.u32 %s3916_s24, 3  ;;  %p46_p12 = por %p45_p8, %p44_p7 }
  0x32   : > { %s3337_s19 = sshll.u32 %s460_s1, 3  ;;  %s468_s18 = scalar_lea.hbm %s4438_s0, %s3338_s17 }
  0x33   : > { %s470_s20 = sshll.u32 %s468_s18, 4  ;;  %s464_s25 = scalar_lea.vmem [#allocation2], %s3337_s19  ;;  %s471_s20 = int_to_ptr.hbm [resolvable:$true] %s470_s20 }
  0x34   : > { %s472_s13 = sshll.u32 %s464_s25, 4  ;;  %p4114_p13 = pnand %p3441_p11, %p46_p12  ;;  %s473_s13 = int_to_ptr.vmem [resolvable:$true] %s472_s13 }
  0x35   : > { %s461_s16 = scalar_lea.sflag [#allocation3], %s460_s1  ;;  %s3832_s4 = sshra.s32 %s471_s20, 4  ;;  %s3833_s4 = int_to_ptr.hbm [resolvable:$true] %s3832_s4 }
  0x36   : > { %s3834_s24 = scalar_lea.hbm %s3833_s4, 8  ;;  %p3836_p2 = pneg %p4114_p13 }
  0x37   : > { %p3835_p0 = scmp.ne.s32.totalorder %s3833_s4, %s3834_s24  ;;  %s3839_s19 = scalar_lea.hbm %s4438_s0, 16 }
  0x38   : > { %p3840_p6 = scmp.lt.s32.totalorder %s3833_s4, %s4438_s0  ;;  %p3841_p7 = scmp.lt.s32.totalorder %s3839_s19, %s3834_s24 }
  0x39   : > { %p3837_p4 = pnand %p3836_p2, %p3835_p0 }
  0x3a   : > { %p3842_p8 = por %p3841_p7, %p3840_p6 }
  0x3b   : > { %p3838_p5 = pneg %p3837_p4 }
  0x3d   : > { %p3843_p9 = pnand %p3842_p8, %p3838_p5 }
  0x3f   : > { %3846 = shalt.err (!%p3843_p9)
}
  0x40   : > { %3430 = dma.hbm_to_vmem [thread:$0]  (!%p4114_p13), %s471_s20, 128, %s473_s13, %s461_s16  }
  0x41   : > { %481 = sbr.rel (%p4029_p3) target bundleno = 2869 (0xb35), region = 68  ;;  %s483_s1 = sand.u32 (!%p4029_p3), 1, %s3908_s22  }
  0x42   : > { %s4131_s18 = sshll.u32 (!%p4029_p3), %s483_s1, 3  ;;  %s484_s25 = scalar_lea.sflag (!%p4029_p3), [#allocation3], %s483_s1 }
  0x43   : > { %s487_s6 = scalar_lea.vmem (!%p4029_p3), [#allocation2], %s4131_s18 }
  0x46   : > { %3879 = dma.done.wait (%p4104_p10), %s484_s25, 128  }
  0x47   : > { %3881 = vsyncadd (%p4104_p10), %s484_s25, 4294967168 }
  0x48   : > { %3883 = dma.done.wait (%p51_p1), [#allocation5], 32  }
  0x49   : > { %3885 = vsyncadd (%p51_p1), [#allocation5], 4294967264 }
  0x4a   : > { %3887 = dma.done.wait (%p51_p1), [#allocation8], 528  }
  0x4b   : > { %3889 = vsyncadd (%p51_p1), [#allocation8], 4294966768 }
  0x4c   : > { %3891 = dma.done.wait (%p51_p1), [#allocation11], 528  }
  0x4d   : > { %3893 = vsyncadd (%p51_p1), [#allocation11], 4294966768 }
  0x4e   : > { %3895 = dma.done.wait (%p51_p1), [#allocation14], 528  }
  0x4f   : > { %3897 = vsyncadd (%p51_p1), [#allocation14], 4294966768 }
  0x50   : > { %3899 = dma.done.wait (%p51_p1), [#allocation17], 144  }
  0x51   : > { %3901 = vsyncadd (%p51_p1), [#allocation17], 4294967152  ;;  %vm585_vm0 = vcmask 261120   ;;  %v582_v0 = vld [vmem:[%s487_s6] sm:$0xff]  ;;  %v3930_v2 = vmov 32.0   ;;  %v3931_v14 = vmov 31.0  }
  0x52   : > { %v586_v1 = vsel %vm585_vm0, %v582_v0, 0.0  ;;  %3507 = vrcp.f32 %v3930_v2  ;;  %v650_v22 = vld [vmem:[%s4441_s3 + $0x18] sm:$0xff]  ;;  %v649_v25 = vld [vmem:[%s4441_s3 + $0x10] sm:$0xff]  ;;  %v648_v28 = vld [vmem:[%s4441_s3 + $0x8] sm:$0xff]  ;;  %vm1235_vm9 = vcmask 64512   ;;  %s3932_s17 = smov 120  }
  0x53   : > { %587 = vadd.xlane.f32.xlu0 %v586_v1  ;;  %3509 = vrcp.f32 %v3931_v14  ;;  %v685_v24 = vand.u32 4294901760, %v650_v22  ;;  %v4175_v27 = vand.u32 4294901760, %v649_v25  ;;  %v4180_v29 = vand.u32 4294901760, %v648_v28  ;;  %v647_v32 = vld [vmem:[%s4441_s3] sm:$0xff]  ;;  %v655_v47 = vld [vmem:[#allocation9 + $0x18] sm:$0xff]  ;;  %v652_v62 = vld [vmem:[#allocation9] sm:$0xff] }
  0x54   : > { %v4188_v34 = vand.u32 4294901760, %v647_v32  ;;  %v4197_v50 = vand.u32 4294901760, %v655_v47  ;;  %v654_v52 = vld [vmem:[#allocation9 + $0x10] sm:$0xff]  ;;  %v653_v57 = vld [vmem:[#allocation9 + $0x8] sm:$0xff]  ;;  %v4217_v1 = vand.u32 4294901760, %v652_v62  ;;  %s3933_s19 = smov 112  }
  0x55   : > { %786 = vmatpush.msra.mxu3 %v685_v24  ;;  %686 = vmatpush.msra.mxu0 %v685_v24  ;;  %v715_v26 = vsub.f32 %v650_v22, %v685_v24  ;;  %v721_v31 = vsub.f32 %v649_v25, %v4175_v27  ;;  %v727_v33 = vsub.f32 %v648_v28, %v4180_v29  ;;  %v4200_v54 = vand.u32 4294901760, %v654_v52  ;;  %s3934_s26 = smov 104   ;;  %p578_p1 = scmp.lt.s32.totalorder %s4024_s28, 1 }
  0x56   : > { %v733_v39 = vsub.f32 %v647_v32, %v4188_v34  ;;  %v4203_v55 = vsub.f32 %v655_v47, %v4197_v50  ;;  %v4207_v59 = vand.u32 4294901760, %v653_v57  ;;  %v3502_v32 = vld [vmem:[#allocation6] ss:$0 sm:$0xff] }
  0x57   : > { %v716_v30 = vand.u32 4294901760, %v715_v26  ;;  %757 = vmatpush.msra.mxu2 %v715_v26  ;;  %788 = vmatpush.msra.mxu3 %v4175_v27  ;;  %v722_v36 = vand.u32 4294901760, %v721_v31  ;;  %v728_v38 = vand.u32 4294901760, %v727_v33  ;;  %v4210_v60 = vsub.f32 %v654_v52, %v4200_v54  ;;  %s4466_s28 = smov (!%p578_p1, %s4024_s28), 1 }
  0x58   : > { %v3508_v3 = vpop.eup %3507  ;;  %688 = vmatpush.msra.mxu0 %v4175_v27  ;;  %v734_v44 = vand.u32 4294901760, %v733_v39  ;;  %v904_v58 = vand.u32 4294901760, %v4203_v55  ;;  %v4220_v2 = vsub.f32 %v653_v57, %v4207_v59  ;;  %s3351_s15 = sshll.u32 %s4466_s28, 3 }
  0x59   : > { %v590_v4 = vmul.f32 32.0, %v3508_v3  ;;  %vm594_vm1 = vweird.f32 %v3508_v3  ;;  %v3510_v15 = vpop.eup %3509  ;;  %v717_v35 = vsub.f32 %v715_v26, %v716_v30  ;;  %760 = vmatpush.msra.mxu2 %v721_v31  ;;  %790 = vmatpush.msra.mxu3 %v4180_v29  ;;  %v723_v42 = vsub.f32 %v721_v31, %v722_v36  ;;  %v660_v26 = vld [vmem:[#allocation12 + $0x18] sm:$0xff]  ;;  %s581_s29 = scalar_lea.vmem %s4450_s12, %s3351_s15 }
  0x5a   : > { %v603_v16 = vmul.f32 31.0, %v3510_v15  ;;  %vm607_vm2 = vweird.f32 %v3510_v15  ;;  %690 = vmatpush.msra.mxu0 %v4180_v29  ;;  %v729_v43 = vsub.f32 %v727_v33, %v728_v38  ;;  %v735_v49 = vsub.f32 %v733_v39, %v734_v44 }
  0x5b   : > { %v591_v5 = vsub.f32 1.0, %v590_v4  ;;  %v718_v41 = vand.u32 4294901760, %v717_v35  ;;  %763 = vmatpush.msra.mxu2 %v727_v33  ;;  %792 = vmatpush.msra.mxu3 %v4188_v34  ;;  %v724_v46 = vand.u32 4294901760, %v723_v42  ;;  %v905_v63 = vsub.f32 %v4203_v55, %v904_v58  ;;  %v658_v35 = vld [vmem:[#allocation12 + $0x8] sm:$0xff] }
  0x5c   : > { %v604_v17 = vsub.f32 1.0, %v603_v16  ;;  %692 = vmatpush.msra.mxu0 %v4188_v34  ;;  %v730_v48 = vand.u32 4294901760, %v729_v43  ;;  %v736_v53 = vand.u32 4294901760, %v735_v49 }
  0x5d   : > { %v592_v6 = vmul.f32 %v3508_v3, %v591_v5  ;;  %719 = vmatpush.msra.mxu1 %v718_v41  ;;  %766 = vmatpush.msra.mxu2 %v733_v39  ;;  %v906_v5 = vand.u32 4294901760, %v905_v63  ;;  %v657_v41 = vld [vmem:[#allocation12] sm:$0xff] }
  0x5e   : > { %v605_v18 = vmul.f32 %v3510_v15, %v604_v17  ;;  %815 = vmatpush.msrb.mxu0 %v716_v30  ;;  %v659_v30 = vld [vmem:[#allocation12 + $0x10] sm:$0xff] }
  0x5f   : > { %v593_v7 = vadd.f32 %v3508_v3, %v592_v6  ;;  %725 = vmatpush.msra.mxu1 %v724_v46  ;;  %874 = vmatpush.msrb.mxu2 %v4197_v50 }
  0x60   : > { %v606_v19 = vadd.f32 %v3510_v15, %v605_v18  ;;  %819 = vmatpush.msrb.mxu0 %v722_v36  ;;  %907 = vmatpush.msrb.mxu3 %v906_v5 }
  0x61   : > { %v595_v8 = vsel %vm594_vm1, %v3508_v3, %v593_v7  ;;  %731 = vmatpush.msra.mxu1 %v730_v48  ;;  %876 = vmatpush.msrb.mxu2 %v4200_v54  ;;  %v916_v7 = vand.u32 4294901760, %v4220_v2 }
  0x62   : > { %v608_v20 = vsel %vm607_vm2, %v3510_v15, %v606_v19  ;;  %823 = vmatpush.msrb.mxu0 %v728_v38 }
  0x63   : > { %737 = vmatpush.msra.mxu1 %v736_v53  ;;  %878 = vmatpush.msrb.mxu2 %v4207_v59 }
  0x64   : > { %827 = vmatpush.msrb.mxu0 %v734_v44 }
  0x65   : > { %846 = vmatpush.msrb.mxu1 %v685_v24  ;;  %880 = vmatpush.msrb.mxu2 %v4217_v1 }
  0x67   : > { %848 = vmatpush.msrb.mxu1 %v4175_v27 }
  0x69   : > { %850 = vmatpush.msrb.mxu1 %v4180_v29  ;;  %v4245_v29 = vand.u32 4294901760, %v660_v26 }
  0x6b   : > { %852 = vmatpush.msrb.mxu1 %v4188_v34  ;;  %v4251_v38 = vsub.f32 %v660_v26, %v4245_v29 }
  0x6d   : > { %v1092_v44 = vand.u32 4294901760, %v4251_v38 }
  0xc6   : > { %v588_v9 = vpop.xlane.xlu0 %587 }
  0xc7   : > { %v596_v10 = vmul.f32 %v595_v8, %v588_v9  ;;  %v4232_v8 = vsub.f32 %v652_v62, %v4217_v1 }
  0xc9   : > { %v4161_v11 = vsub.f32 %v582_v0, %v596_v10  ;;  %v910_v0 = vand.u32 4294901760, %v4210_v60  ;;  %v922_v14 = vand.u32 4294901760, %v4232_v8 }
  0xcb   : > { %v598_v12 = vmul.f32 %v4161_v11, %v4161_v11  ;;  %v911_v6 = vsub.f32 %v4210_v60, %v910_v0  ;;  %v923_v17 = vsub.f32 %v4232_v8, %v922_v14 }
  0xcd   : > { %v599_v13 = vsel %vm585_vm0, %v598_v12, 0.0  ;;  %v912_v12 = vand.u32 4294901760, %v911_v6  ;;  %v924_v18 = vand.u32 4294901760, %v923_v17 }
  0xce   : > { %600 = vadd.xlane.f32.xlu0 %v599_v13  ;;  %v917_v13 = vsub.f32 %v4220_v2, %v916_v7 }
  0xcf   : > { %913 = vmatpush.msrb.mxu3 %v912_v12 }
  0xd0   : > { %v918_v16 = vand.u32 4294901760, %v917_v13 }
  0xd2   : > { %919 = vmatpush.msrb.mxu3 %v918_v16 }
  0xd4   : > { %925 = vmatpush.msrb.mxu3 %v924_v18 }
 0x141   : > { %v601_v21 = vpop.xlane.xlu0 %600 }
 0x142   : > { %v4169_v23 = vmul.f32 %v608_v20, %v601_v21 }
 0x144   : > { %3511 = vrsqrt.f32 %v4169_v23  ;;  %vm617_vm3 = vcmp.eq.f32.partialorder %v4169_v23, inf  ;;  %v620_v4 = vand.u32 2147483648, %v4169_v23  ;;  %vm619_vm4 = vcmp.eq.f32.partialorder %v4169_v23, 0.0 }
 0x14a   : > { %v3512_v37 = vpop.eup %3511 }
 0x14b   : > { %v611_v40 = vmul.f32 %v3512_v37, %v4169_v23 }
 0x14d   : > { %v612_v45 = vmul.f32 %v3512_v37, %v611_v40  ;;  %v4253_v40 = vand.u32 4294901760, %v658_v35 }
 0x14f   : > { %v613_v51 = vmul.f32 0.5, %v612_v45  ;;  %v4262_v45 = vand.u32 4294901760, %v657_v41  ;;  %v4265_v46 = vsub.f32 %v658_v35, %v4253_v40 }
 0x151   : > { %v614_v56 = vsub.f32 1.5, %v613_v51  ;;  %v1093_v51 = vsub.f32 %v4251_v38, %v1092_v44  ;;  %v4275_v52 = vsub.f32 %v657_v41, %v4262_v45  ;;  %v1104_v53 = vand.u32 4294901760, %v4265_v46 }
 0x153   : > { %v615_v61 = vmul.f32 %v3512_v37, %v614_v56  ;;  %v4248_v37 = vand.u32 4294901760, %v659_v30  ;;  %v1094_v62 = vand.u32 4294901760, %v1093_v51  ;;  %v1110_v63 = vand.u32 4294901760, %v4275_v52 }
 0x155   : > { %v616_v3 = vmul.f32 %v615_v61, %v4169_v23  ;;  %v4257_v43 = vsub.f32 %v659_v30, %v4248_v37 }
 0x157   : > { %v618_v9 = vsel %vm617_vm3, %v4169_v23, %v616_v3  ;;  %v3501_v23 = vld [vmem:[#allocation4] ss:$0 sm:$0xff]  ;;  %v1098_v48 = vand.u32 4294901760, %v4257_v43 }
 0x158   : > { %v621_v10 = vsel %vm619_vm4, %v620_v4, %v618_v9  ;;  %v640_v31 = vmul.f32 %v3501_v23, %v4161_v11  ;;  %v3504_v9 = vld [vmem:[#allocation10] ss:$0 sm:$0xff] }
 0x159   : > { %v622_v15 = vadd.f32 1e-06, %v621_v10  ;;  %v1099_v57 = vsub.f32 %v4257_v43, %v1098_v48 }
 0x15b   : > { %3513 = vrcp.f32 %v622_v15  ;;  %v634_v22 = vand.u32 2147483648, %v622_v15  ;;  %v632_v25 = vand.u32 2147483647, %v622_v15  ;;  %vm628_vm6 = vweird.f32 %v622_v15 }
 0x15d   : > { %v635_v28 = vor.u32 1.1754944e-38, %v634_v22  ;;  %vm633_vm8 = vcmp.eq.f32.partialorder %v632_v25, 8.507059e+37 }
 0x161   : > { %v3514_v19 = vpop.eup %3513 }
 0x162   : > { %v624_v20 = vmul.f32 %v3514_v19, %v622_v15  ;;  %vm629_vm5 = vweird.f32 %v3514_v19 }
 0x163   : > { %vm630_vm7 = vmor %vm628_vm6, %vm629_vm5 }
 0x164   : > { %v625_v21 = vsub.f32 1.0, %v624_v20 }
 0x166   : > { %v626_v24 = vmul.f32 %v3514_v19, %v625_v21 }
 0x168   : > { %v627_v27 = vadd.f32 %v3514_v19, %v626_v24 }
 0x16a   : > { %v631_v33 = vsel %vm630_vm7, %v3514_v19, %v627_v27 }
 0x16b   : > { %v636_v34 = vsel %vm633_vm8, %v635_v28, %v631_v33  ;;  %v3505_v28 = vld [vmem:[#allocation13] ss:$0 sm:$0xff] }
 0x16c   : > { %v641_v36 = vmul.f32 %v640_v31, %v636_v34 }
 0x16e   : > { %v645_v39 = vadd.f32 %v3502_v32, %v641_v36 }
 0x170   : > { %v671_v42 = vsel %vm585_vm0, %v645_v39, 0 }
 0x171   : > { %v4259_v11 = vand.u32 4294901760, %v671_v42 }
 0x173   : > { %739 = vmatmul.f32.vlgmr.msra.gmra.mxu1 %v4259_v11  ;;  %v694_v47 = vsub.f32 %v671_v42, %v4259_v11 }
 0x174   : > { %974 = vmatpush.msra.mxu1 %v4197_v50 }
 0x175   : > { %769 = vmatmul.f32.vlgmr.msra.gmra.mxu2 %v694_v47  ;;  %v695_v49 = vand.u32 4294901760, %v694_v47 }
 0x176   : > { %976 = vmatpush.msra.mxu1 %v4200_v54  ;;  %1003 = vmatpush.msra.mxu2 %v904_v58  ;;  %v1105_v58 = vsub.f32 %v4265_v46, %v1104_v53 }
 0x177   : > { %796 = vmatmul.f32.vlgmr.msra.gmra.mxu3 %v695_v49  ;;  %v696_v56 = vsub.f32 %v694_v47, %v695_v49 }
 0x178   : > { %978 = vmatpush.msra.mxu1 %v4207_v59  ;;  %1007 = vmatpush.msra.mxu2 %v910_v0  ;;  %v1100_v0 = vand.u32 4294901760, %v1099_v57  ;;  %v1106_v3 = vand.u32 4294901760, %v1105_v58 }
 0x179   : > { %v697_v61 = vand.u32 4294901760, %v696_v56  ;;  %1034 = vmatpush.msra.mxu3 %v4197_v50  ;;  %v1111_v50 = vsub.f32 %v4275_v52, %v1110_v63 }
 0x17a   : > { %980 = vmatpush.msra.mxu1 %v4217_v1  ;;  %1011 = vmatpush.msra.mxu2 %v916_v7 }
 0x17b   : > { %698 = vmatmul.f32.vlgmr.msra.gmra.mxu0 %v697_v61  ;;  %854 = vmatmul.f32.vlgmr.msrb.gmra.mxu1 %v4259_v11 }
 0x17c   : > { %1036 = vmatpush.msra.mxu3 %v4200_v54  ;;  %945 = vmatpush.msra.mxu0 %v4203_v55  ;;  %v1112_v54 = vand.u32 4294901760, %v1111_v50 }
 0x17d   : > { %886 = vmatmul.f32.vlgmr.msrb.gmra.mxu2 %v697_v61  ;;  %1095 = vmatpush.msrb.mxu1 %v1094_v62 }
 0x17e   : > { %1015 = vmatpush.msra.mxu2 %v922_v14  ;;  %1038 = vmatpush.msra.mxu3 %v4207_v59  ;;  %v3503_v59 = vld [vmem:[#allocation7] ss:$0 sm:$0xff] }
 0x17f   : > { %927 = vmatmul.f32.vlgmr.msrb.gmra.mxu3 %v4259_v11  ;;  %948 = vmatpush.msra.mxu0 %v4210_v60 }
 0x180   : > { %1040 = vmatpush.msra.mxu3 %v4217_v1  ;;  %1101 = vmatpush.msrb.mxu1 %v1100_v0 }
 0x181   : > { %1133 = vmatpush.msrb.mxu2 %v4251_v38  ;;  %951 = vmatpush.msra.mxu0 %v4220_v2 }
 0x182   : > { %1107 = vmatpush.msrb.mxu1 %v1106_v3  ;;  %1162 = vmatpush.msrb.mxu3 %v4245_v29 }
 0x183   : > { %829 = vmatmul.f32.vlgmr.msrb.gmra.mxu0 %v4259_v11  ;;  %984 = vmatmul.f32.vlgmr.msra.gmra.mxu1 %v695_v49 }
 0x184   : > { %1136 = vmatpush.msrb.mxu2 %v4257_v43  ;;  %954 = vmatpush.msra.mxu0 %v4232_v8 }
 0x185   : > { %1017 = vmatmul.f32.vlgmr.msra.gmra.mxu2 %v4259_v11  ;;  %1113 = vmatpush.msrb.mxu1 %v1112_v54 }
 0x186   : > { %1139 = vmatpush.msrb.mxu2 %v4265_v46  ;;  %1164 = vmatpush.msrb.mxu3 %v4248_v37 }
 0x187   : > { %1042 = vmatmul.f32.vlgmr.msra.gmra.mxu3 %v4259_v11  ;;  %1062 = vmatpush.msrb.mxu0 %v4245_v29 }
 0x188   : > { %1142 = vmatpush.msrb.mxu2 %v4275_v52  ;;  %1166 = vmatpush.msrb.mxu3 %v4253_v40 }
 0x189   : > { %1222 = vmatpush.msra.mxu1 %v4245_v29  ;;  %1064 = vmatpush.msrb.mxu0 %v4248_v37 }
 0x18a   : > { %1168 = vmatpush.msrb.mxu3 %v4262_v45 }
 0x18b   : > { %957 = vmatmul.f32.vlgmr.msra.gmra.mxu0 %v694_v47  ;;  %1115 = vmatmul.f32.vlgmr.msrb.gmra.mxu1 %v4259_v11 }
 0x18c   : > { %1224 = vmatpush.msra.mxu1 %v4248_v37  ;;  %1066 = vmatpush.msrb.mxu0 %v4253_v40 }
 0x18d   : > { %1145 = vmatmul.f32.vlgmr.msrb.gmra.mxu2 %v694_v47 }
 0x18e   : > { %1226 = vmatpush.msra.mxu1 %v4253_v40  ;;  %1068 = vmatpush.msrb.mxu0 %v4262_v45 }
 0x18f   : > { %1172 = vmatmul.f32.vlgmr.msrb.gmra.mxu3 %v695_v49 }
 0x190   : > { %1191 = vmatpush.msra.mxu0 %v1092_v44  ;;  %1228 = vmatpush.msra.mxu1 %v4262_v45 }
 0x192   : > { %1195 = vmatpush.msra.mxu0 %v1098_v48 }
 0x193   : > { %1074 = vmatmul.f32.vlgmr.msrb.gmra.mxu0 %v697_v61  ;;  %1230 = vmatmul.f32.vlgmr.msra.gmra.mxu1 %v4259_v11 }
 0x194   : > { %1199 = vmatpush.msra.mxu0 %v1104_v53 }
 0x196   : > { %1203 = vmatpush.msra.mxu0 %v1110_v63 }
 0x19b   : > { %1205 = vmatmul.f32.vlgmr.msra.gmra.mxu0 %v4259_v11 }
 0x1f0   : > { %v740_v55 = vpop.f32.mrf.mxu1 }
 0x1f8   : > { %v699_v60 = vpop.f32.mrf.mxu0  ;;  %v770_v1 = vpop.f32.mrf.mxu2 }
 0x1f9   : > { %v700_v2 = vadd.f32 %v3503_v59, %v699_v60  ;;  %v855_v6 = vpop.f32.mrf.mxu1 }
 0x1fa   : > { %v797_v4 = vpop.f32.mrf.mxu3 }
 0x1fb   : > { %v741_v5 = vadd.f32 %v740_v55, %v700_v2 }
 0x1fd   : > { %v771_v7 = vadd.f32 %v770_v1, %v741_v5 }
 0x1ff   : > { %v798_v8 = vadd.f32 %v797_v4, %v771_v7  ;;  %v4358_v7 = vld [vmem:[#allocation18] sm:$0xff] }
 0x200   : > { %v830_v10 = vpop.f32.mrf.mxu0  ;;  %v887_v12 = vpop.f32.mrf.mxu2  ;;  %vm1234_vm10 = vcmp.eq.f32.partialorder %v4358_v7, 0.0 }
 0x201   : > { %v831_v13 = vadd.f32 %v830_v10, %v798_v8  ;;  %v888_v16 = vadd.f32 %v3504_v9, %v887_v12  ;;  %v985_v19 = vpop.f32.mrf.mxu1 }
 0x202   : > { %v928_v14 = vpop.f32.mrf.mxu3 }
 0x203   : > { %v4331_v15 = vadd.f32 %v855_v6, %v831_v13  ;;  %v929_v20 = vadd.f32 %v928_v14, %v888_v16 }
 0x205   : > { %v1237_v17 = vsel %vm1235_vm9, %v4331_v15, 0 }
 0x206   : > { %v1259_v18 = vand.u32 4294901760, %v1237_v17 }
 0x208   : > { %v958_v21 = vpop.f32.mrf.mxu0  ;;  %v1260_v22 = vsub.f32 %v1237_v17, %v1259_v18  ;;  %v1018_v24 = vpop.f32.mrf.mxu2 }
 0x209   : > { %v959_v23 = vadd.f32 %v958_v21, %v929_v20  ;;  %v1116_v31 = vpop.f32.mrf.mxu1 }
 0x20a   : > { %v1043_v26 = vpop.f32.mrf.mxu3  ;;  %v1261_v29 = vand.u32 4294901760, %v1260_v22 }
 0x20b   : > { %v986_v25 = vadd.f32 %v985_v19, %v959_v23 }
 0x20c   : > { %v1262_v35 = vsub.f32 %v1260_v22, %v1261_v29 }
 0x20d   : > { %v1019_v27 = vadd.f32 %v1018_v24, %v986_v25 }
 0x20e   : > { %v1263_v41 = vand.u32 4294901760, %v1262_v35 }
 0x20f   : > { %v4335_v30 = vadd.f32 %v1043_v26, %v1019_v27 }
 0x210   : > { %v1075_v32 = vpop.f32.mrf.mxu0  ;;  %v1146_v38 = vpop.f32.mrf.mxu2 }
 0x211   : > { %v1076_v33 = vadd.f32 %v3505_v28, %v1075_v32  ;;  %1565 = vrot.lane.b32.xlu2 %v4335_v30, %s3932_s17  ;;  %v1240_v34 = vsel %vm1235_vm9, %v4335_v30, 0  ;;  %v1231_v47 = vpop.f32.mrf.mxu1 }
 0x212   : > { %v1257_v36 = vand.u32 4294901760, %v1240_v34  ;;  %v1173_v42 = vpop.f32.mrf.mxu3 }
 0x213   : > { %v1117_v37 = vadd.f32 %v1116_v31, %v1076_v33 }
 0x214   : > { %1258 = vmatpush.xpose.msra.mxu2 %v1257_v36  ;;  %1334 = vmatpush.xpose.msrb.mxu1 %v1257_v36  ;;  %v1284_v39 = vsub.f32 %v1240_v34, %v1257_v36 }
 0x215   : > { %v1147_v40 = vadd.f32 %v1146_v38, %v1117_v37 }
 0x216   : > { %1311 = vmatpush.xpose.msrb.mxu0 %v1284_v39  ;;  %v1285_v43 = vand.u32 4294901760, %v1284_v39 }
 0x217   : > { %v1174_v11 = vadd.f32 %v1173_v42, %v1147_v40  ;;  %1264 = vmatmul.f32.vlgmr.msra.gmra.mxu2 %v1263_v41  ;;  %1338 = vmatmul.f32.vlgmr.msrb.gmra.mxu1 %v1261_v29 }
 0x218   : > { %v1206_v44 = vpop.f32.mrf.mxu0  ;;  %1360 = vmatpush.xpose.msrb.mxu2 %v1285_v43  ;;  %v1286_v45 = vsub.f32 %v1284_v39, %v1285_v43 }
 0x219   : > { %v1207_v46 = vadd.f32 %v1206_v44, %v1174_v11  ;;  %1563 = vrot.lane.b32.xlu2 %v4331_v15, %s3932_s17  ;;  %1314 = vmatmul.f32.vlgmr.msrb.gmra.mxu0 %v1260_v22 }
 0x21a   : > { %v1287_v48 = vand.u32 4294901760, %v1286_v45 }
 0x21b   : > { %v4343_v49 = vadd.f32 %v1231_v47, %v1207_v46 }
 0x21c   : > { %1288 = vmatpush.xpose.msra.mxu3 %v1287_v48 }
 0x21d   : > { %v1432_v51 = vand.u32 4294901760, %v4343_v49 }
 0x21f   : > { %1290 = vmatmul.f32.vlgmr.msra.gmra.mxu3 %v1259_v18  ;;  %1362 = vmatmul.f32.vlgmr.msrb.gmra.mxu2 %v1259_v18  ;;  %v1459_v52 = vsub.f32 %v4343_v49, %v1432_v51 }
 0x220   : > { %1382 = vmatpush.xpose.msrb.mxu3 %v1257_v36  ;;  %1433 = vmatpush.msra.mxu0 %v1432_v51 }
 0x221   : > { %1744 = vrot.lane.b32.xlu2 %v4343_v49, %s3932_s17  ;;  %1486 = vmatpush.msra.mxu2 %v1459_v52  ;;  %v1460_v53 = vand.u32 4294901760, %v1459_v52 }
 0x223   : > { %1535 = vmatpush.msrb.mxu0 %v1460_v53  ;;  %v1461_v56 = vsub.f32 %v1459_v52, %v1460_v53 }
 0x224   : > { %1509 = vmatpush.msra.mxu3 %v1432_v51 }
 0x225   : > { %v1462_v57 = vand.u32 4294901760, %v1461_v56 }
 0x227   : > { %1384 = vmatmul.f32.vlgmr.msrb.gmra.mxu3 %v1259_v18  ;;  %1463 = vmatpush.msra.mxu1 %v1462_v57 }
 0x229   : > { %1557 = vmatpush.msrb.mxu1 %v1432_v51 }
 0x26b   : > { %v1566_v61 = vpop.permute.xlu2 %1565 }
 0x26c   : > { %v1569_v62 = vsel %vm1235_vm9, %v1566_v61, 0 }
 0x26d   : > { %v4350_v63 = vand.u32 4294901760, %v1569_v62 }
 0x26f   : > { %v4353_v58 = vsub.f32 %v1569_v62, %v4350_v63  ;;  %1587 = vmatpush.xpose.msrb.mxu2 %v4350_v63 }
 0x271   : > { %v1614_v0 = vand.u32 4294901760, %v4353_v58 }
 0x273   : > { %v1615_v50 = vsub.f32 %v4353_v58, %v1614_v0  ;;  %v1564_v21 = vpop.permute.xlu2 %1563 }
 0x274   : > { %v1567_v27 = vsel %vm1235_vm9, %v1564_v21, 0 }
 0x275   : > { %v1616_v3 = vand.u32 4294901760, %v1615_v50  ;;  %v1588_v33 = vand.u32 4294901760, %v1567_v27 }
 0x277   : > { %1617 = vmatpush.xpose.msrb.mxu3 %v1616_v3  ;;  %v1589_v39 = vsub.f32 %v1567_v27, %v1588_v33 }
 0x279   : > { %v1590_v43 = vand.u32 4294901760, %v1589_v39 }
 0x27b   : > { %v1745_v25 = vpop.permute.xlu2 %1744  ;;  %v1591_v46 = vsub.f32 %v1589_v39, %v1590_v43 }
 0x27c   : > { %v1765_v31 = vand.u32 4294901760, %v1745_v25 }
 0x27d   : > { %v1592_v52 = vand.u32 4294901760, %v1591_v46 }
 0x27e   : > { %v1792_v37 = vsub.f32 %v1745_v25, %v1765_v31 }
 0x280   : > { %v1793_v42 = vand.u32 4294901760, %v1792_v37 }
 0x282   : > { %v1794_v45 = vsub.f32 %v1792_v37, %v1793_v42 }
 0x284   : > { %v1795_v51 = vand.u32 4294901760, %v1794_v45 }
 0x294   : > { %v1339_v2 = vpop.f32.mrf.mxu1 }
 0x296   : > { %v1315_v60 = vpop.f32.mrf.mxu0 }
 0x29a   : > { %v1265_v54 = vpop.f32.mrf.mxu2 }
 0x2a2   : > { %v1291_v55 = vpop.f32.mrf.mxu3  ;;  %v1363_v5 = vpop.f32.mrf.mxu2 }
 0x2a3   : > { %v1292_v59 = vadd.f32 %v1291_v55, %v1265_v54 }
 0x2a5   : > { %v1316_v1 = vadd.f32 %v1315_v60, %v1292_v59 }
 0x2a7   : > { %v1340_v4 = vadd.f32 %v1339_v2, %v1316_v1 }
 0x2a9   : > { %v1364_v6 = vadd.f32 %v1363_v5, %v1340_v4 }
 0x2aa   : > { %v1385_v8 = vpop.f32.mrf.mxu3 }
 0x2ab   : > { %v1386_v9 = vadd.f32 %v1385_v8, %v1364_v6 }
 0x2ad   : > { %v1388_v10 = vmul.f32 0.35355338, %v1386_v9 }
 0x2af   : > { %v1389_v12 = vsel %vm1234_vm10, -1e+09, %v1388_v10 }
 0x2b0   : > { %v1390_v13 = vsel %vm1235_vm9, %v1389_v12, -inf }
 0x2b1   : > { %1391 = vmax.xlane.f32.xlu1 %v1390_v13 }
 0x324   : > { %v1392_v14 = vpop.xlane.xlu1 %1391 }
 0x325   : > { %v1393_v16 = vsub.f32 %v1389_v12, %v1392_v14 }
 0x327   : > { %v1394_v17 = vmul.f32 1.442695, %v1393_v16 }
 0x329   : > { %3515 = vpow2.f32 %v1394_v17 }
 0x32f   : > { %v3516_v18 = vpop.eup %3515 }
 0x330   : > { %v1396_v19 = vsel %vm1235_vm9, %v3516_v18, 0.0 }
 0x331   : > { %1397 = vadd.xlane.f32.xlu1 %v1396_v19 }
 0x3a4   : > { %v1398_v20 = vpop.xlane.xlu1 %1397 }
 0x3a5   : > { %3517 = vrcp.f32 %v1398_v20  ;;  %v1410_v26 = vand.u32 2147483648, %v1398_v20  ;;  %v1408_v29 = vand.u32 2147483647, %v1398_v20  ;;  %vm1404_vm12 = vweird.f32 %v1398_v20 }
 0x3a7   : > { %v1411_v34 = vor.u32 1.1754944e-38, %v1410_v26  ;;  %vm1409_vm14 = vcmp.eq.f32.partialorder %v1408_v29, 8.507059e+37 }
 0x3ab   : > { %v3518_v22 = vpop.eup %3517 }
 0x3ac   : > { %v1400_v23 = vmul.f32 %v3518_v22, %v1398_v20  ;;  %vm1405_vm11 = vweird.f32 %v3518_v22 }
 0x3ad   : > { %vm1406_vm13 = vmor %vm1404_vm12, %vm1405_vm11 }
 0x3ae   : > { %v1401_v24 = vsub.f32 1.0, %v1400_v23 }
 0x3b0   : > { %v1402_v28 = vmul.f32 %v3518_v22, %v1401_v24 }
 0x3b2   : > { %v1403_v32 = vadd.f32 %v3518_v22, %v1402_v28 }
 0x3b4   : > { %v1407_v35 = vsel %vm1406_vm13, %v3518_v22, %v1403_v32 }
 0x3b5   : > { %v1412_v36 = vsel %vm1409_vm14, %v1411_v34, %v1407_v35 }
 0x3b6   : > { %v1413_v38 = vmul.f32 %v3516_v18, %v1412_v36 }
 0x3b8   : > { %v1415_v40 = vsel %vm1235_vm9, %v1413_v38, 0  ;;  %v663_v38 = vld [vmem:[#allocation15 + $0x8] sm:$0xff] }
 0x3b9   : > { %v1434_v41 = vand.u32 4294901760, %v1415_v40 }
 0x3bb   : > { %1465 = vmatmul.f32.vlgmr.msra.gmra.mxu1 %v1434_v41  ;;  %v1435_v11 = vsub.f32 %v1415_v40, %v1434_v41 }
 0x3bc   : > { %1663 = vmatpush.xpose.msra.mxu1 %v4350_v63 }
 0x3bd   : > { %1489 = vmatmul.f32.vlgmr.msra.gmra.mxu2 %v1435_v11  ;;  %v1436_v44 = vand.u32 4294901760, %v1435_v11 }
 0x3be   : > { %1689 = vmatpush.xpose.msra.mxu2 %v1614_v0 }
 0x3bf   : > { %1513 = vmatmul.f32.vlgmr.msra.gmra.mxu3 %v1436_v44  ;;  %v1437_v47 = vsub.f32 %v1435_v11, %v1436_v44  ;;  %v662_v11 = vld [vmem:[#allocation15] sm:$0xff] }
 0x3c0   : > { %1711 = vmatpush.xpose.msra.mxu3 %v4350_v63  ;;  %v2063_v44 = vand.u32 4294901760, %v662_v11 }
 0x3c1   : > { %v1438_v48 = vand.u32 4294901760, %v1437_v47 }
 0x3c2   : > { %v2090_v45 = vsub.f32 %v662_v11, %v2063_v44 }
 0x3c3   : > { %1439 = vmatmul.f32.vlgmr.msra.gmra.mxu0 %v1438_v48  ;;  %1559 = vmatmul.f32.vlgmr.msrb.gmra.mxu1 %v1434_v41 }
 0x3c4   : > { %1640 = vmatpush.xpose.msra.mxu0 %v4353_v58  ;;  %1796 = vmatpush.msrb.mxu1 %v1795_v51  ;;  %v2091_v46 = vand.u32 4294901760, %v2090_v45 }
 0x3c5   : > { %1593 = vmatmul.f32.vlgmr.msrb.gmra.mxu2 %v1592_v52 }
 0x3c6   : > { %1819 = vmatpush.msrb.mxu2 %v1792_v37  ;;  %v2092_v47 = vsub.f32 %v2090_v45, %v2091_v46 }
 0x3c7   : > { %1619 = vmatmul.f32.vlgmr.msrb.gmra.mxu3 %v1588_v33 }
 0x3c8   : > { %1842 = vmatpush.msrb.mxu3 %v1765_v31  ;;  %v2093_v48 = vand.u32 4294901760, %v2092_v47 }
 0x3cb   : > { %1537 = vmatmul.f32.vlgmr.msrb.gmra.mxu0 %v1434_v41  ;;  %1667 = vmatmul.f32.vlgmr.msra.gmra.mxu1 %v1590_v43 }
 0x3cc   : > { %1766 = vmatpush.msrb.mxu0 %v1765_v31  ;;  %1890 = vmatpush.msra.mxu1 %v1765_v31 }
 0x3cd   : > { %1691 = vmatmul.f32.vlgmr.msra.gmra.mxu2 %v1588_v33 }
 0x3cf   : > { %1713 = vmatmul.f32.vlgmr.msra.gmra.mxu3 %v1588_v33 }
 0x3d3   : > { %1643 = vmatmul.f32.vlgmr.msra.gmra.mxu0 %v1589_v39  ;;  %v1914_v39 = vand.u32 4294901760, %v663_v38 }
 0x3d4   : > { %1868 = vmatpush.msra.mxu0 %v1793_v42 }
 0x3d5   : > { %v1941_v40 = vsub.f32 %v663_v38, %v1914_v39  ;;  %1915 = vmatpush.msra.mxu2 %v1914_v39 }
 0x3d7   : > { %v1942_v41 = vand.u32 4294901760, %v1941_v40 }
 0x3d9   : > { %v1943_v42 = vsub.f32 %v1941_v40, %v1942_v41 }
 0x3db   : > { %v1944_v43 = vand.u32 4294901760, %v1943_v42 }
 0x3dd   : > { %1945 = vmatpush.msra.mxu3 %v1944_v43 }
 0x438   : > { %v1466_v53 = vpop.f32.mrf.mxu1 }
 0x440   : > { %v1440_v56 = vpop.f32.mrf.mxu0  ;;  %v1490_v57 = vpop.f32.mrf.mxu2 }
 0x441   : > { %v1467_v61 = vadd.f32 %v1466_v53, %v1440_v56  ;;  %v1560_v0 = vpop.f32.mrf.mxu1 }
 0x442   : > { %v1514_v62 = vpop.f32.mrf.mxu3 }
 0x443   : > { %v1491_v63 = vadd.f32 %v1490_v57, %v1467_v61 }
 0x445   : > { %v1515_v58 = vadd.f32 %v1514_v62, %v1491_v63 }
 0x448   : > { %v1538_v50 = vpop.f32.mrf.mxu0  ;;  %v1594_v54 = vpop.f32.mrf.mxu2 }
 0x449   : > { %v1539_v3 = vadd.f32 %v1538_v50, %v1515_v58  ;;  %v1668_v4 = vpop.f32.mrf.mxu1 }
 0x44a   : > { %v1620_v59 = vpop.f32.mrf.mxu3 }
 0x44b   : > { %v4370_v55 = vadd.f32 %v1560_v0, %v1539_v3  ;;  %v1621_v60 = vadd.f32 %v1620_v59, %v1594_v54 }
 0x44d   : > { %v2046_v63 = vsel %vm1235_vm9, %v4370_v55, 0 }
 0x44e   : > { %v2065_v54 = vand.u32 4294901760, %v2046_v63 }
 0x450   : > { %v1644_v1 = vpop.f32.mrf.mxu0  ;;  %v1692_v6 = vpop.f32.mrf.mxu2 }
 0x451   : > { %v1645_v2 = vadd.f32 %v1644_v1, %v1621_v60 }
 0x452   : > { %v1714_v9 = vpop.f32.mrf.mxu3 }
 0x453   : > { %v1669_v5 = vadd.f32 %v1668_v4, %v1645_v2 }
 0x455   : > { %v1693_v8 = vadd.f32 %v1692_v6, %v1669_v5  ;;  %v2066_v5 = vsub.f32 %v2046_v63, %v2065_v54 }
 0x457   : > { %v1715_v10 = vadd.f32 %v1714_v9, %v1693_v8 }
 0x459   : > { %v1717_v12 = vmul.f32 0.35355338, %v1715_v10 }
 0x45b   : > { %v1718_v13 = vsel %vm1234_vm10, -1e+09, %v1717_v12 }
 0x45c   : > { %v1719_v14 = vsel %vm1235_vm9, %v1718_v13, -inf }
 0x45d   : > { %1720 = vmax.xlane.f32.xlu0 %v1719_v14 }
 0x471   : > { %2196 = vrot.lane.b32.xlu0 %v4335_v30, %s3933_s19 }
 0x4d0   : > { %v1721_v16 = vpop.xlane.xlu0 %1720 }
 0x4d1   : > { %v1722_v17 = vsub.f32 %v1718_v13, %v1721_v16  ;;  %v2067_v13 = vand.u32 4294901760, %v2066_v5 }
 0x4d3   : > { %v1723_v18 = vmul.f32 1.442695, %v1722_v17 }
 0x4d5   : > { %3519 = vpow2.f32 %v1723_v18  ;;  %v2068_v18 = vsub.f32 %v2066_v5, %v2067_v13 }
 0x4db   : > { %v3520_v19 = vpop.eup %3519 }
 0x4dc   : > { %v1725_v20 = vsel %vm1235_vm9, %v3520_v19, 0.0 }
 0x4dd   : > { %1726 = vadd.xlane.f32.xlu1 %v1725_v20 }
 0x4e3   : > { %v2197_v53 = vpop.permute.xlu0 %2196 }
 0x4e4   : > { %v2200_v62 = vsel %vm1235_vm9, %v2197_v53, 0 }
 0x4e5   : > { %v2217_v50 = vand.u32 4294901760, %v2200_v62 }
 0x4e7   : > { %v2244_v2 = vsub.f32 %v2200_v62, %v2217_v50 }
 0x4e9   : > { %v2245_v9 = vand.u32 4294901760, %v2244_v2 }
 0x4eb   : > { %v2246_v14 = vsub.f32 %v2244_v2, %v2245_v9 }
 0x4ed   : > { %v2247_v20 = vand.u32 4294901760, %v2246_v14 }
 0x4f6   : > { %2194 = vrot.lane.b32.xlu1 %v4331_v15, %s3933_s19 }
 0x4fe   : > { %2374 = vrot.lane.b32.xlu1 %v4343_v49, %s3933_s19 }
 0x506   : > { %2678 = vrot.lane.b32.xlu1 %v4335_v30, %s3934_s26 }
 0x50e   : > { %2676 = vrot.lane.b32.xlu1 %v4331_v15, %s3934_s26 }
 0x550   : > { %v1727_v21 = vpop.xlane.xlu1 %1726 }
 0x551   : > { %3521 = vrcp.f32 %v1727_v21  ;;  %v1739_v25 = vand.u32 2147483648, %v1727_v21  ;;  %v1737_v27 = vand.u32 2147483647, %v1727_v21  ;;  %vm1733_vm1 = vweird.f32 %v1727_v21 }
 0x553   : > { %v1740_v29 = vor.u32 1.1754944e-38, %v1739_v25  ;;  %vm1738_vm3 = vcmp.eq.f32.partialorder %v1737_v27, 8.507059e+37 }
 0x557   : > { %v3522_v22 = vpop.eup %3521 }
 0x558   : > { %v1729_v23 = vmul.f32 %v3522_v22, %v1727_v21  ;;  %vm1734_vm15 = vweird.f32 %v3522_v22 }
 0x559   : > { %vm1735_vm2 = vmor %vm1733_vm1, %vm1734_vm15 }
 0x55a   : > { %v1730_v24 = vsub.f32 1.0, %v1729_v23 }
 0x55c   : > { %v1731_v26 = vmul.f32 %v3522_v22, %v1730_v24 }
 0x55e   : > { %v1732_v28 = vadd.f32 %v3522_v22, %v1731_v26 }
 0x560   : > { %v1736_v31 = vsel %vm1735_vm2, %v3522_v22, %v1732_v28  ;;  %v2069_v22 = vand.u32 4294901760, %v2068_v18 }
 0x561   : > { %v1741_v32 = vsel %vm1738_vm3, %v1740_v29, %v1736_v31 }
 0x562   : > { %v1742_v30 = vmul.f32 %v3520_v19, %v1741_v32 }
 0x564   : > { %v1748_v33 = vsel %vm1235_vm9, %v1742_v30, 0 }
 0x565   : > { %v1767_v15 = vand.u32 4294901760, %v1748_v33 }
 0x567   : > { %1798 = vmatmul.f32.vlgmr.msrb.gmra.mxu1 %v1767_v15  ;;  %v1768_v34 = vsub.f32 %v1748_v33, %v1767_v15 }
 0x568   : > { %1991 = vmatpush.msrb.mxu1 %v1914_v39  ;;  %v2195_v58 = vpop.permute.xlu1 %2194 }
 0x569   : > { %1822 = vmatmul.f32.vlgmr.msrb.gmra.mxu2 %v1768_v34  ;;  %v1769_v35 = vand.u32 4294901760, %v1768_v34  ;;  %v2198_v23 = vsel %vm1235_vm9, %v2195_v58, 0 }
 0x56a   : > { %2017 = vmatpush.msrb.mxu2 %v1942_v41  ;;  %v2219_v25 = vand.u32 4294901760, %v2198_v23 }
 0x56b   : > { %1846 = vmatmul.f32.vlgmr.msrb.gmra.mxu3 %v1769_v35  ;;  %v1770_v36 = vsub.f32 %v1768_v34, %v1769_v35 }
 0x56c   : > { %2039 = vmatpush.msrb.mxu3 %v1914_v39  ;;  %v2220_v27 = vsub.f32 %v2198_v23, %v2219_v25 }
 0x56d   : > { %v1771_v37 = vand.u32 4294901760, %v1770_v36 }
 0x56e   : > { %v2221_v29 = vand.u32 4294901760, %v2220_v27 }
 0x56f   : > { %1772 = vmatmul.f32.vlgmr.msrb.gmra.mxu0 %v1771_v37  ;;  %1892 = vmatmul.f32.vlgmr.msra.gmra.mxu1 %v1767_v15 }
 0x570   : > { %1968 = vmatpush.msrb.mxu0 %v1941_v40  ;;  %2094 = vmatpush.msra.mxu1 %v2093_v48  ;;  %v2375_v10 = vpop.permute.xlu1 %2374  ;;  %v2222_v31 = vsub.f32 %v2220_v27, %v2221_v29 }
 0x571   : > { %v2395_v16 = vand.u32 4294901760, %v2375_v10 }
 0x572   : > { %v2223_v32 = vand.u32 4294901760, %v2222_v31 }
 0x573   : > { %v2422_v21 = vsub.f32 %v2375_v10, %v2395_v16 }
 0x575   : > { %v2423_v24 = vand.u32 4294901760, %v2422_v21 }
 0x577   : > { %1870 = vmatmul.f32.vlgmr.msra.gmra.mxu0 %v1767_v15  ;;  %v2424_v26 = vsub.f32 %v2422_v21, %v2423_v24 }
 0x578   : > { %2064 = vmatpush.msra.mxu0 %v2063_v44 }
 0x579   : > { %v2425_v28 = vand.u32 4294901760, %v2424_v26 }
 0x5e4   : > { %v1799_v51 = vpop.f32.mrf.mxu1 }
 0x5ec   : > { %v1773_v52 = vpop.f32.mrf.mxu0  ;;  %v1823_v57 = vpop.f32.mrf.mxu2 }
 0x5ed   : > { %v1800_v56 = vadd.f32 %v1799_v51, %v1773_v52  ;;  %v1893_v1 = vpop.f32.mrf.mxu1 }
 0x5ee   : > { %v1847_v0 = vpop.f32.mrf.mxu3 }
 0x5ef   : > { %v1824_v61 = vadd.f32 %v1823_v57, %v1800_v56 }
 0x5f1   : > { %v1848_v3 = vadd.f32 %v1847_v0, %v1824_v61 }
 0x5f4   : > { %v1871_v59 = vpop.f32.mrf.mxu0 }
 0x5f5   : > { %v1872_v60 = vadd.f32 %v1871_v59, %v1848_v3 }
 0x5f7   : > { %v1894_v4 = vadd.f32 %v1893_v1, %v1872_v60 }
 0x5f9   : > { %v1897_v6 = vsel %vm1235_vm9, %v1894_v4, 0 }
 0x5fa   : > { %v1916_v8 = vand.u32 4294901760, %v1897_v6 }
 0x5fc   : > { %v1917_v12 = vsub.f32 %v1897_v6, %v1916_v8  ;;  %1947 = vmatmul.f32.vlgmr.msra.gmra.mxu3 %v1916_v8 }
 0x5fd   : > { %2140 = vmatpush.msra.mxu3 %v2063_v44 }
 0x5fe   : > { %1971 = vmatmul.f32.vlgmr.msrb.gmra.mxu0 %v1917_v12  ;;  %v1918_v55 = vand.u32 4294901760, %v1917_v12 }
 0x5ff   : > { %2166 = vmatpush.msrb.mxu0 %v2091_v46 }
 0x600   : > { %1995 = vmatmul.f32.vlgmr.msrb.gmra.mxu1 %v1918_v55  ;;  %v1919_v17 = vsub.f32 %v1917_v12, %v1918_v55  ;;  %v664_v12 = vld [vmem:[#allocation15 + $0x10] sm:$0xff] }
 0x601   : > { %2188 = vmatpush.msrb.mxu1 %v2063_v44 }
 0x602   : > { %v1920_v19 = vand.u32 4294901760, %v1919_v17 }
 0x604   : > { %1921 = vmatmul.f32.vlgmr.msra.gmra.mxu2 %v1920_v19  ;;  %2041 = vmatmul.f32.vlgmr.msrb.gmra.mxu3 %v1916_v8 }
 0x605   : > { %2248 = vmatpush.xpose.msrb.mxu3 %v2247_v20  ;;  %2117 = vmatpush.msra.mxu2 %v2090_v45 }
 0x606   : > { %2070 = vmatmul.f32.vlgmr.msra.gmra.mxu0 %v2069_v22 }
 0x607   : > { %2271 = vmatpush.xpose.msra.mxu0 %v2244_v2 }
 0x608   : > { %2096 = vmatmul.f32.vlgmr.msra.gmra.mxu1 %v2065_v54 }
 0x609   : > { %2294 = vmatpush.xpose.msra.mxu1 %v2217_v50 }
 0x60c   : > { %2019 = vmatmul.f32.vlgmr.msrb.gmra.mxu2 %v1916_v8  ;;  %2144 = vmatmul.f32.vlgmr.msra.gmra.mxu3 %v2067_v13  ;;  %v2544_v13 = vand.u32 4294901760, %v664_v12 }
 0x60d   : > { %2218 = vmatpush.xpose.msrb.mxu2 %v2217_v50  ;;  %2342 = vmatpush.xpose.msra.mxu3 %v2217_v50 }
 0x60e   : > { %2168 = vmatmul.f32.vlgmr.msrb.gmra.mxu0 %v2065_v54 }
 0x60f   : > { %2396 = vmatpush.msrb.mxu0 %v2395_v16 }
 0x610   : > { %2190 = vmatmul.f32.vlgmr.msrb.gmra.mxu1 %v2065_v54 }
 0x611   : > { %2426 = vmatpush.msrb.mxu1 %v2425_v28 }
 0x614   : > { %2120 = vmatmul.f32.vlgmr.msra.gmra.mxu2 %v2066_v5  ;;  %2250 = vmatmul.f32.vlgmr.msrb.gmra.mxu3 %v2219_v25 }
 0x615   : > { %2320 = vmatpush.xpose.msra.mxu2 %v2245_v9  ;;  %2472 = vmatpush.msrb.mxu3 %v2395_v16 }
 0x616   : > { %2274 = vmatmul.f32.vlgmr.msra.gmra.mxu0 %v2220_v27 }
 0x617   : > { %2498 = vmatpush.msra.mxu0 %v2423_v24 }
 0x618   : > { %2298 = vmatmul.f32.vlgmr.msra.gmra.mxu1 %v2221_v29 }
 0x619   : > { %2520 = vmatpush.msra.mxu1 %v2395_v16  ;;  %v2679_v16 = vpop.permute.xlu1 %2678 }
 0x61a   : > { %v2682_v19 = vsel %vm1235_vm9, %v2679_v16, 0 }
 0x61b   : > { %v4396_v23 = vand.u32 4294901760, %v2682_v19 }
 0x61c   : > { %2224 = vmatmul.f32.vlgmr.msrb.gmra.mxu2 %v2223_v32  ;;  %2344 = vmatmul.f32.vlgmr.msra.gmra.mxu3 %v2219_v25 }
 0x61d   : > { %2449 = vmatpush.msrb.mxu2 %v2422_v21  ;;  %v2726_v28 = vsub.f32 %v2682_v19, %v4396_v23 }
 0x624   : > { %2322 = vmatmul.f32.vlgmr.msra.gmra.mxu2 %v2219_v25 }
 0x625   : > { %2545 = vmatpush.msra.mxu2 %v2544_v13 }
 0x67b   : > { %v1972_v33 = vpop.f32.mrf.mxu0 }
 0x67d   : > { %v1996_v15 = vpop.f32.mrf.mxu1 }
 0x67f   : > { %v1948_v30 = vpop.f32.mrf.mxu3 }
 0x683   : > { %v2071_v39 = vpop.f32.mrf.mxu0 }
 0x685   : > { %v2097_v42 = vpop.f32.mrf.mxu1 }
 0x687   : > { %v1922_v34 = vpop.f32.mrf.mxu2  ;;  %v2042_v37 = vpop.f32.mrf.mxu3 }
 0x688   : > { %v1949_v35 = vadd.f32 %v1948_v30, %v1922_v34  ;;  %v2727_v30 = vand.u32 4294901760, %v2726_v28 }
 0x68a   : > { %v1973_v36 = vadd.f32 %v1972_v33, %v1949_v35  ;;  %v2728_v34 = vsub.f32 %v2726_v28, %v2727_v30 }
 0x68b   : > { %v2169_v46 = vpop.f32.mrf.mxu0 }
 0x68c   : > { %v1997_v38 = vadd.f32 %v1996_v15, %v1973_v36  ;;  %v2571_v36 = vsub.f32 %v664_v12, %v2544_v13 }
 0x68d   : > { %v2191_v52 = vpop.f32.mrf.mxu1 }
 0x68f   : > { %v2020_v40 = vpop.f32.mrf.mxu2  ;;  %v2145_v44 = vpop.f32.mrf.mxu3 }
 0x690   : > { %v2021_v41 = vadd.f32 %v2020_v40, %v1997_v38  ;;  %v2729_v38 = vand.u32 4294901760, %v2728_v34 }
 0x692   : > { %v2043_v43 = vadd.f32 %v2042_v37, %v2021_v41 }
 0x693   : > { %v2275_v63 = vpop.f32.mrf.mxu0 }
 0x694   : > { %v2072_v11 = vadd.f32 %v2071_v39, %v2043_v43  ;;  %v2572_v39 = vand.u32 4294901760, %v2571_v36 }
 0x695   : > { %v2299_v0 = vpop.f32.mrf.mxu1 }
 0x696   : > { %v2098_v45 = vadd.f32 %v2097_v42, %v2072_v11  ;;  %v2573_v40 = vsub.f32 %v2571_v36, %v2572_v39 }
 0x697   : > { %v2121_v47 = vpop.f32.mrf.mxu2  ;;  %v2251_v57 = vpop.f32.mrf.mxu3 }
 0x698   : > { %v2122_v48 = vadd.f32 %v2121_v47, %v2098_v45  ;;  %v2574_v41 = vand.u32 4294901760, %v2573_v40 }
 0x69a   : > { %v2146_v51 = vadd.f32 %v2145_v44, %v2122_v48  ;;  %2575 = vmatpush.msra.mxu3 %v2574_v41  ;;  %v2677_v44 = vpop.permute.xlu1 %2676 }
 0x69b   : > { %v2680_v47 = vsel %vm1235_vm9, %v2677_v44, 0 }
 0x69c   : > { %v2170_v53 = vadd.f32 %v2169_v46, %v2146_v51 }
 0x69e   : > { %v4389_v56 = vadd.f32 %v2191_v52, %v2170_v53  ;;  %v2701_v52 = vand.u32 4294901760, %v2680_v47 }
 0x69f   : > { %v2225_v61 = vpop.f32.mrf.mxu2  ;;  %v2345_v59 = vpop.f32.mrf.mxu3 }
 0x6a0   : > { %v2252_v62 = vadd.f32 %v2251_v57, %v2225_v61 }
 0x6a2   : > { %v2276_v58 = vadd.f32 %v2275_v63, %v2252_v62  ;;  %v2702_v63 = vsub.f32 %v2680_v47, %v2701_v52 }
 0x6a4   : > { %v2300_v50 = vadd.f32 %v2299_v0, %v2276_v58 }
 0x6a7   : > { %v2323_v3 = vpop.f32.mrf.mxu2 }
 0x6a8   : > { %v2324_v54 = vadd.f32 %v2323_v3, %v2300_v50  ;;  %v2703_v50 = vand.u32 4294901760, %v2702_v63 }
 0x6aa   : > { %v2346_v60 = vadd.f32 %v2345_v59, %v2324_v54  ;;  %v2704_v59 = vsub.f32 %v2702_v63, %v2703_v50 }
 0x6ac   : > { %v2348_v1 = vmul.f32 0.35355338, %v2346_v60 }
 0x6ae   : > { %v2349_v2 = vsel %vm1234_vm10, -1e+09, %v2348_v1 }
 0x6af   : > { %v2350_v4 = vsel %vm1235_vm9, %v2349_v2, -inf }
 0x6b0   : > { %2351 = vmax.xlane.f32.xlu2 %v2350_v4 }
 0x723   : > { %v2352_v5 = vpop.xlane.xlu2 %2351 }
 0x724   : > { %v2353_v6 = vsub.f32 %v2349_v2, %v2352_v5  ;;  %v2705_v2 = vand.u32 4294901760, %v2704_v59 }
 0x726   : > { %v2354_v8 = vmul.f32 1.442695, %v2353_v6 }
 0x728   : > { %3523 = vpow2.f32 %v2354_v8 }
 0x72e   : > { %v3524_v9 = vpop.eup %3523 }
 0x72f   : > { %v2356_v10 = vsel %vm1235_vm9, %v3524_v9, 0.0 }
 0x730   : > { %2357 = vadd.xlane.f32.xlu0 %v2356_v10 }
 0x7a3   : > { %v2358_v55 = vpop.xlane.xlu0 %2357 }
 0x7a4   : > { %3525 = vrcp.f32 %v2358_v55  ;;  %v2370_v20 = vand.u32 2147483648, %v2358_v55  ;;  %v2368_v22 = vand.u32 2147483647, %v2358_v55  ;;  %vm2364_vm5 = vweird.f32 %v2358_v55 }
 0x7a6   : > { %v2371_v25 = vor.u32 1.1754944e-38, %v2370_v20  ;;  %vm2369_vm7 = vcmp.eq.f32.partialorder %v2368_v22, 8.507059e+37 }
 0x7aa   : > { %v3526_v14 = vpop.eup %3525 }
 0x7ab   : > { %v2360_v17 = vmul.f32 %v3526_v14, %v2358_v55  ;;  %vm2365_vm4 = vweird.f32 %v3526_v14 }
 0x7ac   : > { %vm2366_vm6 = vmor %vm2364_vm5, %vm2365_vm4 }
 0x7ad   : > { %v2361_v18 = vsub.f32 1.0, %v2360_v17 }
 0x7af   : > { %v2362_v21 = vmul.f32 %v3526_v14, %v2361_v18 }
 0x7b1   : > { %v2363_v24 = vadd.f32 %v3526_v14, %v2362_v21 }
 0x7b3   : > { %v2367_v26 = vsel %vm2366_vm6, %v3526_v14, %v2363_v24 }
 0x7b4   : > { %v2372_v27 = vsel %vm2369_vm7, %v2371_v25, %v2367_v26 }
 0x7b5   : > { %v2373_v29 = vmul.f32 %v3524_v9, %v2372_v27 }
 0x7b7   : > { %v2378_v31 = vsel %vm1235_vm9, %v2373_v29, 0 }
 0x7b8   : > { %v2397_v32 = vand.u32 4294901760, %v2378_v31 }
 0x7ba   : > { %2428 = vmatmul.f32.vlgmr.msrb.gmra.mxu1 %v2397_v32  ;;  %v2398_v33 = vsub.f32 %v2378_v31, %v2397_v32 }
 0x7bb   : > { %2621 = vmatpush.msrb.mxu1 %v2544_v13 }
 0x7bc   : > { %2452 = vmatmul.f32.vlgmr.msrb.gmra.mxu2 %v2398_v33  ;;  %v2399_v15 = vand.u32 4294901760, %v2398_v33 }
 0x7bd   : > { %2647 = vmatpush.msrb.mxu2 %v2572_v39 }
 0x7be   : > { %2476 = vmatmul.f32.vlgmr.msrb.gmra.mxu3 %v2399_v15  ;;  %v2400_v35 = vsub.f32 %v2398_v33, %v2399_v15 }
 0x7bf   : > { %2669 = vmatpush.msrb.mxu3 %v2544_v13 }
 0x7c0   : > { %v2401_v37 = vand.u32 4294901760, %v2400_v35 }
 0x7c2   : > { %2402 = vmatmul.f32.vlgmr.msrb.gmra.mxu0 %v2401_v37  ;;  %2522 = vmatmul.f32.vlgmr.msra.gmra.mxu1 %v2397_v32 }
 0x7c3   : > { %2730 = vmatpush.xpose.msra.mxu1 %v2729_v38  ;;  %2598 = vmatpush.msrb.mxu0 %v2571_v36 }
 0x7ca   : > { %2500 = vmatmul.f32.vlgmr.msra.gmra.mxu0 %v2397_v32 }
 0x7cb   : > { %2700 = vmatpush.xpose.msra.mxu0 %v4396_v23 }
 0x837   : > { %v2429_v42 = vpop.f32.mrf.mxu1 }
 0x83f   : > { %v2403_v43 = vpop.f32.mrf.mxu0  ;;  %v2453_v45 = vpop.f32.mrf.mxu2 }
 0x840   : > { %v2430_v11 = vadd.f32 %v2429_v42, %v2403_v43  ;;  %v2523_v61 = vpop.f32.mrf.mxu1 }
 0x841   : > { %v2477_v48 = vpop.f32.mrf.mxu3 }
 0x842   : > { %v2454_v46 = vadd.f32 %v2453_v45, %v2430_v11 }
 0x844   : > { %v2478_v51 = vadd.f32 %v2477_v48, %v2454_v46 }
 0x847   : > { %v2501_v53 = vpop.f32.mrf.mxu0 }
 0x848   : > { %v2502_v57 = vadd.f32 %v2501_v53, %v2478_v51 }
 0x84a   : > { %v2524_v62 = vadd.f32 %v2523_v61, %v2502_v57 }
 0x84c   : > { %v2527_v58 = vsel %vm1235_vm9, %v2524_v62, 0 }
 0x84d   : > { %v2546_v0 = vand.u32 4294901760, %v2527_v58 }
 0x84f   : > { %v2547_v3 = vsub.f32 %v2527_v58, %v2546_v0  ;;  %2577 = vmatmul.f32.vlgmr.msra.gmra.mxu3 %v2546_v0  ;;  %v665_v58 = vld [vmem:[#allocation15 + $0x18] sm:$0xff] }
 0x850   : > { %2776 = vmatpush.xpose.msra.mxu3 %v4396_v23 }
 0x851   : > { %2601 = vmatmul.f32.vlgmr.msrb.gmra.mxu0 %v2547_v3  ;;  %v2548_v54 = vand.u32 4294901760, %v2547_v3 }
 0x852   : > { %2802 = vmatpush.xpose.msrb.mxu0 %v2727_v30 }
 0x853   : > { %2625 = vmatmul.f32.vlgmr.msrb.gmra.mxu1 %v2548_v54  ;;  %v2549_v60 = vsub.f32 %v2547_v3, %v2548_v54 }
 0x854   : > { %2824 = vmatpush.xpose.msrb.mxu1 %v4396_v23 }
 0x855   : > { %v2550_v1 = vand.u32 4294901760, %v2549_v60 }
 0x857   : > { %2551 = vmatmul.f32.vlgmr.msra.gmra.mxu2 %v2550_v1  ;;  %2671 = vmatmul.f32.vlgmr.msrb.gmra.mxu3 %v2546_v0 }
 0x858   : > { %2753 = vmatpush.xpose.msra.mxu2 %v2726_v28 }
 0x859   : > { %2706 = vmatmul.f32.vlgmr.msra.gmra.mxu0 %v2705_v2 }
 0x85b   : > { %2732 = vmatmul.f32.vlgmr.msra.gmra.mxu1 %v2701_v52 }
 0x85f   : > { %2649 = vmatmul.f32.vlgmr.msrb.gmra.mxu2 %v2546_v0  ;;  %2780 = vmatmul.f32.vlgmr.msra.gmra.mxu3 %v2703_v50  ;;  %v3026_v0 = vand.u32 4294901760, %v665_v58 }
 0x861   : > { %2804 = vmatmul.f32.vlgmr.msrb.gmra.mxu0 %v2701_v52  ;;  %v3053_v50 = vsub.f32 %v665_v58, %v3026_v0 }
 0x863   : > { %2826 = vmatmul.f32.vlgmr.msrb.gmra.mxu1 %v2701_v52  ;;  %v3054_v3 = vand.u32 4294901760, %v3053_v50 }
 0x865   : > { %v3055_v54 = vsub.f32 %v3053_v50, %v3054_v3 }
 0x867   : > { %2756 = vmatmul.f32.vlgmr.msra.gmra.mxu2 %v2702_v63  ;;  %v3056_v59 = vand.u32 4294901760, %v3055_v54 }
 0x8ce   : > { %v2602_v5 = vpop.f32.mrf.mxu0 }
 0x8d0   : > { %v2626_v9 = vpop.f32.mrf.mxu1 }
 0x8d2   : > { %v2578_v4 = vpop.f32.mrf.mxu3 }
 0x8d6   : > { %v2707_v16 = vpop.f32.mrf.mxu0 }
 0x8d8   : > { %v2733_v18 = vpop.f32.mrf.mxu1 }
 0x8d9   : > { %v2734_v20 = vadd.f32 %v2733_v18, %v2707_v16 }
 0x8da   : > { %v2552_v6 = vpop.f32.mrf.mxu2  ;;  %v2672_v13 = vpop.f32.mrf.mxu3 }
 0x8db   : > { %v2579_v8 = vadd.f32 %v2578_v4, %v2552_v6 }
 0x8dd   : > { %v2603_v10 = vadd.f32 %v2602_v5, %v2579_v8 }
 0x8de   : > { %v2805_v25 = vpop.f32.mrf.mxu0 }
 0x8df   : > { %v2627_v12 = vadd.f32 %v2626_v9, %v2603_v10 }
 0x8e0   : > { %v2827_v27 = vpop.f32.mrf.mxu1 }
 0x8e2   : > { %v2650_v55 = vpop.f32.mrf.mxu2  ;;  %v2781_v23 = vpop.f32.mrf.mxu3 }
 0x8e3   : > { %v2651_v14 = vadd.f32 %v2650_v55, %v2627_v12 }
 0x8e5   : > { %v2673_v17 = vadd.f32 %v2672_v13, %v2651_v14 }
 0x8e7   : > { %v4406_v19 = vadd.f32 %v2673_v17, %v4389_v56 }
 0x8ea   : > { %v2757_v21 = vpop.f32.mrf.mxu2 }
 0x8eb   : > { %v2758_v22 = vadd.f32 %v2757_v21, %v2734_v20 }
 0x8ed   : > { %v2782_v24 = vadd.f32 %v2781_v23, %v2758_v22 }
 0x8ef   : > { %v2806_v26 = vadd.f32 %v2805_v25, %v2782_v24 }
 0x8f1   : > { %v2828_v28 = vadd.f32 %v2827_v27, %v2806_v26 }
 0x8f3   : > { %v2830_v29 = vmul.f32 0.35355338, %v2828_v28 }
 0x8f5   : > { %v2831_v31 = vsel %vm1234_vm10, -1e+09, %v2830_v29 }
 0x8f6   : > { %v2832_v32 = vsel %vm1235_vm9, %v2831_v31, -inf }
 0x8f7   : > { %2833 = vmax.xlane.f32.xlu2 %v2832_v32 }
 0x90f   : > { %2856 = vrot.lane.b32.xlu2 %v4343_v49, %s3934_s26 }
 0x96a   : > { %v2834_v56 = vpop.xlane.xlu2 %2833 }
 0x96b   : > { %v2835_v30 = vsub.f32 %v2831_v31, %v2834_v56  ;;  %v3506_v56 = vld [vmem:[#allocation16] ss:$0 sm:$0xff] }
 0x96d   : > { %v2836_v33 = vmul.f32 1.442695, %v2835_v30 }
 0x96f   : > { %3527 = vpow2.f32 %v2836_v33 }
 0x972   : > { %v2857_v15 = vpop.permute.xlu2 %2856 }
 0x973   : > { %v2877_v34 = vand.u32 4294901760, %v2857_v15 }
 0x975   : > { %v3528_v35 = vpop.eup %3527  ;;  %v2904_v36 = vsub.f32 %v2857_v15, %v2877_v34  ;;  %2878 = vmatpush.msrb.mxu2 %v2877_v34  ;;  %2954 = vmatpush.msra.mxu1 %v2877_v34  ;;  %v3531_v15 = vld [vmem:[%s487_s6] sm:$0xff] }
 0x976   : > { %v2838_v37 = vsel %vm1235_vm9, %v3528_v35, 0.0 }
 0x977   : > { %v2905_v7 = vand.u32 4294901760, %v2904_v36  ;;  %2839 = vadd.xlane.f32.xlu1 %v2838_v37  ;;  %2931 = vmatpush.msra.mxu0 %v2904_v36 }
 0x978   : > { %3057 = vmatpush.msrb.mxu1 %v3056_v59 }
 0x979   : > { %v2906_v38 = vsub.f32 %v2904_v36, %v2905_v7  ;;  %2980 = vmatpush.msra.mxu2 %v2905_v7  ;;  %3027 = vmatpush.msrb.mxu0 %v3026_v0 }
 0x97b   : > { %v2907_v39 = vand.u32 4294901760, %v2906_v38 }
 0x97d   : > { %2908 = vmatpush.msrb.mxu3 %v2907_v39 }
 0x97f   : > { %3002 = vmatpush.msra.mxu3 %v2877_v34 }
 0x9ea   : > { %v2840_v49 = vpop.xlane.xlu1 %2839 }
 0x9eb   : > { %3529 = vrcp.f32 %v2840_v49  ;;  %v2852_v43 = vand.u32 2147483648, %v2840_v49  ;;  %v2850_v44 = vand.u32 2147483647, %v2840_v49  ;;  %vm2846_vm10 = vweird.f32 %v2840_v49 }
 0x9ed   : > { %v2853_v46 = vor.u32 1.1754944e-38, %v2852_v43  ;;  %vm2851_vm12 = vcmp.eq.f32.partialorder %v2850_v44, 8.507059e+37 }
 0x9f1   : > { %v3530_v40 = vpop.eup %3529 }
 0x9f2   : > { %v2842_v41 = vmul.f32 %v3530_v40, %v2840_v49  ;;  %vm2847_vm8 = vweird.f32 %v3530_v40 }
 0x9f3   : > { %vm2848_vm11 = vmor %vm2846_vm10, %vm2847_vm8 }
 0x9f4   : > { %v2843_v42 = vsub.f32 1.0, %v2842_v41 }
 0x9f6   : > { %v2844_v11 = vmul.f32 %v3530_v40, %v2843_v42 }
 0x9f8   : > { %v2845_v45 = vadd.f32 %v3530_v40, %v2844_v11 }
 0x9fa   : > { %v2849_v47 = vsel %vm2848_vm11, %v3530_v40, %v2845_v45 }
 0x9fb   : > { %v2854_v48 = vsel %vm2851_vm12, %v2853_v46, %v2849_v47 }
 0x9fc   : > { %v2855_v51 = vmul.f32 %v3528_v35, %v2854_v48 }
 0x9fe   : > { %v2860_v52 = vsel %vm1235_vm9, %v2855_v51, 0 }
 0x9ff   : > { %v2879_v53 = vand.u32 4294901760, %v2860_v52 }
 0xa01   : > { %2910 = vmatmul.f32.vlgmr.msrb.gmra.mxu3 %v2879_v53  ;;  %v2880_v57 = vsub.f32 %v2860_v52, %v2879_v53 }
 0xa02   : > { %3103 = vmatpush.msrb.mxu3 %v3026_v0 }
 0xa03   : > { %2934 = vmatmul.f32.vlgmr.msra.gmra.mxu0 %v2880_v57  ;;  %v2881_v61 = vand.u32 4294901760, %v2880_v57 }
 0xa04   : > { %3129 = vmatpush.msra.mxu0 %v3054_v3 }
 0xa05   : > { %2958 = vmatmul.f32.vlgmr.msra.gmra.mxu1 %v2881_v61  ;;  %v2882_v62 = vsub.f32 %v2880_v57, %v2881_v61 }
 0xa06   : > { %3151 = vmatpush.msra.mxu1 %v3026_v0 }
 0xa07   : > { %v2883_v63 = vand.u32 4294901760, %v2882_v62 }
 0xa09   : > { %2884 = vmatmul.f32.vlgmr.msrb.gmra.mxu2 %v2883_v63  ;;  %3004 = vmatmul.f32.vlgmr.msra.gmra.mxu3 %v2879_v53 }
 0xa0a   : > { %3080 = vmatpush.msrb.mxu2 %v3053_v50 }
 0xa11   : > { %2982 = vmatmul.f32.vlgmr.msra.gmra.mxu2 %v2879_v53 }
 0xa80   : > { %v2935_v4 = vpop.f32.mrf.mxu0 }
 0xa82   : > { %v2959_v6 = vpop.f32.mrf.mxu1 }
 0xa84   : > { %v2911_v60 = vpop.f32.mrf.mxu3 }
 0xa8c   : > { %v2885_v1 = vpop.f32.mrf.mxu2  ;;  %v3005_v12 = vpop.f32.mrf.mxu3 }
 0xa8d   : > { %v2912_v2 = vadd.f32 %v2911_v60, %v2885_v1 }
 0xa8f   : > { %v2936_v5 = vadd.f32 %v2935_v4, %v2912_v2 }
 0xa91   : > { %v2960_v8 = vadd.f32 %v2959_v6, %v2936_v5 }
 0xa94   : > { %v2983_v9 = vpop.f32.mrf.mxu2 }
 0xa95   : > { %v2984_v10 = vadd.f32 %v2983_v9, %v2960_v8 }
 0xa97   : > { %v3006_v13 = vadd.f32 %v3005_v12, %v2984_v10 }
 0xa99   : > { %v3009_v55 = vsel %vm1235_vm9, %v3006_v13, 0 }
 0xa9a   : > { %v3028_v14 = vand.u32 4294901760, %v3009_v55 }
 0xa9c   : > { %v3029_v16 = vsub.f32 %v3009_v55, %v3028_v14  ;;  %3059 = vmatmul.f32.vlgmr.msrb.gmra.mxu1 %v3028_v14 }
 0xa9e   : > { %3083 = vmatmul.f32.vlgmr.msrb.gmra.mxu2 %v3029_v16  ;;  %v3030_v17 = vand.u32 4294901760, %v3029_v16 }
 0xaa0   : > { %3107 = vmatmul.f32.vlgmr.msrb.gmra.mxu3 %v3030_v17  ;;  %v3031_v18 = vsub.f32 %v3029_v16, %v3030_v17 }
 0xaa2   : > { %v3032_v20 = vand.u32 4294901760, %v3031_v18 }
 0xaa4   : > { %3033 = vmatmul.f32.vlgmr.msrb.gmra.mxu0 %v3032_v20  ;;  %3153 = vmatmul.f32.vlgmr.msra.gmra.mxu1 %v3028_v14 }
 0xaac   : > { %3131 = vmatmul.f32.vlgmr.msra.gmra.mxu0 %v3028_v14 }
 0xb19   : > { %v3060_v21 = vpop.f32.mrf.mxu1 }
 0xb21   : > { %v3034_v22 = vpop.f32.mrf.mxu0  ;;  %v3084_v24 = vpop.f32.mrf.mxu2 }
 0xb22   : > { %v3061_v23 = vadd.f32 %v3060_v21, %v3034_v22  ;;  %v3154_v31 = vpop.f32.mrf.mxu1 }
 0xb23   : > { %v3108_v26 = vpop.f32.mrf.mxu3 }
 0xb24   : > { %v3085_v25 = vadd.f32 %v3084_v24, %v3061_v23 }
 0xb26   : > { %v3109_v27 = vadd.f32 %v3108_v26, %v3085_v25 }
 0xb29   : > { %v3132_v28 = vpop.f32.mrf.mxu0 }
 0xb2a   : > { %v3133_v29 = vadd.f32 %v3132_v28, %v3109_v27 }
 0xb2c   : > { %v3155_v32 = vadd.f32 %v3154_v31, %v3133_v29 }
 0xb2e   : > { %v3157_v30 = vadd.f32 %v3155_v32, %v4406_v19 }
 0xb30   : > { %v3161_v33 = vadd.f32 %v3506_v56, %v3157_v30 }
 0xb32   : > { %v3162_v34 = vadd.f32 %v3531_v15, %v3161_v33 }
 0xb34   : > { %3163 = vst.msk [vmem:[%s581_s29] sm:$0xff] %vm585_vm0, %v3162_v34 }
 0xb35 PF: > { %p27_p3 = scmp.ge.s32.totalorder %s4089_s30, 4   ;;  %s4461_s21 = smov %s3908_s22 }
 0xb36   : > { %s4462_s22 = smov %s3912_s23  ;;  %s4463_s23 = smov %s4100_s14 }
 0xb37   : > { %s4464_s24 = smov %s4089_s30  ;;  %29 = sbr.rel (!%p27_p3) target bundleno = 12 (0xc), region = 148 }
 0xb3c   :  { %3183 = vsyncpa [#allocation3], 1 }
 0xb3d   :  { %3185 = vsyncpa [#allocation3 + $0x1], 1 }
 0xb3e   :  { %3186 = vsyncpa [#allocation5], 1 }
 0xb3f   :  { %3187 = vsyncpa [#allocation8], 1 }
 0xb40   :  { %3188 = vsyncpa [#allocation11], 1 }
 0xb41   :  { %3189 = vsyncpa [#allocation14], 1 }
 0xb42   :  { %3190 = vsyncpa [#allocation17], 1 }

// kernel: decoder_layer_pallas.4
= control target key start
LH: loop header
LB: loop body
LE: loop exit
PB: predicated region body
PF: predicated region fallthrough
CT: control target
= control target key end

     0   :  { %s4220_s0 = inlined_call_operand.vmem [shape: f32[2,8,32], index: 0, kind: input, shape index: {}]   ;;  %s4221_s1 = inlined_call_operand.vmem [shape: f32[1,32], index: 1, kind: input, shape index: {}]   ;;  %s4222_s2 = inlined_call_operand.vmem [shape: f32[1,32], index: 2, kind: input, shape index: {}]   ;;  %s4223_s3 = inlined_call_operand.vmem [shape: f32[2,10,32], index: 3, kind: input, shape index: {}]   ;;  %s4224_s4 = inlined_call_operand.hbm [shape: f32[32,32], index: 4, kind: input, shape index: {}]   ;;  %s4225_s5 = inlined_call_operand.vmem [shape: f32[1,32], index: 5, kind: input, shape index: {}]   ;;  %s4226_s6 = inlined_call_operand.hbm [shape: f32[32,32], index: 6, kind: input, shape index: {}]   ;;  %s4227_s7 = inlined_call_operand.vmem [shape: f32[1,32], index: 7, kind: input, shape index: {}]   ;;  %s4228_s8 = inlined_call_operand.hbm [shape: f32[32,32], index: 8, kind: input, shape index: {}]   ;;  %s4229_s9 = inlined_call_operand.vmem [shape: f32[1,32], index: 9, kind: input, shape index: {}]   ;;  %s4230_s10 = inlined_call_operand.hbm [shape: f32[32,32], index: 10, kind: input, shape index: {}]   ;;  %s4231_s11 = inlined_call_operand.vmem [shape: f32[1,32], index: 11, kind: input, shape index: {}]   ;;  %s4232_s12 = inlined_call_operand.vmem [shape: f32[2,1,10], index: 12, kind: input, shape index: {}]   ;;  %s4233_s13 = inlined_call_operand.vmem [shape: f32[2,8,32], index: 13, kind: output, shape index: {}]  }
   0x1   :  { %4234 = sst [smem:[#allocation12_spill]] %s4224_s4 }
   0x2   :  { %4235 = sst [smem:[#allocation13_spill]] %s4226_s6 }
   0x3   :  { %18 = vsyncpa [#allocation3], 0 }
   0x4   :  { %19 = vsyncpa [#allocation5], 0 }
   0x5   :  { %20 = vsyncpa [#allocation8], 0  ;;  %s3773_s25 = smov 0  }
   0x6 LB: > { %s3779_s26 = sadd.s32 4294967295, %s3689_s25   ;;  %p3445_p0 = scmp.ge.s32.totalorder %s3689_s25, 1  ;;  %s3689_s25 = sphi %s3773_s25, %s26_s25  }
   0x7   : > { %p345_p1 = scmp.lt.s32.totalorder %s3689_s25, 3  ;;  %p3492_p2 = scmp.eq.s32.totalorder %s3779_s26, 0 }
   0x8   : > { %s4236_s6 = sld [smem:[#allocation13_spill]]  ;;  %s3691_s17 = smov [#allocation4]  }
   0x9   : > { %p3787_p3 = pnand %p3445_p0, %p345_p1  ;;  %s4238_s4 = sld [smem:[#allocation12_spill]] }
   0xa   : > { %s381_s18 = sshll.u32 %s3691_s17, 4  ;;  %s3692_s20 = smov [#allocation2]   ;;  %s382_s18 = int_to_ptr.vmem [resolvable:$true] %s381_s18 }
   0xb   : > { %p3479_p4 = pneg %p3787_p3  ;;  %s364_s21 = sshll.u32 %s3692_s20, 4  ;;  %s365_s21 = int_to_ptr.vmem [resolvable:$true] %s364_s21 }
   0xc   : > { %s396_s24 = sshll.u32 %s4228_s8, 4  ;;  %s3693_s27 = smov 128   ;;  %s397_s24 = int_to_ptr.hbm [resolvable:$true] %s396_s24 }
   0xd   : > { %p3798_p5 = pnand %p3492_p2, %p3479_p4  ;;  %s3694_s28 = smov 8  }
   0xe   : > { %s379_s29 = sshll.u32 %s4236_s6, 4  ;;  %s3695_s14 = smov [#allocation6]   ;;  %s380_s29 = int_to_ptr.hbm [resolvable:$true] %s379_s29 }
   0xf   : > { %s362_s16 = sshll.u32 %s4238_s4, 4  ;;  %s398_s15 = sshll.u32 %s3695_s14, 4  ;;  %s363_s16 = int_to_ptr.hbm [resolvable:$true] %s362_s16  ;;  %s399_s15 = int_to_ptr.vmem [resolvable:$true] %s398_s15 }
  0x10   : > { %3485 = dma.hbm_to_vmem [thread:$0]  (!%p3798_p5), %s380_s29, 512, %s382_s18, [#allocation5], %s3693_s27, %s3693_s27, %s3694_s28  }
  0x11   : > { %3482 = dma.hbm_to_vmem [thread:$0]  (!%p3798_p5), %s363_s16, 512, %s365_s21, [#allocation3], %s3693_s27, %s3693_s27, %s3694_s28  }
  0x12   : > { %s413_s6 = sshll.u32 %s4230_s10, 4  ;;  %s3696_s20 = smov [#allocation7]   ;;  %s414_s6 = int_to_ptr.hbm [resolvable:$true] %s413_s6 }
  0x13   : > { %3488 = dma.hbm_to_vmem [thread:$0]  (!%p3798_p5), %s397_s24, 512, %s399_s15, [#allocation5], %s3693_s27, %s3693_s27, %s3694_s28  }
  0x14   : > { %s415_s22 = sshll.u32 %s3696_s20, 4  ;;  %455 = sbr.rel (%p3787_p3) target bundleno = 2839 (0xb17), region = 72  ;;  %s416_s22 = int_to_ptr.vmem [resolvable:$true] %s415_s22 }
  0x15   : > { %3491 = dma.hbm_to_vmem [thread:$0]  (!%p3798_p5), %s414_s6, 512, %s416_s22, [#allocation8], %s3693_s27, %s3693_s27, %s3694_s28  }
  0x19   : > { %3676 = dma.done.wait (%p3492_p2), [#allocation3], 512  }
  0x1a   : > { %3678 = vsyncadd (%p3492_p2), [#allocation3], 4294966784 }
  0x1b   : > { %3680 = dma.done.wait (%p3492_p2), [#allocation5], 1024  }
  0x1c   : > { %3682 = vsyncadd (%p3492_p2), [#allocation5], 4294966272 }
  0x1d   : > { %3684 = dma.done.wait (%p3492_p2), [#allocation8], 512  }
  0x1e   : > { %3686 = vsyncadd (%p3492_p2), [#allocation8], 4294966784  ;;  %p521_p6 = scmp.lt.s32.totalorder %s3779_s26, 1  ;;  %vm540_vm0 = vcmask 261120   ;;  %v3697_v2 = vmov 32.0   ;;  %v3698_v14 = vmov 31.0  }
  0x1f   : > { %3526 = vrcp.f32 %v3697_v2  ;;  %v607_v20 = vld [vmem:[#allocation2 + $0x18] sm:$0xff]  ;;  %v606_v21 = vld [vmem:[#allocation2 + $0x10] sm:$0xff]  ;;  %v605_v22 = vld [vmem:[#allocation2 + $0x8] sm:$0xff]  ;;  %s3699_s22 = smov 120   ;;  %vm1260_vm9 = vcmask 64512   ;;  %s3701_s18 = smov 104  }
  0x20   : > { %s4243_s26 = smov (!%p521_p6, %s3779_s26), 1  ;;  %3528 = vrcp.f32 %v3698_v14  ;;  %v642_v23 = vand.u32 4294901760, %v607_v20  ;;  %v644_v24 = vand.u32 4294901760, %v606_v21  ;;  %v646_v25 = vand.u32 4294901760, %v605_v22  ;;  %v604_v26 = vld [vmem:[#allocation2] sm:$0xff]  ;;  %v612_v50 = vld [vmem:[#allocation4 + $0x18] sm:$0xff] }
  0x21   : > { %s3456_s4 = sshll.u32 %s4243_s26, 3  ;;  %v3849_v27 = vand.u32 4294901760, %v604_v26  ;;  %v3858_v51 = vand.u32 4294901760, %v612_v50  ;;  %v611_v53 = vld [vmem:[#allocation4 + $0x10] sm:$0xff]  ;;  %v610_v57 = vld [vmem:[#allocation4 + $0x8] sm:$0xff]  ;;  %v609_v62 = vld [vmem:[#allocation4] sm:$0xff]  ;;  %s532_s23 = scalar_lea.vmem %s4232_s12, %s4243_s26 }
  0x22   : > { %s3840_s30 = scalar_lea.vmem %s4220_s0, %s3456_s4  ;;  %v672_v28 = vsub.f32 %v607_v20, %v642_v23  ;;  %v678_v29 = vsub.f32 %v606_v21, %v644_v24  ;;  %v684_v30 = vsub.f32 %v605_v22, %v646_v25  ;;  %743 = vmatpush.msra.mxu3 %v642_v23  ;;  %643 = vmatpush.msra.mxu0 %v642_v23  ;;  %v3861_v54 = vand.u32 4294901760, %v611_v53  ;;  %s3462_s16 = sshll.u32 %s4243_s26, 4 }
  0x23   : > { %v537_v0 = vld [vmem:[%s3840_s30] sm:$0xff]  ;;  %v690_v32 = vsub.f32 %v604_v26, %v3849_v27  ;;  %v3864_v55 = vsub.f32 %v612_v50, %v3858_v51  ;;  %v3868_v59 = vand.u32 4294901760, %v610_v57  ;;  %s529_s21 = scalar_lea.vmem %s4223_s3, %s3462_s16  ;;  %s3700_s16 = smov 112   ;;  %vm1462_vm10 = vcmask 1041408  }
  0x24   : > { %v541_v1 = vsel %vm540_vm0, %v537_v0, 0.0  ;;  %v673_v33 = vand.u32 4294901760, %v672_v28  ;;  %v679_v34 = vand.u32 4294901760, %v678_v29  ;;  %714 = vmatpush.msra.mxu2 %v672_v28  ;;  %v685_v35 = vand.u32 4294901760, %v684_v30  ;;  %745 = vmatpush.msra.mxu3 %v644_v24  ;;  %v601_v21 = vld [vmem:[%s529_s21] sm:$0xff]  ;;  %s536_s15 = scalar_lea.vmem %s4233_s13, %s3456_s4 }
  0x25   : > { %542 = vadd.xlane.f32.xlu0 %v541_v1  ;;  %v3527_v3 = vpop.eup %3526  ;;  %v691_v37 = vand.u32 4294901760, %v690_v32  ;;  %645 = vmatpush.msra.mxu0 %v644_v24  ;;  %v875_v58 = vand.u32 4294901760, %v3864_v55  ;;  %v3871_v60 = vsub.f32 %v611_v53, %v3861_v54  ;;  %v3879_v1 = vand.u32 4294901760, %v609_v62 }
  0x26   : > { %v545_v4 = vmul.f32 32.0, %v3527_v3  ;;  %vm549_vm1 = vweird.f32 %v3527_v3  ;;  %v3529_v15 = vpop.eup %3528  ;;  %v674_v39 = vsub.f32 %v672_v28, %v673_v33  ;;  %v680_v40 = vsub.f32 %v678_v29, %v679_v34  ;;  %717 = vmatpush.msra.mxu2 %v678_v29  ;;  %747 = vmatpush.msra.mxu3 %v646_v25 }
  0x27   : > { %v558_v16 = vmul.f32 31.0, %v3529_v15  ;;  %vm562_vm2 = vweird.f32 %v3529_v15  ;;  %v686_v41 = vsub.f32 %v684_v30, %v685_v35  ;;  %647 = vmatpush.msra.mxu0 %v646_v25  ;;  %v692_v44 = vsub.f32 %v690_v32, %v691_v37 }
  0x28   : > { %v546_v5 = vsub.f32 1.0, %v545_v4  ;;  %720 = vmatpush.msra.mxu2 %v684_v30  ;;  %v675_v42 = vand.u32 4294901760, %v674_v39  ;;  %v681_v43 = vand.u32 4294901760, %v680_v40  ;;  %749 = vmatpush.msra.mxu3 %v3849_v27  ;;  %v876_v63 = vsub.f32 %v3864_v55, %v875_v58  ;;  %v616_v40 = vld [vmem:[#allocation6 + $0x10] sm:$0xff] }
  0x29   : > { %v559_v17 = vsub.f32 1.0, %v558_v16  ;;  %649 = vmatpush.msra.mxu0 %v3849_v27  ;;  %v687_v45 = vand.u32 4294901760, %v686_v41  ;;  %v693_v46 = vand.u32 4294901760, %v692_v44  ;;  %v3882_v2 = vsub.f32 %v610_v57, %v3868_v59  ;;  %v615_v44 = vld [vmem:[#allocation6 + $0x8] sm:$0xff] }
  0x2a   : > { %v547_v6 = vmul.f32 %v3527_v3, %v546_v5  ;;  %723 = vmatpush.msra.mxu2 %v690_v32  ;;  %676 = vmatpush.msra.mxu1 %v675_v42  ;;  %v877_v5 = vand.u32 4294901760, %v876_v63  ;;  %vm1434_vm13 = vcmask 80896  }
  0x2b   : > { %v560_v18 = vmul.f32 %v3529_v15, %v559_v17  ;;  %772 = vmatpush.msrb.mxu0 %v673_v33  ;;  %v3521_v33 = vld [vmem:[%s4222_s2] ss:$0 sm:$0xff] }
  0x2c   : > { %v548_v7 = vadd.f32 %v3527_v3, %v547_v6  ;;  %682 = vmatpush.msra.mxu1 %v681_v43  ;;  %837 = vmatpush.msrb.mxu2 %v3858_v51 }
  0x2d   : > { %v561_v19 = vadd.f32 %v3529_v15, %v560_v18  ;;  %776 = vmatpush.msrb.mxu0 %v679_v34  ;;  %878 = vmatpush.msrb.mxu3 %v877_v5 }
  0x2e   : > { %v550_v8 = vsel %vm549_vm1, %v3527_v3, %v548_v7  ;;  %688 = vmatpush.msra.mxu1 %v687_v45  ;;  %839 = vmatpush.msrb.mxu2 %v3861_v54  ;;  %v887_v7 = vand.u32 4294901760, %v3882_v2 }
  0x2f   : > { %v563_v31 = vsel %vm562_vm2, %v3529_v15, %v561_v19  ;;  %780 = vmatpush.msrb.mxu0 %v685_v35  ;;  %v602_v35 = vld [vmem:[%s529_s21 + $0x8] sm:$0x3] }
  0x30   : > { %694 = vmatpush.msra.mxu1 %v693_v46  ;;  %841 = vmatpush.msrb.mxu2 %v3868_v59  ;;  %v822_v42 = vsel %vm540_vm0, %v602_v35, 0  ;;  %v3930_v46 = vand.u32 4294901760, %v615_v44 }
  0x31   : > { %784 = vmatpush.msrb.mxu0 %v691_v37 }
  0x32   : > { %803 = vmatpush.msrb.mxu1 %v642_v23  ;;  %843 = vmatpush.msrb.mxu2 %v3879_v1 }
  0x34   : > { %805 = vmatpush.msrb.mxu1 %v644_v24  ;;  %v3520_v24 = vld [vmem:[%s4221_s1] ss:$0 sm:$0xff] }
  0x36   : > { %807 = vmatpush.msrb.mxu1 %v646_v25 }
  0x38   : > { %809 = vmatpush.msrb.mxu1 %v3849_v27  ;;  %v819_v27 = vsel %vm540_vm0, %v601_v21, 0 }
  0x39   : > { %v3912_v30 = vand.u32 4294901760, %v819_v27 }
  0x3b   : > { %v3921_v39 = vsub.f32 %v819_v27, %v3912_v30  ;;  %v3523_v27 = vld [vmem:[%s4227_s7] ss:$0 sm:$0xff] }
  0x98   : > { %v543_v9 = vpop.xlane.xlu0 %542 }
  0x99   : > { %v551_v10 = vmul.f32 %v550_v8, %v543_v9  ;;  %v3893_v8 = vsub.f32 %v609_v62, %v3879_v1 }
  0x9b   : > { %v3844_v11 = vsub.f32 %v537_v0, %v551_v10  ;;  %v881_v0 = vand.u32 4294901760, %v3871_v60  ;;  %v893_v14 = vand.u32 4294901760, %v3893_v8 }
  0x9d   : > { %v553_v12 = vmul.f32 %v3844_v11, %v3844_v11  ;;  %v882_v6 = vsub.f32 %v3871_v60, %v881_v0  ;;  %v894_v17 = vsub.f32 %v3893_v8, %v893_v14 }
  0x9f   : > { %v554_v13 = vsel %vm540_vm0, %v553_v12, 0.0  ;;  %v883_v12 = vand.u32 4294901760, %v882_v6  ;;  %v895_v18 = vand.u32 4294901760, %v894_v17 }
  0xa0   : > { %555 = vadd.xlane.f32.xlu0 %v554_v13  ;;  %v888_v13 = vsub.f32 %v3882_v2, %v887_v7 }
  0xa1   : > { %884 = vmatpush.msrb.mxu3 %v883_v12 }
  0xa2   : > { %v889_v16 = vand.u32 4294901760, %v888_v13 }
  0xa4   : > { %890 = vmatpush.msrb.mxu3 %v889_v16 }
  0xa6   : > { %896 = vmatpush.msrb.mxu3 %v895_v18 }
 0x113   : > { %v556_v36 = vpop.xlane.xlu0 %555 }
 0x114   : > { %v3852_v38 = vmul.f32 %v563_v31, %v556_v36  ;;  %v595_v31 = vmul.f32 %v3520_v24, %v3844_v11  ;;  %v617_v36 = vld [vmem:[#allocation6 + $0x18] sm:$0xff]  ;;  %v3924_v11 = vand.u32 4294901760, %v616_v40 }
 0x116   : > { %3530 = vrsqrt.f32 %v3852_v38  ;;  %vm572_vm3 = vcmp.eq.f32.partialorder %v3852_v38, inf  ;;  %v575_v4 = vand.u32 2147483648, %v3852_v38  ;;  %vm574_vm4 = vcmp.eq.f32.partialorder %v3852_v38, 0.0 }
 0x117   : > { %v3938_v50 = vsub.f32 %v616_v40, %v3924_v11 }
 0x11c   : > { %v3531_v47 = vpop.eup %3530 }
 0x11d   : > { %v566_v48 = vmul.f32 %v3531_v47, %v3852_v38 }
 0x11f   : > { %v567_v49 = vmul.f32 %v3531_v47, %v566_v48  ;;  %v3933_v48 = vand.u32 4294901760, %v3921_v39 }
 0x121   : > { %v568_v52 = vmul.f32 0.5, %v567_v49  ;;  %v3935_v49 = vand.u32 4294901760, %v822_v42  ;;  %v847_v63 = vsub.f32 %v3921_v39, %v3933_v48 }
 0x123   : > { %v569_v56 = vsub.f32 1.5, %v568_v52  ;;  %v614_v52 = vld [vmem:[#allocation6] sm:$0xff] }
 0x124   : > { %v3940_v53 = vand.u32 4294901760, %v614_v52 }
 0x125   : > { %v570_v61 = vmul.f32 %v3531_v47, %v569_v56 }
 0x126   : > { %v3957_v5 = vsub.f32 %v614_v52, %v3940_v53 }
 0x127   : > { %v571_v3 = vmul.f32 %v570_v61, %v3852_v38  ;;  %v3945_v61 = vsub.f32 %v615_v44, %v3930_v46 }
 0x129   : > { %v573_v9 = vsel %vm572_vm3, %v3852_v38, %v571_v3  ;;  %v3918_v38 = vand.u32 4294901760, %v617_v36  ;;  %v3950_v3 = vsub.f32 %v822_v42, %v3935_v49 }
 0x12a   : > { %v576_v10 = vsel %vm574_vm4, %v575_v4, %v573_v9  ;;  %v1100_v4 = vand.u32 4294901760, %v3938_v50 }
 0x12b   : > { %v577_v15 = vadd.f32 1e-06, %v576_v10  ;;  %v3927_v43 = vsub.f32 %v617_v36, %v3918_v38  ;;  %v1106_v10 = vand.u32 4294901760, %v3945_v61  ;;  %v3967_v13 = vand.u32 4294901760, %v3950_v3 }
 0x12d   : > { %3532 = vrcp.f32 %v577_v15  ;;  %v589_v23 = vand.u32 2147483648, %v577_v15  ;;  %v587_v26 = vand.u32 2147483647, %v577_v15  ;;  %vm583_vm6 = vweird.f32 %v577_v15 }
 0x12e   : > { %v1094_v57 = vand.u32 4294901760, %v3927_v43  ;;  %v1107_v16 = vsub.f32 %v3945_v61, %v1106_v10  ;;  %v855_v17 = vsub.f32 %v3950_v3, %v3967_v13 }
 0x12f   : > { %v590_v29 = vor.u32 1.1754944e-38, %v589_v23  ;;  %vm588_vm8 = vcmp.eq.f32.partialorder %v587_v26, 8.507059e+37 }
 0x130   : > { %v1095_v9 = vsub.f32 %v3927_v43, %v1094_v57  ;;  %v856_v18 = vand.u32 4294901760, %v855_v17 }
 0x133   : > { %v3533_v19 = vpop.eup %3532 }
 0x134   : > { %v579_v20 = vmul.f32 %v3533_v19, %v577_v15  ;;  %vm584_vm5 = vweird.f32 %v3533_v19  ;;  %v1101_v15 = vsub.f32 %v3938_v50, %v1100_v4 }
 0x135   : > { %vm585_vm7 = vmor %vm583_vm6, %vm584_vm5 }
 0x136   : > { %v580_v22 = vsub.f32 1.0, %v579_v20 }
 0x138   : > { %v581_v25 = vmul.f32 %v3533_v19, %v580_v22 }
 0x13a   : > { %v582_v28 = vadd.f32 %v3533_v19, %v581_v25 }
 0x13c   : > { %v586_v32 = vsel %vm585_vm7, %v3533_v19, %v582_v28 }
 0x13d   : > { %v591_v34 = vsel %vm588_vm8, %v590_v29, %v586_v32 }
 0x13e   : > { %v596_v37 = vmul.f32 %v595_v31, %v591_v34 }
 0x140   : > { %v600_v41 = vadd.f32 %v3521_v33, %v596_v37 }
 0x142   : > { %v628_v45 = vsel %vm540_vm0, %v600_v41, 0 }
 0x143   : > { %v650_v47 = vand.u32 4294901760, %v628_v45 }
 0x145   : > { %696 = vmatmul.f32.vlgmr.msra.gmra.mxu1 %v650_v47  ;;  %v651_v56 = vsub.f32 %v628_v45, %v650_v47 }
 0x146   : > { %954 = vmatpush.msra.mxu1 %v3858_v51 }
 0x147   : > { %726 = vmatmul.f32.vlgmr.msra.gmra.mxu2 %v651_v56  ;;  %v652_v62 = vand.u32 4294901760, %v651_v56 }
 0x148   : > { %989 = vmatpush.msra.mxu2 %v875_v58  ;;  %956 = vmatpush.msra.mxu1 %v3861_v54  ;;  %v848_v58 = vand.u32 4294901760, %v847_v63 }
 0x149   : > { %753 = vmatmul.f32.vlgmr.msra.gmra.mxu3 %v652_v62  ;;  %v653_v6 = vsub.f32 %v651_v56, %v652_v62 }
 0x14a   : > { %993 = vmatpush.msra.mxu2 %v881_v0  ;;  %1024 = vmatpush.msra.mxu3 %v3858_v51  ;;  %v1112_v51 = vand.u32 4294901760, %v3957_v5  ;;  %v1096_v0 = vand.u32 4294901760, %v1095_v9 }
 0x14b   : > { %v654_v12 = vand.u32 4294901760, %v653_v6  ;;  %958 = vmatpush.msra.mxu1 %v3868_v59 }
 0x14c   : > { %997 = vmatpush.msra.mxu2 %v887_v7  ;;  %1026 = vmatpush.msra.mxu3 %v3861_v54  ;;  %v1102_v7 = vand.u32 4294901760, %v1101_v15  ;;  %v1113_v54 = vsub.f32 %v3957_v5, %v1112_v51 }
 0x14d   : > { %655 = vmatmul.f32.vlgmr.msra.gmra.mxu0 %v654_v12  ;;  %811 = vmatmul.f32.vlgmr.msrb.gmra.mxu1 %v650_v47 }
 0x14e   : > { %920 = vmatpush.msra.mxu0 %v3864_v55  ;;  %960 = vmatpush.msra.mxu1 %v3879_v1  ;;  %v1108_v55 = vand.u32 4294901760, %v1107_v16 }
 0x14f   : > { %849 = vmatmul.f32.vlgmr.msrb.gmra.mxu2 %v848_v58  ;;  %1028 = vmatpush.msra.mxu3 %v3868_v59  ;;  %v1114_v59 = vand.u32 4294901760, %v1113_v54 }
 0x150   : > { %923 = vmatpush.msra.mxu0 %v3871_v60  ;;  %1001 = vmatpush.msra.mxu2 %v893_v14 }
 0x151   : > { %898 = vmatmul.f32.vlgmr.msrb.gmra.mxu3 %v3912_v30  ;;  %1097 = vmatpush.msrb.mxu1 %v1096_v0 }
 0x152   : > { %926 = vmatpush.msra.mxu0 %v3882_v2  ;;  %1030 = vmatpush.msra.mxu3 %v3879_v1  ;;  %v3522_v1 = vld [vmem:[%s4225_s5] ss:$0 sm:$0xff] }
 0x153   : > { %1103 = vmatpush.msrb.mxu1 %v1102_v7  ;;  %1139 = vmatpush.msrb.mxu2 %v3927_v43 }
 0x154   : > { %929 = vmatpush.msra.mxu0 %v3893_v8  ;;  %1173 = vmatpush.msrb.mxu3 %v3918_v38 }
 0x155   : > { %786 = vmatmul.f32.vlgmr.msrb.gmra.mxu0 %v650_v47  ;;  %964 = vmatmul.f32.vlgmr.msra.gmra.mxu1 %v3933_v48 }
 0x156   : > { %1056 = vmatpush.msrb.mxu0 %v3918_v38  ;;  %1109 = vmatpush.msrb.mxu1 %v1108_v55 }
 0x157   : > { %857 = vmatmul.f32.gmra.mxu2 %v856_v18  ;;  %1175 = vmatpush.msrb.mxu3 %v3924_v11 }
 0x158   : > { %1058 = vmatpush.msrb.mxu0 %v3924_v11  ;;  %1115 = vmatpush.msrb.mxu1 %v1114_v59 }
 0x159   : > { %902 = vmatmul.f32.gmra.mxu3 %v3935_v49  ;;  %1142 = vmatpush.msrb.mxu2 %v3938_v50 }
 0x15a   : > { %1060 = vmatpush.msrb.mxu0 %v3930_v46  ;;  %1177 = vmatpush.msrb.mxu3 %v3930_v46 }
 0x15b   : > { %1145 = vmatpush.msrb.mxu2 %v3945_v61  ;;  %1243 = vmatpush.msra.mxu1 %v3918_v38 }
 0x15c   : > { %1062 = vmatpush.msrb.mxu0 %v3940_v53  ;;  %1179 = vmatpush.msrb.mxu3 %v3940_v53 }
 0x15d   : > { %932 = vmatmul.f32.vlgmr.msra.gmra.mxu0 %v3921_v39  ;;  %970 = vmatmul.f32.gmra.mxu1 %v3967_v13 }
 0x15e   : > { %1148 = vmatpush.msrb.mxu2 %v3957_v5  ;;  %1208 = vmatpush.msra.mxu0 %v1094_v57 }
 0x15f   : > { %1003 = vmatmul.f32.vlgmr.msra.gmra.mxu2 %v3912_v30  ;;  %1245 = vmatpush.msra.mxu1 %v3924_v11 }
 0x160   : > { %1212 = vmatpush.msra.mxu0 %v1100_v4 }
 0x161   : > { %1032 = vmatmul.f32.vlgmr.msra.gmra.mxu3 %v3912_v30  ;;  %1247 = vmatpush.msra.mxu1 %v3930_v46 }
 0x162   : > { %1216 = vmatpush.msra.mxu0 %v1106_v10 }
 0x163   : > { %1249 = vmatpush.msra.mxu1 %v3940_v53 }
 0x164   : > { %1220 = vmatpush.msra.mxu0 %v1112_v51 }
 0x165   : > { %937 = vmatmul.f32.gmra.mxu0 %v3950_v3  ;;  %1117 = vmatmul.f32.vlgmr.msrb.gmra.mxu1 %v3912_v30 }
 0x167   : > { %1007 = vmatmul.f32.gmra.mxu2 %v3935_v49 }
 0x169   : > { %1036 = vmatmul.f32.gmra.mxu3 %v3935_v49 }
 0x16d   : > { %1068 = vmatmul.f32.vlgmr.msrb.gmra.mxu0 %v848_v58  ;;  %1121 = vmatmul.f32.gmra.mxu1 %v3935_v49 }
 0x16f   : > { %1151 = vmatmul.f32.vlgmr.msrb.gmra.mxu2 %v3921_v39 }
 0x171   : > { %1183 = vmatmul.f32.vlgmr.msrb.gmra.mxu3 %v3933_v48 }
 0x175   : > { %1076 = vmatmul.f32.gmra.mxu0 %v856_v18  ;;  %1251 = vmatmul.f32.vlgmr.msra.gmra.mxu1 %v3912_v30 }
 0x177   : > { %1156 = vmatmul.f32.gmra.mxu2 %v3950_v3 }
 0x179   : > { %1189 = vmatmul.f32.gmra.mxu3 %v3967_v13 }
 0x17d   : > { %1222 = vmatmul.f32.vlgmr.msra.gmra.mxu0 %v3912_v30  ;;  %1255 = vmatmul.f32.gmra.mxu1 %v3935_v49 }
 0x185   : > { %1226 = vmatmul.f32.gmra.mxu0 %v3935_v49  ;;  %v3524_v49 = vld [vmem:[%s4229_s9] ss:$0 sm:$0xff] }
 0x1c2   : > { %v697_v60 = vpop.f32.mrf.mxu1 }
 0x1ca   : > { %v656_v2 = vpop.f32.mrf.mxu0  ;;  %v727_v8 = vpop.f32.mrf.mxu2 }
 0x1cb   : > { %v657_v14 = vadd.f32 %v3522_v1, %v656_v2  ;;  %v812_v19 = vpop.f32.mrf.mxu1 }
 0x1cc   : > { %v754_v20 = vpop.f32.mrf.mxu3 }
 0x1cd   : > { %v698_v21 = vadd.f32 %v697_v60, %v657_v14 }
 0x1cf   : > { %v728_v22 = vadd.f32 %v727_v8, %v698_v21 }
 0x1d1   : > { %v755_v23 = vadd.f32 %v754_v20, %v728_v22 }
 0x1d2   : > { %v787_v24 = vpop.f32.mrf.mxu0  ;;  %v850_v25 = vpop.f32.mrf.mxu2 }
 0x1d3   : > { %v788_v26 = vadd.f32 %v787_v24, %v755_v23  ;;  %v965_v28 = vpop.f32.mrf.mxu1  ;;  %v851_v31 = vadd.f32 %v3523_v27, %v850_v25 }
 0x1d4   : > { %v899_v29 = vpop.f32.mrf.mxu3 }
 0x1d5   : > { %v4036_v30 = vadd.f32 %v812_v19, %v788_v26  ;;  %v900_v34 = vadd.f32 %v899_v29, %v851_v31 }
 0x1d7   : > { %1625 = vrot.lane.b32.xlu0 %v4036_v30, %s3699_s22  ;;  %v1262_v43 = vsel %vm1260_vm9, %v4036_v30, 0 }
 0x1d8   : > { %v1288_v48 = vand.u32 4294901760, %v1262_v43 }
 0x1da   : > { %v858_v32 = vpop.f32.mrf.mxu2  ;;  %v933_v33 = vpop.f32.mrf.mxu0  ;;  %v1289_v62 = vsub.f32 %v1262_v43, %v1288_v48 }
 0x1db   : > { %v971_v36 = vpop.f32.mrf.mxu1  ;;  %v934_v37 = vadd.f32 %v933_v33, %v900_v34  ;;  %v859_v38 = vadd.f32 %v3523_v27, %v858_v32 }
 0x1dc   : > { %v903_v35 = vpop.f32.mrf.mxu3  ;;  %v1290_v9 = vand.u32 4294901760, %v1289_v62 }
 0x1dd   : > { %v966_v39 = vadd.f32 %v965_v28, %v934_v37  ;;  %v904_v42 = vadd.f32 %v903_v35, %v859_v38 }
 0x1de   : > { %v1291_v16 = vsub.f32 %v1289_v62, %v1290_v9 }
 0x1e0   : > { %v1292_v59 = vand.u32 4294901760, %v1291_v16 }
 0x1e2   : > { %v938_v40 = vpop.f32.mrf.mxu0  ;;  %v1004_v41 = vpop.f32.mrf.mxu2 }
 0x1e3   : > { %v1005_v11 = vadd.f32 %v1004_v41, %v966_v39  ;;  %v939_v45 = vadd.f32 %v938_v40, %v904_v42  ;;  %v1118_v47 = vpop.f32.mrf.mxu1 }
 0x1e4   : > { %v1033_v44 = vpop.f32.mrf.mxu3 }
 0x1e5   : > { %v4042_v46 = vadd.f32 %v1033_v44, %v1005_v11  ;;  %v972_v50 = vadd.f32 %v971_v36, %v939_v45 }
 0x1e7   : > { %v1265_v52 = vsel %vm1260_vm9, %v4042_v46, 0 }
 0x1e8   : > { %v1286_v3 = vand.u32 4294901760, %v1265_v52 }
 0x1ea   : > { %v1008_v53 = vpop.f32.mrf.mxu2  ;;  %v1069_v56 = vpop.f32.mrf.mxu0  ;;  %v1318_v58 = vsub.f32 %v1265_v52, %v1286_v3 }
 0x1eb   : > { %v1009_v57 = vadd.f32 %v1008_v53, %v972_v50  ;;  %v1070_v61 = vadd.f32 %v3524_v49, %v1069_v56  ;;  %v1122_v12 = vpop.f32.mrf.mxu1 }
 0x1ec   : > { %v1037_v63 = vpop.f32.mrf.mxu3  ;;  %v1319_v54 = vand.u32 4294901760, %v1318_v58 }
 0x1ed   : > { %v1038_v4 = vadd.f32 %v1037_v63, %v1009_v57  ;;  %v1119_v5 = vadd.f32 %v1118_v47, %v1070_v61  ;;  %v603_v63 = vld [vmem:[%s532_s23] sm:$0x1] }
 0x1ee   : > { %v1320_v1 = vsub.f32 %v1318_v58, %v1319_v54  ;;  %vm1259_vm11 = vcmp.eq.f32.partialorder %v603_v63, 0.0 }
 0x1ef   : > { %1629 = vrot.lane.b32.xlu2 %v1038_v4, %s3699_s22  ;;  %v1268_v6 = vsel %vm1260_vm9, %v1038_v4, 0 }
 0x1f0   : > { %v1284_v10 = vand.u32 4294901760, %v1268_v6  ;;  %v1321_v19 = vand.u32 4294901760, %v1320_v1 }
 0x1f2   : > { %v1077_v13 = vpop.f32.mrf.mxu0  ;;  %1285 = vmatpush.xpose.msra.mxu2 %v1284_v10  ;;  %1369 = vmatpush.xpose.msrb.mxu1 %v1284_v10  ;;  %v1312_v15 = vsub.f32 %v1268_v6, %v1284_v10  ;;  %v1152_v51 = vpop.f32.mrf.mxu2 }
 0x1f3   : > { %v1153_v0 = vadd.f32 %v1152_v51, %v1119_v5  ;;  %v1252_v8 = vpop.f32.mrf.mxu1  ;;  %v1078_v21 = vadd.f32 %v3524_v49, %v1077_v13 }
 0x1f4   : > { %1344 = vmatpush.xpose.msrb.mxu0 %v1312_v15  ;;  %v1313_v17 = vand.u32 4294901760, %v1312_v15  ;;  %v1184_v7 = vpop.f32.mrf.mxu3 }
 0x1f5   : > { %v1185_v18 = vadd.f32 %v1184_v7, %v1153_v0  ;;  %v1123_v22 = vadd.f32 %v1122_v12, %v1078_v21 }
 0x1f6   : > { %1287 = vmatpush.xpose.msra.mxu2 %v1286_v3  ;;  %1371 = vmatpush.xpose.msrb.mxu1 %v1286_v3  ;;  %v1314_v55 = vsub.f32 %v1312_v15, %v1313_v17 }
 0x1f7   : > { %1627 = vrot.lane.b32.xlu2 %v4042_v46, %s3699_s22 }
 0x1f8   : > { %1347 = vmatpush.xpose.msrb.mxu0 %v1318_v58  ;;  %v1315_v60 = vand.u32 4294901760, %v1314_v55 }
 0x1f9   : > { %1293 = vmatmul.f32.vlgmr.msra.gmra.mxu2 %v1292_v59  ;;  %1375 = vmatmul.f32.vlgmr.msrb.gmra.mxu1 %v1290_v9  ;;  %v3702_v9 = vmov 0  }
 0x1fa   : > { %1396 = vmatpush.xpose.msrb.mxu2 %v1313_v17  ;;  %v1223_v2 = vpop.f32.mrf.mxu0  ;;  %1316 = vmatpush.xpose.msra.mxu3 %v1315_v60  ;;  %v1157_v23 = vpop.f32.mrf.mxu2 }
 0x1fb   : > { %v1224_v14 = vadd.f32 %v1223_v2, %v1185_v18  ;;  %1350 = vmatmul.f32.vlgmr.msrb.gmra.mxu0 %v1289_v62  ;;  %v1158_v24 = vadd.f32 %v1157_v23, %v1123_v22  ;;  %v1256_v29 = vpop.f32.mrf.mxu1 }
 0x1fc   : > { %v1190_v25 = vpop.f32.mrf.mxu3 }
 0x1fd   : > { %v4053_v20 = vadd.f32 %v1252_v8, %v1224_v14  ;;  %v1191_v26 = vadd.f32 %v1190_v25, %v1158_v24 }
 0x1fe   : > { %1400 = vmatpush.xpose.msrb.mxu2 %v1319_v54  ;;  %1322 = vmatpush.xpose.msra.mxu3 %v1321_v19 }
 0x1ff   : > { %1823 = vrot.lane.b32.xlu0 %v4053_v20, %s3699_s22  ;;  %v1482_v35 = vand.u32 4294901760, %v4053_v20 }
 0x201   : > { %1324 = vmatmul.f32.vlgmr.msra.gmra.mxu3 %v1288_v48  ;;  %1402 = vmatmul.f32.vlgmr.msrb.gmra.mxu2 %v1288_v48  ;;  %v1514_v36 = vsub.f32 %v4053_v20, %v1482_v35 }
 0x202   : > { %1421 = vmatpush.xpose.msrb.mxu3 %v1284_v10  ;;  %v1227_v27 = vpop.f32.mrf.mxu0  ;;  %v1430_v10 = vsel %vm1259_vm11, 1, %v3702_v9 }
 0x203   : > { %v1228_v28 = vadd.f32 %v1227_v27, %v1191_v26  ;;  %v1515_v11 = vand.u32 4294901760, %v1514_v36  ;;  %v1431_v15 = vperm.slane %v1430_v10, 0 }
 0x205   : > { %v4060_v31 = vadd.f32 %v1256_v29, %v1228_v28  ;;  %v1516_v45 = vsub.f32 %v1514_v36, %v1515_v11  ;;  %vm4099_vm12 = vcmp.eq.s32.totalorder %v1431_v15, 1 }
 0x206   : > { %1423 = vmatpush.xpose.msrb.mxu3 %v1286_v3 }
 0x207   : > { %2294 = vrot.lane.b32.xlu0 %v1038_v4, %s3700_s16  ;;  %v1464_v32 = vsel %vm1462_vm10, %v4060_v31, 0 }
 0x208   : > { %v1480_v33 = vand.u32 4294901760, %v1464_v32 }
 0x209   : > { %1425 = vmatmul.f32.vlgmr.msrb.gmra.mxu3 %v1288_v48  ;;  %v1517_v48 = vand.u32 4294901760, %v1516_v45 }
 0x20a   : > { %v1508_v34 = vsub.f32 %v1464_v32, %v1480_v33  ;;  %1565 = vmatpush.msra.mxu3 %v1480_v33  ;;  %1481 = vmatpush.msra.mxu0 %v1480_v33 }
 0x20c   : > { %1540 = vmatpush.msra.mxu2 %v1508_v34  ;;  %1567 = vmatpush.msra.mxu3 %v1482_v35  ;;  %v1509_v40 = vand.u32 4294901760, %v1508_v34 }
 0x20d   : > { %1483 = vmatpush.msra.mxu0 %v1482_v35 }
 0x20e   : > { %1543 = vmatpush.msra.mxu2 %v1514_v36  ;;  %v1510_v42 = vsub.f32 %v1508_v34, %v1509_v40 }
 0x20f   : > { %2290 = vrot.lane.b32.xlu0 %v4036_v30, %s3700_s16  ;;  %1592 = vmatpush.msrb.mxu0 %v1509_v40 }
 0x210   : > { %v1511_v44 = vand.u32 4294901760, %v1510_v42 }
 0x211   : > { %1596 = vmatpush.msrb.mxu0 %v1515_v11 }
 0x212   : > { %1512 = vmatpush.msra.mxu1 %v1511_v44 }
 0x214   : > { %1518 = vmatpush.msra.mxu1 %v1517_v48 }
 0x216   : > { %1617 = vmatpush.msrb.mxu1 %v1480_v33 }
 0x217   : > { %2489 = vrot.lane.b32.xlu0 %v4060_v31, %s3700_s16 }
 0x218   : > { %1619 = vmatpush.msrb.mxu1 %v1482_v35 }
 0x21f   : > { %2810 = vrot.lane.b32.xlu0 %v1038_v4, %s3701_s18 }
 0x227   : > { %2808 = vrot.lane.b32.xlu0 %v4042_v46, %s3701_s18 }
 0x22f   : > { %2806 = vrot.lane.b32.xlu0 %v4036_v30, %s3701_s18 }
 0x249   : > { %v1630_v37 = vpop.permute.xlu2 %1629  ;;  %v1626_v21 = vpop.permute.xlu0 %1625 }
 0x24a   : > { %v1635_v38 = vsel %vm1260_vm9, %v1630_v37, 0  ;;  %v1631_v24 = vsel %vm1260_vm9, %v1626_v21, 0 }
 0x24b   : > { %v4074_v39 = vand.u32 4294901760, %v1635_v38  ;;  %v1655_v28 = vand.u32 4294901760, %v1631_v24 }
 0x24d   : > { %v4077_v41 = vsub.f32 %v1635_v38, %v4074_v39  ;;  %1652 = vmatpush.xpose.msrb.mxu2 %v4074_v39  ;;  %v1656_v35 = vsub.f32 %v1631_v24, %v1655_v28 }
 0x24f   : > { %v1680_v43 = vand.u32 4294901760, %v4077_v41  ;;  %v1657_v38 = vand.u32 4294901760, %v1656_v35 }
 0x251   : > { %v1681_v30 = vsub.f32 %v4077_v41, %v1680_v43  ;;  %v1628_v47 = vpop.permute.xlu2 %1627  ;;  %v1658_v11 = vsub.f32 %v1656_v35, %v1657_v38 }
 0x252   : > { %v1633_v49 = vsel %vm1260_vm9, %v1628_v47, 0 }
 0x253   : > { %v1682_v50 = vand.u32 4294901760, %v1681_v30  ;;  %v4085_v52 = vand.u32 4294901760, %v1633_v49  ;;  %v1659_v30 = vand.u32 4294901760, %v1658_v11 }
 0x255   : > { %v4088_v53 = vsub.f32 %v1633_v49, %v4085_v52  ;;  %1654 = vmatpush.xpose.msrb.mxu2 %v4085_v52  ;;  %1683 = vmatpush.xpose.msrb.mxu3 %v1682_v50 }
 0x257   : > { %v1686_v56 = vand.u32 4294901760, %v4088_v53 }
 0x259   : > { %v1687_v57 = vsub.f32 %v4088_v53, %v1686_v56 }
 0x25b   : > { %v1688_v61 = vand.u32 4294901760, %v1687_v57 }
 0x25d   : > { %1689 = vmatpush.xpose.msrb.mxu3 %v1688_v61 }
 0x276   : > { %v1376_v12 = vpop.f32.mrf.mxu1 }
 0x278   : > { %v1351_v5 = vpop.f32.mrf.mxu0 }
 0x27c   : > { %v1294_v62 = vpop.f32.mrf.mxu2 }
 0x284   : > { %v1325_v3 = vpop.f32.mrf.mxu3  ;;  %v1403_v13 = vpop.f32.mrf.mxu2 }
 0x285   : > { %v1326_v4 = vadd.f32 %v1325_v3, %v1294_v62 }
 0x287   : > { %v1352_v6 = vadd.f32 %v1351_v5, %v1326_v4 }
 0x289   : > { %v1377_v58 = vadd.f32 %v1376_v12, %v1352_v6 }
 0x28b   : > { %v1404_v51 = vadd.f32 %v1403_v13, %v1377_v58 }
 0x28c   : > { %v1426_v0 = vpop.f32.mrf.mxu3 }
 0x28d   : > { %v1427_v16 = vadd.f32 %v1426_v0, %v1404_v51 }
 0x28f   : > { %v1429_v7 = vmul.f32 0.35355338, %v1427_v16 }
 0x291   : > { %v1433_v54 = vsel %vm4099_vm12, -1e+09, %v1429_v7 }
 0x292   : > { %v1435_v55 = vsel %vm1434_vm13, %v1433_v54, -inf }
 0x293   : > { %1436 = vmax.xlane.f32.xlu1 %v1435_v55 }
 0x306   : > { %v1437_v18 = vpop.xlane.xlu1 %1436 }
 0x307   : > { %v1438_v59 = vsub.f32 %v1433_v54, %v1437_v18  ;;  %v1824_v18 = vpop.permute.xlu0 %1823 }
 0x309   : > { %v1439_v60 = vmul.f32 1.442695, %v1438_v59  ;;  %v1849_v59 = vand.u32 4294901760, %v1824_v18 }
 0x30b   : > { %3534 = vpow2.f32 %v1439_v60  ;;  %v1881_v60 = vsub.f32 %v1824_v18, %v1849_v59 }
 0x311   : > { %v3535_v1 = vpop.eup %3534 }
 0x312   : > { %v1441_v2 = vsel %vm1434_vm13, %v3535_v1, 0.0 }
 0x313   : > { %1442 = vadd.xlane.f32.xlu1 %v1441_v2 }
 0x386   : > { %v1443_v8 = vpop.xlane.xlu1 %1442 }
 0x387   : > { %3536 = vrcp.f32 %v1443_v8  ;;  %v1455_v23 = vand.u32 2147483648, %v1443_v8  ;;  %v1453_v26 = vand.u32 2147483647, %v1443_v8  ;;  %vm1449_vm15 = vweird.f32 %v1443_v8 }
 0x389   : > { %v1456_v29 = vor.u32 1.1754944e-38, %v1455_v23  ;;  %vm1454_vm2 = vcmp.eq.f32.partialorder %v1453_v26, 8.507059e+37 }
 0x38d   : > { %v3537_v14 = vpop.eup %3536 }
 0x38e   : > { %v1445_v19 = vmul.f32 %v3537_v14, %v1443_v8  ;;  %vm1450_vm14 = vweird.f32 %v3537_v14 }
 0x38f   : > { %vm1451_vm1 = vmor %vm1449_vm15, %vm1450_vm14 }
 0x390   : > { %v1446_v22 = vsub.f32 1.0, %v1445_v19  ;;  %v1882_v19 = vand.u32 4294901760, %v1881_v60 }
 0x392   : > { %v1447_v25 = vmul.f32 %v3537_v14, %v1446_v22  ;;  %v1883_v22 = vsub.f32 %v1881_v60, %v1882_v19 }
 0x394   : > { %v1448_v27 = vadd.f32 %v3537_v14, %v1447_v25  ;;  %v1884_v24 = vand.u32 4294901760, %v1883_v22 }
 0x396   : > { %v1452_v32 = vsel %vm1451_vm1, %v3537_v14, %v1448_v27 }
 0x397   : > { %v1457_v33 = vsel %vm1454_vm2, %v1456_v29, %v1452_v32 }
 0x398   : > { %v1458_v34 = vmul.f32 %v3535_v1, %v1457_v33 }
 0x39a   : > { %v1460_v36 = vsel %vm1434_vm13, %v1458_v34, 0 }
 0x39b   : > { %v1484_v37 = vand.u32 4294901760, %v1460_v36 }
 0x39d   : > { %1520 = vmatmul.f32.vlgmr.msra.gmra.mxu1 %v1484_v37  ;;  %v1485_v40 = vsub.f32 %v1460_v36, %v1484_v37 }
 0x39e   : > { %1736 = vmatpush.xpose.msra.mxu1 %v4074_v39 }
 0x39f   : > { %1546 = vmatmul.f32.vlgmr.msra.gmra.mxu2 %v1485_v40  ;;  %v1486_v42 = vand.u32 4294901760, %v1485_v40 }
 0x3a0   : > { %1763 = vmatpush.xpose.msra.mxu2 %v1680_v43 }
 0x3a1   : > { %1571 = vmatmul.f32.vlgmr.msra.gmra.mxu3 %v1486_v42  ;;  %v1487_v44 = vsub.f32 %v1485_v40, %v1486_v42 }
 0x3a2   : > { %1738 = vmatpush.xpose.msra.mxu1 %v4085_v52  ;;  %1788 = vmatpush.xpose.msra.mxu3 %v4074_v39 }
 0x3a3   : > { %v1488_v45 = vand.u32 4294901760, %v1487_v44 }
 0x3a4   : > { %1767 = vmatpush.xpose.msra.mxu2 %v1686_v56 }
 0x3a5   : > { %1489 = vmatmul.f32.vlgmr.msra.gmra.mxu0 %v1488_v45  ;;  %1621 = vmatmul.f32.vlgmr.msrb.gmra.mxu1 %v1484_v37 }
 0x3a6   : > { %1711 = vmatpush.xpose.msra.mxu0 %v4077_v41  ;;  %1790 = vmatpush.xpose.msra.mxu3 %v4085_v52 }
 0x3a7   : > { %1660 = vmatmul.f32.vlgmr.msrb.gmra.mxu2 %v1659_v30 }
 0x3a9   : > { %1691 = vmatmul.f32.vlgmr.msrb.gmra.mxu3 %v1655_v28 }
 0x3aa   : > { %1714 = vmatpush.xpose.msra.mxu0 %v4088_v53 }
 0x3ad   : > { %1598 = vmatmul.f32.vlgmr.msrb.gmra.mxu0 %v1484_v37  ;;  %1742 = vmatmul.f32.vlgmr.msra.gmra.mxu1 %v1657_v38 }
 0x3af   : > { %1769 = vmatmul.f32.vlgmr.msra.gmra.mxu2 %v1655_v28 }
 0x3b1   : > { %1792 = vmatmul.f32.vlgmr.msra.gmra.mxu3 %v1655_v28 }
 0x3b5   : > { %1717 = vmatmul.f32.vlgmr.msra.gmra.mxu0 %v1656_v35 }
 0x41a   : > { %v1521_v39 = vpop.f32.mrf.mxu1 }
 0x422   : > { %v1490_v43 = vpop.f32.mrf.mxu0  ;;  %v1547_v47 = vpop.f32.mrf.mxu2 }
 0x423   : > { %v1522_v48 = vadd.f32 %v1521_v39, %v1490_v43  ;;  %v1622_v57 = vpop.f32.mrf.mxu1  ;;  %v620_v39 = vld [vmem:[#allocation7 + $0x8] sm:$0xff] }
 0x424   : > { %v1572_v49 = vpop.f32.mrf.mxu3  ;;  %v2010_v43 = vand.u32 4294901760, %v620_v39 }
 0x425   : > { %v1548_v50 = vadd.f32 %v1547_v47, %v1522_v48 }
 0x426   : > { %v2037_v47 = vsub.f32 %v620_v39, %v2010_v43 }
 0x427   : > { %v1573_v56 = vadd.f32 %v1572_v49, %v1548_v50 }
 0x428   : > { %v2038_v48 = vand.u32 4294901760, %v2037_v47 }
 0x42a   : > { %v1599_v41 = vpop.f32.mrf.mxu0  ;;  %v1661_v52 = vpop.f32.mrf.mxu2  ;;  %v2039_v49 = vsub.f32 %v2037_v47, %v2038_v48 }
 0x42b   : > { %v1600_v61 = vadd.f32 %v1599_v41, %v1573_v56  ;;  %v1743_v5 = vpop.f32.mrf.mxu1  ;;  %v619_v56 = vld [vmem:[#allocation7] sm:$0xff] }
 0x42c   : > { %v1692_v63 = vpop.f32.mrf.mxu3  ;;  %v2040_v50 = vand.u32 4294901760, %v2039_v49 }
 0x42d   : > { %v4119_v62 = vadd.f32 %v1622_v57, %v1600_v61  ;;  %v1693_v53 = vadd.f32 %v1692_v63, %v1661_v52  ;;  %v2159_v57 = vand.u32 4294901760, %v619_v56 }
 0x42f   : > { %v2186_v41 = vsub.f32 %v619_v56, %v2159_v57 }
 0x431   : > { %v2187_v61 = vand.u32 4294901760, %v2186_v41 }
 0x432   : > { %v1718_v3 = vpop.f32.mrf.mxu0  ;;  %v1770_v9 = vpop.f32.mrf.mxu2 }
 0x433   : > { %v1719_v4 = vadd.f32 %v1718_v3, %v1693_v53  ;;  %v2188_v52 = vsub.f32 %v2186_v41, %v2187_v61  ;;  %v2295_v53 = vpop.permute.xlu0 %2294 }
 0x434   : > { %v1793_v12 = vpop.f32.mrf.mxu3 }
 0x435   : > { %v1744_v6 = vadd.f32 %v1743_v5, %v1719_v4  ;;  %v2189_v63 = vand.u32 4294901760, %v2188_v52 }
 0x437   : > { %v1771_v10 = vadd.f32 %v1770_v9, %v1744_v6 }
 0x439   : > { %v1794_v58 = vadd.f32 %v1793_v12, %v1771_v10  ;;  %v2300_v10 = vsel %vm1260_vm9, %v2295_v53, 0 }
 0x43b   : > { %v1796_v13 = vmul.f32 0.35355338, %v1794_v58  ;;  %v2291_v12 = vpop.permute.xlu0 %2290  ;;  %v2142_v58 = vsel %vm1260_vm9, %v4119_v62, 0 }
 0x43d   : > { %v1797_v15 = vsel %vm4099_vm12, -1e+09, %v1796_v13 }
 0x43e   : > { %v1798_v51 = vsel %vm1434_vm13, %v1797_v15, -inf }
 0x43f   : > { %1799 = vmax.xlane.f32.xlu1 %v1798_v51  ;;  %v2316_v51 = vand.u32 4294901760, %v2300_v10 }
 0x458   : > { %1825 = vrot.lane.b32.xlu1 %v4060_v31, %s3699_s22 }
 0x460   : > { %2292 = vrot.lane.b32.xlu1 %v4042_v46, %s3700_s16 }
 0x4b2   : > { %v1800_v0 = vpop.xlane.xlu1 %1799 }
 0x4b3   : > { %v1801_v16 = vsub.f32 %v1797_v15, %v1800_v0 }
 0x4b5   : > { %v1802_v7 = vmul.f32 1.442695, %v1801_v16  ;;  %v2161_v16 = vand.u32 4294901760, %v2142_v58 }
 0x4b7   : > { %3538 = vpow2.f32 %v1802_v7 }
 0x4bd   : > { %v3539_v54 = vpop.eup %3538 }
 0x4be   : > { %v1804_v55 = vsel %vm1434_vm13, %v3539_v54, 0.0 }
 0x4bf   : > { %1805 = vadd.xlane.f32.xlu2 %v1804_v55 }
 0x4ca   : > { %v1826_v1 = vpop.permute.xlu1 %1825 }
 0x4cb   : > { %v1831_v2 = vsel %vm1462_vm10, %v1826_v1, 0 }
 0x4cc   : > { %v1847_v8 = vand.u32 4294901760, %v1831_v2 }
 0x4ce   : > { %v1875_v14 = vsub.f32 %v1831_v2, %v1847_v8  ;;  %1848 = vmatpush.msrb.mxu0 %v1847_v8  ;;  %1932 = vmatpush.msrb.mxu3 %v1847_v8  ;;  %v2162_v2 = vsub.f32 %v2142_v58, %v2161_v16 }
 0x4d0   : > { %v1876_v46 = vand.u32 4294901760, %v1875_v14  ;;  %1850 = vmatpush.msrb.mxu0 %v1849_v59  ;;  %1907 = vmatpush.msrb.mxu2 %v1875_v14 }
 0x4d1   : > { %1934 = vmatpush.msrb.mxu3 %v1849_v59 }
 0x4d2   : > { %v1877_v21 = vsub.f32 %v1875_v14, %v1876_v46  ;;  %1910 = vmatpush.msrb.mxu2 %v1881_v60  ;;  %1959 = vmatpush.msra.mxu0 %v1876_v46  ;;  %v2293_v13 = vpop.permute.xlu1 %2292  ;;  %v2490_v46 = vpop.permute.xlu0 %2489 }
 0x4d3   : > { %2041 = vmatpush.msra.mxu3 %v2040_v50  ;;  %v2298_v7 = vsel %vm1260_vm9, %v2293_v13, 0 }
 0x4d4   : > { %v1878_v23 = vand.u32 4294901760, %v1877_v21  ;;  %1963 = vmatpush.msra.mxu0 %v1882_v19  ;;  %2011 = vmatpush.msra.mxu2 %v2010_v43  ;;  %v2318_v60 = vand.u32 4294901760, %v2298_v7  ;;  %v2495_v21 = vsel %vm1462_vm10, %v2490_v46, 0 }
 0x4d6   : > { %1879 = vmatpush.msrb.mxu1 %v1878_v23  ;;  %v2350_v62 = vsub.f32 %v2298_v7, %v2318_v60  ;;  %v2163_v23 = vand.u32 4294901760, %v2162_v2 }
 0x4d8   : > { %1885 = vmatpush.msrb.mxu1 %v1884_v24 }
 0x4da   : > { %1984 = vmatpush.msra.mxu1 %v1847_v8 }
 0x4dc   : > { %1986 = vmatpush.msra.mxu1 %v1849_v59  ;;  %v2344_v59 = vsub.f32 %v2300_v10, %v2316_v51 }
 0x4de   : > { %v2345_v19 = vand.u32 4294901760, %v2344_v59 }
 0x532   : > { %v1806_v25 = vpop.xlane.xlu2 %1805 }
 0x533   : > { %3540 = vrcp.f32 %v1806_v25  ;;  %v1818_v29 = vand.u32 2147483648, %v1806_v25  ;;  %v1816_v33 = vand.u32 2147483647, %v1806_v25  ;;  %vm1812_vm4 = vweird.f32 %v1806_v25 }
 0x535   : > { %v1819_v35 = vor.u32 1.1754944e-38, %v1818_v29  ;;  %vm1817_vm6 = vcmp.eq.f32.partialorder %v1816_v33, 8.507059e+37  ;;  %v2164_v29 = vsub.f32 %v2162_v2, %v2163_v23 }
 0x539   : > { %v3541_v26 = vpop.eup %3540 }
 0x53a   : > { %v1808_v27 = vmul.f32 %v3541_v26, %v1806_v25  ;;  %vm1813_vm3 = vweird.f32 %v3541_v26  ;;  %v2346_v25 = vsub.f32 %v2344_v59, %v2345_v19 }
 0x53b   : > { %vm1814_vm5 = vmor %vm1812_vm4, %vm1813_vm3 }
 0x53c   : > { %v1809_v28 = vsub.f32 1.0, %v1808_v27  ;;  %v2351_v27 = vand.u32 4294901760, %v2350_v62  ;;  %v2347_v33 = vand.u32 4294901760, %v2346_v25 }
 0x53e   : > { %v1810_v32 = vmul.f32 %v3541_v26, %v1809_v28 }
 0x540   : > { %v1811_v34 = vadd.f32 %v3541_v26, %v1810_v32 }
 0x542   : > { %v1815_v36 = vsel %vm1814_vm5, %v3541_v26, %v1811_v34  ;;  %v4137_v26 = vand.u32 4294901760, %v2495_v21 }
 0x543   : > { %v1820_v37 = vsel %vm1817_vm6, %v1819_v35, %v1815_v36  ;;  %v2352_v35 = vsub.f32 %v2350_v62, %v2351_v27  ;;  %v2165_v36 = vand.u32 4294901760, %v2164_v29 }
 0x544   : > { %v1821_v38 = vmul.f32 %v3539_v54, %v1820_v37  ;;  %v4140_v34 = vsub.f32 %v2495_v21, %v4137_v26  ;;  %v2296_v37 = vsel %vm1260_vm9, %v2291_v12, 0 }
 0x546   : > { %v1829_v40 = vsel %vm1434_vm13, %v1821_v38, 0  ;;  %v2540_v38 = vand.u32 4294901760, %v4140_v34 }
 0x547   : > { %v1851_v42 = vand.u32 4294901760, %v1829_v40 }
 0x549   : > { %1887 = vmatmul.f32.vlgmr.msrb.gmra.mxu1 %v1851_v42  ;;  %v1852_v11 = vsub.f32 %v1829_v40, %v1851_v42  ;;  %v2353_v40 = vand.u32 4294901760, %v2352_v35  ;;  %v621_v35 = vld [vmem:[#allocation7 + $0x10] sm:$0xff] }
 0x54a   : > { %2087 = vmatpush.msrb.mxu1 %v2010_v43 }
 0x54b   : > { %1913 = vmatmul.f32.vlgmr.msrb.gmra.mxu2 %v1852_v11  ;;  %v1853_v44 = vand.u32 4294901760, %v1852_v11 }
 0x54c   : > { %2113 = vmatpush.msrb.mxu2 %v2038_v48 }
 0x54d   : > { %1938 = vmatmul.f32.vlgmr.msrb.gmra.mxu3 %v1853_v44  ;;  %v1854_v45 = vsub.f32 %v1852_v11, %v1853_v44  ;;  %v2541_v11 = vsub.f32 %v4140_v34, %v2540_v38 }
 0x54e   : > { %2135 = vmatpush.msrb.mxu3 %v2010_v43 }
 0x54f   : > { %v1855_v30 = vand.u32 4294901760, %v1854_v45  ;;  %v2542_v45 = vand.u32 4294901760, %v2541_v11 }
 0x551   : > { %1856 = vmatmul.f32.vlgmr.msrb.gmra.mxu0 %v1855_v30  ;;  %1988 = vmatmul.f32.vlgmr.msra.gmra.mxu1 %v1851_v42 }
 0x552   : > { %2064 = vmatpush.msrb.mxu0 %v2037_v47  ;;  %2190 = vmatpush.msra.mxu1 %v2189_v63 }
 0x559   : > { %1965 = vmatmul.f32.vlgmr.msra.gmra.mxu0 %v1851_v42  ;;  %v2320_v42 = vand.u32 4294901760, %v2296_v37 }
 0x55a   : > { %2160 = vmatpush.msra.mxu0 %v2159_v57 }
 0x55b   : > { %v2321_v44 = vsub.f32 %v2296_v37, %v2320_v42 }
 0x55d   : > { %v2322_v30 = vand.u32 4294901760, %v2321_v44 }
 0x55f   : > { %v2323_v39 = vsub.f32 %v2321_v44, %v2322_v30 }
 0x561   : > { %v2324_v43 = vand.u32 4294901760, %v2323_v39 }
 0x5c6   : > { %v1888_v3 = vpop.f32.mrf.mxu1 }
 0x5ce   : > { %v1857_v4 = vpop.f32.mrf.mxu0  ;;  %v1914_v6 = vpop.f32.mrf.mxu2 }
 0x5cf   : > { %v1889_v5 = vadd.f32 %v1888_v3, %v1857_v4  ;;  %v1989_v18 = vpop.f32.mrf.mxu1 }
 0x5d0   : > { %v1939_v15 = vpop.f32.mrf.mxu3 }
 0x5d1   : > { %v1915_v9 = vadd.f32 %v1914_v6, %v1889_v5 }
 0x5d3   : > { %v1940_v0 = vadd.f32 %v1939_v15, %v1915_v9 }
 0x5d6   : > { %v1966_v54 = vpop.f32.mrf.mxu0 }
 0x5d7   : > { %v1967_v55 = vadd.f32 %v1966_v54, %v1940_v0 }
 0x5d9   : > { %v1990_v1 = vadd.f32 %v1989_v18, %v1967_v55 }
 0x5db   : > { %v1993_v8 = vsel %vm1260_vm9, %v1990_v1, 0 }
 0x5dc   : > { %v2012_v14 = vand.u32 4294901760, %v1993_v8 }
 0x5de   : > { %v2013_v22 = vsub.f32 %v1993_v8, %v2012_v14  ;;  %2043 = vmatmul.f32.vlgmr.msra.gmra.mxu3 %v2012_v14 }
 0x5df   : > { %2236 = vmatpush.msra.mxu3 %v2159_v57 }
 0x5e0   : > { %2067 = vmatmul.f32.vlgmr.msrb.gmra.mxu0 %v2013_v22  ;;  %v2014_v24 = vand.u32 4294901760, %v2013_v22 }
 0x5e1   : > { %2262 = vmatpush.msrb.mxu0 %v2187_v61 }
 0x5e2   : > { %2091 = vmatmul.f32.vlgmr.msrb.gmra.mxu1 %v2014_v24  ;;  %v2015_v28 = vsub.f32 %v2013_v22, %v2014_v24 }
 0x5e3   : > { %2284 = vmatpush.msrb.mxu1 %v2159_v57 }
 0x5e4   : > { %v2016_v32 = vand.u32 4294901760, %v2015_v28  ;;  %v2811_v28 = vpop.permute.xlu0 %2810 }
 0x5e5   : > { %v2816_v37 = vsel %vm1260_vm9, %v2811_v28, 0 }
 0x5e6   : > { %2017 = vmatmul.f32.vlgmr.msra.gmra.mxu2 %v2016_v32  ;;  %2137 = vmatmul.f32.vlgmr.msrb.gmra.mxu3 %v2012_v14  ;;  %v4165_v39 = vand.u32 4294901760, %v2816_v37 }
 0x5e7   : > { %2348 = vmatpush.xpose.msrb.mxu3 %v2347_v33  ;;  %2213 = vmatpush.msra.mxu2 %v2186_v41 }
 0x5e8   : > { %2166 = vmatmul.f32.vlgmr.msra.gmra.mxu0 %v2165_v36 }
 0x5e9   : > { %2376 = vmatpush.xpose.msra.mxu0 %v2344_v59 }
 0x5ea   : > { %2192 = vmatmul.f32.vlgmr.msra.gmra.mxu1 %v2161_v16 }
 0x5eb   : > { %2354 = vmatpush.xpose.msrb.mxu3 %v2353_v40  ;;  %2401 = vmatpush.xpose.msra.mxu1 %v2316_v51 }
 0x5ec   : > { %v2809_v11 = vpop.permute.xlu0 %2808 }
 0x5ed   : > { %2379 = vmatpush.xpose.msra.mxu0 %v2350_v62 }
 0x5ee   : > { %2115 = vmatmul.f32.vlgmr.msrb.gmra.mxu2 %v2012_v14  ;;  %2240 = vmatmul.f32.vlgmr.msra.gmra.mxu3 %v2163_v23 }
 0x5ef   : > { %2317 = vmatpush.xpose.msrb.mxu2 %v2316_v51  ;;  %2403 = vmatpush.xpose.msra.mxu1 %v2318_v60 }
 0x5f0   : > { %2453 = vmatpush.xpose.msra.mxu3 %v2316_v51  ;;  %2264 = vmatmul.f32.vlgmr.msrb.gmra.mxu0 %v2161_v16 }
 0x5f1   : > { %2512 = vmatpush.msrb.mxu0 %v4137_v26 }
 0x5f2   : > { %2286 = vmatmul.f32.vlgmr.msrb.gmra.mxu1 %v2161_v16 }
 0x5f3   : > { %2319 = vmatpush.xpose.msrb.mxu2 %v2318_v60  ;;  %2543 = vmatpush.msrb.mxu1 %v2542_v45 }
 0x5f4   : > { %2455 = vmatpush.xpose.msra.mxu3 %v2318_v60 }
 0x5f6   : > { %2216 = vmatmul.f32.vlgmr.msra.gmra.mxu2 %v2162_v2  ;;  %2356 = vmatmul.f32.vlgmr.msrb.gmra.mxu3 %v2320_v42 }
 0x5f7   : > { %2428 = vmatpush.xpose.msra.mxu2 %v2345_v19 }
 0x5f8   : > { %2596 = vmatpush.msrb.mxu3 %v4137_v26  ;;  %2382 = vmatmul.f32.vlgmr.msra.gmra.mxu0 %v2321_v44 }
 0x5fa   : > { %2407 = vmatmul.f32.vlgmr.msra.gmra.mxu1 %v2322_v30 }
 0x5fb   : > { %2432 = vmatpush.xpose.msra.mxu2 %v2351_v27 }
 0x5fe   : > { %2325 = vmatmul.f32.vlgmr.msrb.gmra.mxu2 %v2324_v43  ;;  %2457 = vmatmul.f32.vlgmr.msra.gmra.mxu3 %v2320_v42 }
 0x5ff   : > { %2571 = vmatpush.msrb.mxu2 %v4140_v34  ;;  %v4169_v34 = vsub.f32 %v2816_v37, %v4165_v39 }
 0x606   : > { %2434 = vmatmul.f32.vlgmr.msra.gmra.mxu2 %v2320_v42 }
 0x65d   : > { %v2068_v48 = vpop.f32.mrf.mxu0 }
 0x65f   : > { %v2092_v49 = vpop.f32.mrf.mxu1 }
 0x661   : > { %v2044_v47 = vpop.f32.mrf.mxu3 }
 0x665   : > { %v2167_v52 = vpop.f32.mrf.mxu0 }
 0x667   : > { %v2193_v3 = vpop.f32.mrf.mxu1 }
 0x669   : > { %v2018_v50 = vpop.f32.mrf.mxu2  ;;  %v2138_v41 = vpop.f32.mrf.mxu3 }
 0x66a   : > { %v2045_v56 = vadd.f32 %v2044_v47, %v2018_v50  ;;  %v2814_v47 = vsel %vm1260_vm9, %v2809_v11, 0 }
 0x66c   : > { %v2069_v57 = vadd.f32 %v2068_v48, %v2045_v56 }
 0x66d   : > { %v2265_v10 = vpop.f32.mrf.mxu0 }
 0x66e   : > { %v2093_v61 = vadd.f32 %v2092_v49, %v2069_v57 }
 0x66f   : > { %v2287_v15 = vpop.f32.mrf.mxu1 }
 0x671   : > { %v2116_v63 = vpop.f32.mrf.mxu2  ;;  %v2241_v6 = vpop.f32.mrf.mxu3 }
 0x672   : > { %v2117_v53 = vadd.f32 %v2116_v63, %v2093_v61  ;;  %v2861_v63 = vand.u32 4294901760, %v4169_v34 }
 0x674   : > { %v2139_v4 = vadd.f32 %v2138_v41, %v2117_v53 }
 0x675   : > { %v2383_v55 = vpop.f32.mrf.mxu0 }
 0x676   : > { %v2168_v5 = vadd.f32 %v2167_v52, %v2139_v4 }
 0x677   : > { %v2408_v59 = vpop.f32.mrf.mxu1 }
 0x678   : > { %v2194_v9 = vadd.f32 %v2193_v3, %v2168_v5  ;;  %v2862_v5 = vsub.f32 %v4169_v34, %v2861_v63 }
 0x679   : > { %v2217_v12 = vpop.f32.mrf.mxu2  ;;  %v2357_v16 = vpop.f32.mrf.mxu3 }
 0x67a   : > { %v2218_v58 = vadd.f32 %v2217_v12, %v2194_v9  ;;  %v2863_v12 = vand.u32 4294901760, %v2862_v5 }
 0x67c   : > { %v2242_v13 = vadd.f32 %v2241_v6, %v2218_v58 }
 0x67e   : > { %v2266_v51 = vadd.f32 %v2265_v10, %v2242_v13 }
 0x680   : > { %v4150_v0 = vadd.f32 %v2287_v15, %v2266_v51 }
 0x681   : > { %v2326_v7 = vpop.f32.mrf.mxu2  ;;  %v2458_v8 = vpop.f32.mrf.mxu3 }
 0x682   : > { %v2358_v54 = vadd.f32 %v2357_v16, %v2326_v7 }
 0x684   : > { %v2384_v18 = vadd.f32 %v2383_v55, %v2358_v54 }
 0x686   : > { %v2409_v60 = vadd.f32 %v2408_v59, %v2384_v18  ;;  %v2807_v59 = vpop.permute.xlu0 %2806 }
 0x689   : > { %v2435_v1 = vpop.f32.mrf.mxu2 }
 0x68a   : > { %v2436_v2 = vadd.f32 %v2435_v1, %v2409_v60 }
 0x68c   : > { %v2459_v14 = vadd.f32 %v2458_v8, %v2436_v2  ;;  %v2812_v2 = vsel %vm1260_vm9, %v2807_v59, 0 }
 0x68e   : > { %v2461_v19 = vmul.f32 0.35355338, %v2459_v14 }
 0x690   : > { %v2462_v46 = vsel %vm4099_vm12, -1e+09, %v2461_v19 }
 0x691   : > { %v2463_v62 = vsel %vm1434_vm13, %v2462_v46, -inf }
 0x692   : > { %2464 = vmax.xlane.f32.xlu1 %v2463_v62  ;;  %v2836_v62 = vand.u32 4294901760, %v2812_v2 }
 0x694   : > { %v2837_v28 = vsub.f32 %v2812_v2, %v2836_v62 }
 0x6ab   : > { %3005 = vrot.lane.b32.xlu1 %v4060_v31, %s3701_s18 }
 0x6b3   : > { %3003 = vrot.lane.b32.xlu1 %v4053_v20, %s3701_s18 }
 0x705   : > { %v2465_v21 = vpop.xlane.xlu1 %2464 }
 0x706   : > { %v2466_v22 = vsub.f32 %v2462_v46, %v2465_v21 }
 0x708   : > { %v2467_v23 = vmul.f32 1.442695, %v2466_v22 }
 0x70a   : > { %3542 = vpow2.f32 %v2467_v23 }
 0x710   : > { %v3543_v24 = vpop.eup %3542 }
 0x711   : > { %v2469_v25 = vsel %vm1434_vm13, %v3543_v24, 0.0 }
 0x712   : > { %2470 = vadd.xlane.f32.xlu2 %v2469_v25 }
 0x71d   : > { %v3006_v7 = vpop.permute.xlu1 %3005 }
 0x71e   : > { %v3011_v8 = vsel %vm1462_vm10, %v3006_v7, 0 }
 0x71f   : > { %v3027_v21 = vand.u32 4294901760, %v3011_v8 }
 0x725   : > { %v3004_v19 = vpop.permute.xlu1 %3003 }
 0x72a   : > { %2487 = vrot.lane.b32.xlu2 %v4053_v20, %s3700_s16  ;;  %v2674_v20 = vand.u32 4294901760, %v621_v35 }
 0x72c   : > { %v2701_v9 = vsub.f32 %v621_v35, %v2674_v20  ;;  %v2838_v35 = vand.u32 4294901760, %v2837_v28 }
 0x72e   : > { %v2702_v15 = vand.u32 4294901760, %v2701_v9  ;;  %v2839_v11 = vsub.f32 %v2837_v28, %v2838_v35 }
 0x730   : > { %v2703_v51 = vsub.f32 %v2701_v9, %v2702_v15 }
 0x732   : > { %v2704_v16 = vand.u32 4294901760, %v2703_v51 }
 0x785   : > { %v2471_v27 = vpop.xlane.xlu2 %2470 }
 0x786   : > { %3544 = vrcp.f32 %v2471_v27  ;;  %v2483_v40 = vand.u32 2147483648, %v2471_v27  ;;  %v2481_v45 = vand.u32 2147483647, %v2471_v27  ;;  %vm2477_vm8 = vweird.f32 %v2471_v27 }
 0x788   : > { %v2484_v48 = vor.u32 1.1754944e-38, %v2483_v40  ;;  %vm2482_vm14 = vcmp.eq.f32.partialorder %v2481_v45, 8.507059e+37 }
 0x78c   : > { %v3545_v29 = vpop.eup %3544 }
 0x78d   : > { %v2473_v32 = vmul.f32 %v3545_v29, %v2471_v27  ;;  %v2488_v31 = vpop.permute.xlu2 %2487  ;;  %vm2478_vm7 = vweird.f32 %v3545_v29 }
 0x78e   : > { %v2513_v33 = vand.u32 4294901760, %v2488_v31  ;;  %vm2479_vm11 = vmor %vm2477_vm8, %vm2478_vm7 }
 0x78f   : > { %v2474_v36 = vsub.f32 1.0, %v2473_v32 }
 0x790   : > { %v2545_v42 = vsub.f32 %v2488_v31, %v2513_v33  ;;  %2514 = vmatpush.msrb.mxu0 %v2513_v33  ;;  %2598 = vmatpush.msrb.mxu3 %v2513_v33 }
 0x791   : > { %v2475_v44 = vmul.f32 %v3545_v29, %v2474_v36 }
 0x792   : > { %2623 = vmatpush.msra.mxu0 %v2540_v38  ;;  %2574 = vmatpush.msrb.mxu2 %v2545_v42  ;;  %v2546_v30 = vand.u32 4294901760, %v2545_v42  ;;  %v4171_v38 = vand.u32 4294901760, %v2814_v47 }
 0x793   : > { %v2476_v43 = vadd.f32 %v3545_v29, %v2475_v44  ;;  %2705 = vmatpush.msra.mxu3 %v2704_v16 }
 0x794   : > { %2675 = vmatpush.msra.mxu2 %v2674_v20  ;;  %2627 = vmatpush.msra.mxu0 %v2546_v30  ;;  %v2547_v49 = vsub.f32 %v2545_v42, %v2546_v30  ;;  %v4177_v53 = vsub.f32 %v2814_v47, %v4171_v38 }
 0x795   : > { %v2480_v50 = vsel %vm2479_vm11, %v3545_v29, %v2476_v43  ;;  %v3055_v29 = vsub.f32 %v3011_v8, %v3027_v21  ;;  %v2840_v43 = vand.u32 4294901760, %v2839_v11 }
 0x796   : > { %v2485_v56 = vsel %vm2482_vm14, %v2484_v48, %v2480_v50  ;;  %v2548_v57 = vand.u32 4294901760, %v2547_v49  ;;  %v2867_v6 = vand.u32 4294901760, %v4177_v53 }
 0x797   : > { %v2486_v41 = vmul.f32 %v3543_v24, %v2485_v56  ;;  %v3029_v24 = vand.u32 4294901760, %v3004_v19  ;;  %v3056_v36 = vand.u32 4294901760, %v3055_v29 }
 0x798   : > { %2549 = vmatpush.msrb.mxu1 %v2548_v57  ;;  %v2868_v58 = vsub.f32 %v4177_v53, %v2867_v6 }
 0x799   : > { %v2493_v61 = vsel %vm1434_vm13, %v2486_v41, 0  ;;  %v3061_v31 = vsub.f32 %v3004_v19, %v3029_v24  ;;  %v3057_v44 = vsub.f32 %v3055_v29, %v3056_v36 }
 0x79a   : > { %2648 = vmatpush.msra.mxu1 %v4137_v26  ;;  %v2515_v52 = vand.u32 4294901760, %v2493_v61  ;;  %v2869_v13 = vand.u32 4294901760, %v2868_v58 }
 0x79b   : > { %v3062_v40 = vand.u32 4294901760, %v3061_v31  ;;  %v3058_v47 = vand.u32 4294901760, %v3057_v44 }
 0x79c   : > { %2650 = vmatpush.msra.mxu1 %v2513_v33  ;;  %v2516_v3 = vsub.f32 %v2493_v61, %v2515_v52 }
 0x79d   : > { %2551 = vmatmul.f32.vlgmr.msrb.gmra.mxu1 %v2515_v52  ;;  %v3063_v30 = vsub.f32 %v3061_v31, %v3062_v40 }
 0x79e   : > { %2751 = vmatpush.msrb.mxu1 %v2674_v20  ;;  %2577 = vmatmul.f32.vlgmr.msrb.gmra.mxu2 %v2516_v3  ;;  %v2517_v4 = vand.u32 4294901760, %v2516_v3 }
 0x79f   : > { %2777 = vmatpush.msrb.mxu2 %v2702_v15  ;;  %v3064_v48 = vand.u32 4294901760, %v3063_v30 }
 0x7a0   : > { %2602 = vmatmul.f32.vlgmr.msrb.gmra.mxu3 %v2517_v4  ;;  %v2518_v26 = vsub.f32 %v2516_v3, %v2517_v4 }
 0x7a1   : > { %2799 = vmatpush.msrb.mxu3 %v2674_v20 }
 0x7a2   : > { %v2519_v10 = vand.u32 4294901760, %v2518_v26 }
 0x7a4   : > { %2520 = vmatmul.f32.vlgmr.msrb.gmra.mxu0 %v2519_v10 }
 0x7a5   : > { %2652 = vmatmul.f32.vlgmr.msra.gmra.mxu1 %v2515_v52  ;;  %2728 = vmatpush.msrb.mxu0 %v2701_v9 }
 0x7a6   : > { %2864 = vmatpush.xpose.msra.mxu1 %v2863_v12 }
 0x7aa   : > { %2870 = vmatpush.xpose.msra.mxu1 %v2869_v13 }
 0x7ac   : > { %2629 = vmatmul.f32.vlgmr.msra.gmra.mxu0 %v2515_v52 }
 0x7ad   : > { %2833 = vmatpush.xpose.msra.mxu0 %v4165_v39 }
 0x7b1   : > { %2835 = vmatpush.xpose.msra.mxu0 %v4171_v38 }
 0x81a   : > { %v2552_v54 = vpop.f32.mrf.mxu1 }
 0x821   : > { %v2521_v55 = vpop.f32.mrf.mxu0  ;;  %v2578_v60 = vpop.f32.mrf.mxu2 }
 0x822   : > { %v2553_v18 = vadd.f32 %v2552_v54, %v2521_v55  ;;  %v2653_v25 = vpop.f32.mrf.mxu1 }
 0x823   : > { %v2603_v14 = vpop.f32.mrf.mxu3 }
 0x824   : > { %v2579_v1 = vadd.f32 %v2578_v60, %v2553_v18 }
 0x826   : > { %v2604_v46 = vadd.f32 %v2603_v14, %v2579_v1 }
 0x829   : > { %v2630_v22 = vpop.f32.mrf.mxu0 }
 0x82a   : > { %v2631_v23 = vadd.f32 %v2630_v22, %v2604_v46 }
 0x82c   : > { %v2654_v27 = vadd.f32 %v2653_v25, %v2631_v23 }
 0x82e   : > { %v2657_v32 = vsel %vm1260_vm9, %v2654_v27, 0 }
 0x82f   : > { %v2676_v33 = vand.u32 4294901760, %v2657_v32 }
 0x831   : > { %v2677_v37 = vsub.f32 %v2657_v32, %v2676_v33  ;;  %2707 = vmatmul.f32.vlgmr.msra.gmra.mxu3 %v2676_v33 }
 0x832   : > { %2917 = vmatpush.xpose.msra.mxu3 %v4165_v39 }
 0x833   : > { %2731 = vmatmul.f32.vlgmr.msrb.gmra.mxu0 %v2677_v37  ;;  %v2678_v42 = vand.u32 4294901760, %v2677_v37 }
 0x834   : > { %2944 = vmatpush.xpose.msrb.mxu0 %v2861_v63 }
 0x835   : > { %2755 = vmatmul.f32.vlgmr.msrb.gmra.mxu1 %v2678_v42  ;;  %v2679_v45 = vsub.f32 %v2677_v37, %v2678_v42 }
 0x836   : > { %2919 = vmatpush.xpose.msra.mxu3 %v4171_v38  ;;  %2969 = vmatpush.xpose.msrb.mxu1 %v4165_v39 }
 0x837   : > { %v2680_v20 = vand.u32 4294901760, %v2679_v45 }
 0x838   : > { %2948 = vmatpush.xpose.msrb.mxu0 %v2867_v6 }
 0x839   : > { %2681 = vmatmul.f32.vlgmr.msra.gmra.mxu2 %v2680_v20  ;;  %2801 = vmatmul.f32.vlgmr.msrb.gmra.mxu3 %v2676_v33 }
 0x83a   : > { %2892 = vmatpush.xpose.msra.mxu2 %v4169_v34  ;;  %2971 = vmatpush.xpose.msrb.mxu1 %v4171_v38 }
 0x83b   : > { %3059 = vmatpush.msrb.mxu3 %v3058_v47  ;;  %2841 = vmatmul.f32.vlgmr.msra.gmra.mxu0 %v2840_v43 }
 0x83c   : > { %3087 = vmatpush.msra.mxu0 %v3055_v29 }
 0x83d   : > { %3065 = vmatpush.msrb.mxu3 %v3064_v48  ;;  %2872 = vmatmul.f32.vlgmr.msra.gmra.mxu1 %v2836_v62 }
 0x83e   : > { %2895 = vmatpush.xpose.msra.mxu2 %v4177_v53  ;;  %3090 = vmatpush.msra.mxu0 %v3061_v31  ;;  %v622_v31 = vld [vmem:[#allocation7 + $0x18] sm:$0xff] }
 0x83f   : > { %3112 = vmatpush.msra.mxu1 %v3027_v21 }
 0x841   : > { %3114 = vmatpush.msra.mxu1 %v3029_v24  ;;  %2779 = vmatmul.f32.vlgmr.msrb.gmra.mxu2 %v2676_v33  ;;  %v3190_v33 = vand.u32 4294901760, %v622_v31 }
 0x842   : > { %2923 = vmatmul.f32.vlgmr.msra.gmra.mxu3 %v2838_v35  ;;  %3028 = vmatpush.msrb.mxu2 %v3027_v21 }
 0x843   : > { %3164 = vmatpush.msra.mxu3 %v3027_v21  ;;  %2950 = vmatmul.f32.vlgmr.msrb.gmra.mxu0 %v2836_v62  ;;  %v3217_v35 = vsub.f32 %v622_v31, %v3190_v33 }
 0x844   : > { %3030 = vmatpush.msrb.mxu2 %v3029_v24  ;;  %3191 = vmatpush.msrb.mxu0 %v3190_v33 }
 0x845   : > { %3166 = vmatpush.msra.mxu3 %v3029_v24  ;;  %2973 = vmatmul.f32.vlgmr.msrb.gmra.mxu1 %v2836_v62 }
 0x849   : > { %2898 = vmatmul.f32.vlgmr.msra.gmra.mxu2 %v2837_v28 }
 0x84a   : > { %3139 = vmatpush.msra.mxu2 %v3056_v36  ;;  %v3218_v36 = vand.u32 4294901760, %v3217_v35 }
 0x84c   : > { %3143 = vmatpush.msra.mxu2 %v3062_v40  ;;  %v3219_v37 = vsub.f32 %v3217_v35, %v3218_v36 }
 0x84e   : > { %v3220_v40 = vand.u32 4294901760, %v3219_v37 }
 0x850   : > { %3221 = vmatpush.msrb.mxu1 %v3220_v40 }
 0x8b0   : > { %v2732_v49 = vpop.f32.mrf.mxu0 }
 0x8b2   : > { %v2756_v57 = vpop.f32.mrf.mxu1 }
 0x8b4   : > { %v2708_v39 = vpop.f32.mrf.mxu3 }
 0x8b8   : > { %v2842_v63 = vpop.f32.mrf.mxu0 }
 0x8ba   : > { %v2873_v3 = vpop.f32.mrf.mxu1 }
 0x8bb   : > { %v2874_v5 = vadd.f32 %v2873_v3, %v2842_v63 }
 0x8bc   : > { %v2682_v50 = vpop.f32.mrf.mxu2  ;;  %v2802_v41 = vpop.f32.mrf.mxu3 }
 0x8bd   : > { %v2709_v56 = vadd.f32 %v2708_v39, %v2682_v50 }
 0x8bf   : > { %v2733_v34 = vadd.f32 %v2732_v49, %v2709_v56 }
 0x8c0   : > { %v2951_v12 = vpop.f32.mrf.mxu0 }
 0x8c1   : > { %v2757_v38 = vadd.f32 %v2756_v57, %v2733_v34 }
 0x8c2   : > { %v2974_v13 = vpop.f32.mrf.mxu1 }
 0x8c4   : > { %v2780_v61 = vpop.f32.mrf.mxu2 }
 0x8c5   : > { %v2781_v52 = vadd.f32 %v2780_v61, %v2757_v38  ;;  %v2924_v9 = vpop.f32.mrf.mxu3 }
 0x8c7   : > { %v2803_v53 = vadd.f32 %v2802_v41, %v2781_v52 }
 0x8c9   : > { %v4198_v4 = vadd.f32 %v2803_v53, %v4150_v0 }
 0x8cc   : > { %v2899_v6 = vpop.f32.mrf.mxu2 }
 0x8cd   : > { %v2900_v26 = vadd.f32 %v2899_v6, %v2874_v5 }
 0x8cf   : > { %v2925_v10 = vadd.f32 %v2924_v9, %v2900_v26 }
 0x8d1   : > { %v2952_v58 = vadd.f32 %v2951_v12, %v2925_v10 }
 0x8d3   : > { %v2975_v15 = vadd.f32 %v2974_v13, %v2952_v58  ;;  %v3525_v58 = vld [vmem:[%s4231_s11] ss:$0 sm:$0xff] }
 0x8d5   : > { %v2977_v51 = vmul.f32 0.35355338, %v2975_v15 }
 0x8d7   : > { %v2978_v16 = vsel %vm4099_vm12, -1e+09, %v2977_v51  ;;  %v3550_v51 = vld [vmem:[%s3840_s30] sm:$0xff] }
 0x8d8   : > { %v2979_v7 = vsel %vm1434_vm13, %v2978_v16, -inf }
 0x8d9   : > { %2980 = vmax.xlane.f32.xlu2 %v2979_v7 }
 0x94c   : > { %v2981_v54 = vpop.xlane.xlu2 %2980 }
 0x94d   : > { %v2982_v55 = vsub.f32 %v2978_v16, %v2981_v54 }
 0x94f   : > { %v2983_v0 = vmul.f32 1.442695, %v2982_v55 }
 0x951   : > { %3546 = vpow2.f32 %v2983_v0 }
 0x957   : > { %v3547_v18 = vpop.eup %3546 }
 0x958   : > { %v2985_v59 = vsel %vm1434_vm13, %v3547_v18, 0.0 }
 0x959   : > { %2986 = vadd.xlane.f32.xlu0 %v2985_v59 }
 0x9cc   : > { %v2987_v60 = vpop.xlane.xlu0 %2986 }
 0x9cd   : > { %3548 = vrcp.f32 %v2987_v60  ;;  %v2999_v14 = vand.u32 2147483648, %v2987_v60  ;;  %v2997_v17 = vand.u32 2147483647, %v2987_v60  ;;  %vm2993_vm12 = vweird.f32 %v2987_v60 }
 0x9cf   : > { %v3000_v62 = vor.u32 1.1754944e-38, %v2999_v14  ;;  %vm2998_vm1 = vcmp.eq.f32.partialorder %v2997_v17, 8.507059e+37 }
 0x9d3   : > { %v3549_v1 = vpop.eup %3548 }
 0x9d4   : > { %v2989_v2 = vmul.f32 %v3549_v1, %v2987_v60  ;;  %vm2994_vm10 = vweird.f32 %v3549_v1 }
 0x9d5   : > { %vm2995_vm15 = vmor %vm2993_vm12, %vm2994_vm10 }
 0x9d6   : > { %v2990_v8 = vsub.f32 1.0, %v2989_v2 }
 0x9d8   : > { %v2991_v19 = vmul.f32 %v3549_v1, %v2990_v8 }
 0x9da   : > { %v2992_v46 = vadd.f32 %v3549_v1, %v2991_v19 }
 0x9dc   : > { %v2996_v21 = vsel %vm2995_vm15, %v3549_v1, %v2992_v46 }
 0x9dd   : > { %v3001_v22 = vsel %vm2998_vm1, %v3000_v62, %v2996_v21 }
 0x9de   : > { %v3002_v23 = vmul.f32 %v3547_v18, %v3001_v22 }
 0x9e0   : > { %v3009_v24 = vsel %vm1434_vm13, %v3002_v23, 0 }
 0x9e1   : > { %v3031_v25 = vand.u32 4294901760, %v3009_v24 }
 0x9e3   : > { %3067 = vmatmul.f32.vlgmr.msrb.gmra.mxu3 %v3031_v25  ;;  %v3032_v27 = vsub.f32 %v3009_v24, %v3031_v25 }
 0x9e4   : > { %3267 = vmatpush.msrb.mxu3 %v3190_v33 }
 0x9e5   : > { %3093 = vmatmul.f32.vlgmr.msra.gmra.mxu0 %v3032_v27  ;;  %v3033_v28 = vand.u32 4294901760, %v3032_v27 }
 0x9e6   : > { %3293 = vmatpush.msra.mxu0 %v3218_v36 }
 0x9e7   : > { %3118 = vmatmul.f32.vlgmr.msra.gmra.mxu1 %v3033_v28  ;;  %v3034_v29 = vsub.f32 %v3032_v27, %v3033_v28 }
 0x9e8   : > { %3315 = vmatpush.msra.mxu1 %v3190_v33 }
 0x9e9   : > { %v3035_v32 = vand.u32 4294901760, %v3034_v29 }
 0x9eb   : > { %3036 = vmatmul.f32.vlgmr.msrb.gmra.mxu2 %v3035_v32  ;;  %3168 = vmatmul.f32.vlgmr.msra.gmra.mxu3 %v3031_v25 }
 0x9ec   : > { %3244 = vmatpush.msrb.mxu2 %v3217_v35 }
 0x9f3   : > { %3145 = vmatmul.f32.vlgmr.msra.gmra.mxu2 %v3031_v25 }
 0xa62   : > { %v3094_v45 = vpop.f32.mrf.mxu0 }
 0xa64   : > { %v3119_v30 = vpop.f32.mrf.mxu1 }
 0xa66   : > { %v3068_v42 = vpop.f32.mrf.mxu3 }
 0xa6e   : > { %v3037_v11 = vpop.f32.mrf.mxu2  ;;  %v3169_v39 = vpop.f32.mrf.mxu3 }
 0xa6f   : > { %v3069_v44 = vadd.f32 %v3068_v42, %v3037_v11 }
 0xa71   : > { %v3095_v20 = vadd.f32 %v3094_v45, %v3069_v44 }
 0xa73   : > { %v3120_v43 = vadd.f32 %v3119_v30, %v3095_v20 }
 0xa76   : > { %v3146_v47 = vpop.f32.mrf.mxu2 }
 0xa77   : > { %v3147_v48 = vadd.f32 %v3146_v47, %v3120_v43 }
 0xa79   : > { %v3170_v49 = vadd.f32 %v3169_v39, %v3147_v48 }
 0xa7b   : > { %v3173_v50 = vsel %vm1260_vm9, %v3170_v49, 0 }
 0xa7c   : > { %v3192_v56 = vand.u32 4294901760, %v3173_v50 }
 0xa7e   : > { %v3193_v57 = vsub.f32 %v3173_v50, %v3192_v56  ;;  %3223 = vmatmul.f32.vlgmr.msrb.gmra.mxu1 %v3192_v56 }
 0xa80   : > { %v3194_v34 = vand.u32 4294901760, %v3193_v57  ;;  %3247 = vmatmul.f32.vlgmr.msrb.gmra.mxu2 %v3193_v57 }
 0xa82   : > { %v3195_v38 = vsub.f32 %v3193_v57, %v3194_v34  ;;  %3271 = vmatmul.f32.vlgmr.msrb.gmra.mxu3 %v3194_v34 }
 0xa84   : > { %v3196_v41 = vand.u32 4294901760, %v3195_v38 }
 0xa86   : > { %3197 = vmatmul.f32.vlgmr.msrb.gmra.mxu0 %v3196_v41  ;;  %3317 = vmatmul.f32.vlgmr.msra.gmra.mxu1 %v3192_v56 }
 0xa8e   : > { %3295 = vmatmul.f32.vlgmr.msra.gmra.mxu0 %v3192_v56 }
 0xafb   : > { %v3224_v61 = vpop.f32.mrf.mxu1 }
 0xb03   : > { %v3198_v52 = vpop.f32.mrf.mxu0  ;;  %v3248_v53 = vpop.f32.mrf.mxu2 }
 0xb04   : > { %v3225_v63 = vadd.f32 %v3224_v61, %v3198_v52  ;;  %v3318_v10 = vpop.f32.mrf.mxu1 }
 0xb05   : > { %v3272_v5 = vpop.f32.mrf.mxu3 }
 0xb06   : > { %v3249_v3 = vadd.f32 %v3248_v53, %v3225_v63 }
 0xb08   : > { %v3273_v6 = vadd.f32 %v3272_v5, %v3249_v3 }
 0xb0b   : > { %v3296_v26 = vpop.f32.mrf.mxu0 }
 0xb0c   : > { %v3297_v9 = vadd.f32 %v3296_v26, %v3273_v6 }
 0xb0e   : > { %v3319_v12 = vadd.f32 %v3318_v10, %v3297_v9 }
 0xb10   : > { %v3321_v13 = vadd.f32 %v3319_v12, %v4198_v4 }
 0xb12   : > { %v3325_v15 = vadd.f32 %v3525_v58, %v3321_v13 }
 0xb14   : > { %v3326_v16 = vadd.f32 %v3550_v51, %v3325_v15 }
 0xb16   : > { %3327 = vst.msk [vmem:[%s536_s15] sm:$0xff] %vm540_vm0, %v3326_v16 }
 0xb17 PF: > { %s26_s25 = sadd.s32 1, %s3689_s25  }
 0xb18   : > { %p23_p7 = scmp.ge.s32.totalorder %s26_s25, 4  }
 0xb1a   :  { %25 = sbr.rel (!%p23_p7) target bundleno = 6 (0x6), region = 125 }
 0xb1f   :  { %3347 = vsyncpa [#allocation3], 1 }
 0xb20   :  { %3349 = vsyncpa [#allocation3 + $0x1], 1 }
 0xb21   :  { %3350 = vsyncpa [#allocation5], 1 }
 0xb22   :  { %3351 = vsyncpa [#allocation8], 1 }

</bundles_post_ra>
